<compile_context>
chip_gen: v6e
topology: v6e:2x2x1
jax: 0.10.0
libtpu: 0.0.40
codegen_flags: <defaults>
</compile_context>

<pallas_src>
import functools
import math

import jax
import jax.numpy as jnp
from jax.experimental import pallas as pl
from jax.experimental.pallas import tpu as pltpu


def upconv_bn_relu_kernel(x_ref, bmat_ref, uw_ref, bias_ref, gamma_ref, beta_ref,
                          pmat_ref, o_ref, acc_ref, *, n_batch, w_in, h2, eps):
    kw = pl.program_id(1)
    kt = pl.program_id(2)
    n_kt = pl.num_programs(2)
    w2 = 2 * w_in

    # ---- M1: heavy matmul, accumulated over the K (=C*H) grid axis ----
    @pl.when(kt == 0)
    def _():
        acc_ref[...] = jnp.zeros_like(acc_ref)

    acc_ref[...] += jnp.dot(x_ref[...], bmat_ref[0],
                            preferred_element_type=jnp.float32)

    # ---- at the last K step: column-interp (M2), bias, and (at last kw) BN + ReLU ----
    @pl.when(kt == n_kt - 1)
    def _finalize_kw():
        uw = uw_ref[0]                                    # (W2, W) bf16
        l_bf = acc_ref[...].astype(jnp.bfloat16)          # (N*W, TJ)

        for n in range(n_batch):                          # tiny unrolled loop over batch
            l_n = l_bf[n * w_in:(n + 1) * w_in, :]        # (W, TJ)
            part = jnp.dot(uw, l_n, preferred_element_type=jnp.float32)  # (W2, TJ)

            @pl.when(kw == 0)
            def _(part=part, n=n):
                o_ref[n] = part + bias_ref[...]

            @pl.when(kw > 0)
            def _(part=part, n=n):
                o_ref[n] = o_ref[n] + part

        @pl.when(kw == pl.num_programs(1) - 1)
        def _bn_relu():
            tj = o_ref.shape[2]
            y = o_ref[...].reshape(n_batch * w2, tj)      # (N*W2, TJ) f32
            s1 = jnp.sum(y, axis=0, keepdims=True)        # (1, TJ)
            s2 = jnp.sum(y * y, axis=0, keepdims=True)    # (1, TJ)
            # per-channel totals broadcast back to each of the channel's H2 columns
            tot1 = jnp.dot(s1, pmat_ref[...], precision=jax.lax.Precision.HIGHEST,
                           preferred_element_type=jnp.float32)
            tot2 = jnp.dot(s2, pmat_ref[...], precision=jax.lax.Precision.HIGHEST,
                           preferred_element_type=jnp.float32)
            cnt = float(n_batch * w2 * h2)
            mean = tot1 * (1.0 / cnt)
            var = tot2 * (1.0 / cnt) - mean * mean
            scale = gamma_ref[...] * jax.lax.rsqrt(var + eps)   # (1, TJ)
            shift = beta_ref[...] - mean * scale
            yn = jnp.maximum(y * scale + shift, 0.0)
            o_ref[...] = yn.reshape(n_batch, w2, tj)


def interp_matrix(in_size, out_size):
    """Row-interpolation matrix for bilinear upsampling, align_corners=True."""
    i = jnp.arange(out_size, dtype=jnp.float32)
    src = i * (in_size - 1) / max(out_size - 1, 1)
    i0 = jnp.clip(jnp.floor(src).astype(jnp.int32), 0, in_size - 1)
    i1 = jnp.clip(i0 + 1, 0, in_size - 1)
    frac = src - i0.astype(jnp.float32)
    m = jnp.zeros((out_size, in_size), jnp.float32)
    rows = jnp.arange(out_size)
    m = m.at[rows, i0].add(1.0 - frac)
    m = m.at[rows, i1].add(frac)
    return m


def shift_rows(m, s):
    """out[i] = m[i + s] if in range else 0 (conv tap shift with zero padding)."""
    rows = m.shape[0]
    out = jnp.zeros_like(m)
    lo, hi = max(0, -s), min(rows, rows - s)
    if hi > lo:
        out = out.at[lo:hi].set(m[lo + s:hi + s])
    return out


def _pick_tile(total, target, align, group=1):
    """Largest tile <= target that divides `total` and is a multiple of lcm(align, group);
    falls back to the full extent (always legal for BlockSpec)."""
    if total <= target:
        return total
    step = align * group // math.gcd(align, group)
    t = (target // step) * step
    while t >= step:
        if total % t == 0:
            return t
        t -= step
    return total


def upconv_forward(x, w, b, gamma, beta, eps=1e-5):
    N, C, H, W = x.shape
    O = w.shape[0]
    H2, W2 = 2 * H, 2 * W
    CH, OH2, NW = C * H, O * H2, N * W

    # ---- data-independent parameter prep (interp matrices, weight fold) ----
    Uh = interp_matrix(H, H2)                                         # (H2, H)
    Uw = interp_matrix(W, W2)                                         # (W2, W)
    Uh_s = jnp.stack([shift_rows(Uh, k - 1) for k in range(3)])       # (3, H2, H)  [kh, i, h]
    Uw_s = jnp.stack([shift_rows(Uw, k - 1) for k in range(3)])       # (3, W2, W)  [kw, j, w]

    # BmatT[kw, c*H + h, o*H2 + i] = sum_kh w[o,c,kh,kw] * Uh_s[kh, i, h]
    bmat = jnp.einsum('ocab,aih->bchoi', w, Uh_s,
                      precision=jax.lax.Precision.HIGHEST).reshape(3, CH, OH2)

    # Xrows[n*W + w, c*H + h] = x[n, c, h, w]   (layout plumbing)
    xrows = jnp.transpose(x, (0, 3, 1, 2)).reshape(NW, CH)

    # ---- tiling ----
    TJ = _pick_tile(OH2, target=512, align=128, group=H2)   # lane tile over (o, i), whole channels
    TK = _pick_tile(CH, target=1024, align=128)             # K tile over (c, h)
    n_jt = OH2 // TJ
    n_kt = CH // TK

    # per-column (o,i) parameter rows and the per-channel group-sum matrix
    bias_row = jnp.repeat(b.astype(jnp.float32), H2)[None, :]         # (1, O*H2)
    gamma_row = jnp.repeat(gamma.astype(jnp.float32), H2)[None, :]
    beta_row = jnp.repeat(beta.astype(jnp.float32), H2)[None, :]
    col_group = jnp.arange(TJ) // H2
    pmat = (col_group[:, None] == col_group[None, :]).astype(jnp.float32)   # (TJ, TJ)

    kernel = functools.partial(upconv_bn_relu_kernel,
                               n_batch=N, w_in=W, h2=H2, eps=eps)

    flops = 2 * NW * CH * 3 * OH2 + 2 * 3 * N * W2 * W * OH2 + 8 * N * W2 * OH2
    bytes_accessed = (2 * NW * CH * 3 * n_jt          # x tiles (bf16), re-read per (jt, kw)
                      + 2 * 3 * CH * OH2              # folded weights (bf16), read once
                      + 4 * N * W2 * OH2              # f32 output
                      + 4 * 4 * OH2)                  # small vectors

    grid_spec = pltpu.PrefetchScalarGridSpec(
        num_scalar_prefetch=0,
        grid=(n_jt, 3, n_kt),                         # (lane tile, kw tap, K tile)
        in_specs=[
            pl.BlockSpec((NW, TK), lambda jt, kw, kt: (0, kt)),        # xrows
            pl.BlockSpec((1, TK, TJ), lambda jt, kw, kt: (kw, kt, jt)),  # folded weights
            pl.BlockSpec((1, W2, W), lambda jt, kw, kt: (kw, 0, 0)),   # Uw taps
            pl.BlockSpec((1, TJ), lambda jt, kw, kt: (0, jt)),         # bias row
            pl.BlockSpec((1, TJ), lambda jt, kw, kt: (0, jt)),         # gamma row
            pl.BlockSpec((1, TJ), lambda jt, kw, kt: (0, jt)),         # beta row
            pl.BlockSpec((TJ, TJ), lambda jt, kw, kt: (0, 0)),         # group-sum matrix
        ],
        out_specs=pl.BlockSpec((N, W2, TJ), lambda jt, kw, kt: (0, 0, jt)),
        scratch_shapes=[pltpu.VMEM((NW, TJ), jnp.float32)],
    )

    out_flat = pl.pallas_call(
        kernel,
        out_shape=jax.ShapeDtypeStruct((N, W2, OH2), jnp.float32),
        grid_spec=grid_spec,
        compiler_params=pltpu.CompilerParams(
            dimension_semantics=("parallel", "arbitrary", "arbitrary"),
            vmem_limit_bytes=48 * 1024 * 1024),
        cost_estimate=pl.CostEstimate(flops=int(flops),
                                      transcendentals=int(OH2),
                                      bytes_accessed=int(bytes_accessed)),
    )(xrows.astype(jnp.bfloat16), bmat.astype(jnp.bfloat16), Uw_s.astype(jnp.bfloat16),
      bias_row, gamma_row, beta_row, pmat)

    # lane-dense (N, W2, O*H2) -> NCHW (layout plumbing)
    return out_flat.reshape(N, W2, O, H2).transpose(0, 2, 3, 1)


def reference(x, w, b, gamma, beta, eps=1e-5):
    """Pure-JAX reference of the same math (upsample as interp matmuls, conv, BN, ReLU)."""
    N, C, H, W = x.shape
    Uh = interp_matrix(H, 2 * H)
    Uw = interp_matrix(W, 2 * W)
    hp = jax.lax.Precision.HIGHEST
    xu = jnp.einsum('ih,nchw->nciw', Uh, x, precision=hp)
    xu = jnp.einsum('jw,nciw->ncij', Uw, xu, precision=hp)
    conv = jax.lax.conv_general_dilated(
        xu, w, window_strides=(1, 1), padding=((1, 1), (1, 1)),
        dimension_numbers=('NCHW', 'OIHW', 'NCHW'), precision=hp)
    conv = conv + b[None, :, None, None]
    mean = conv.mean(axis=(0, 2, 3), keepdims=True)
    var = ((conv - mean) ** 2).mean(axis=(0, 2, 3), keepdims=True)
    y = (conv - mean) * jax.lax.rsqrt(var + eps)
    y = y * gamma[None, :, None, None] + beta[None, :, None, None]
    return jnp.maximum(y, 0.0)


if __name__ == "__main__":
    key = jax.random.PRNGKey(0)
    k1, k2, k3, k4, k5 = jax.random.split(key, 5)
    N, C, H, W, O = 2, 4, 16, 16, 8

    x = jax.random.normal(k1, (N, C, H, W), jnp.float32)
    w = jax.random.normal(k2, (O, C, 3, 3), jnp.float32) / ((C * 9) ** 0.5)
    b = 0.1 * jax.random.normal(k3, (O,), jnp.float32)
    gamma = 1.0 + 0.1 * jax.random.normal(k4, (O,), jnp.float32)
    beta = 0.1 * jax.random.normal(k5, (O,), jnp.float32)

    out = jax.block_until_ready(upconv_forward(x, w, b, gamma, beta))
    assert out.shape == (N, O, 2 * H, 2 * W), out.shape

    ref = reference(x, w, b, gamma, beta)
    err = float(jnp.max(jnp.abs(out - ref)))
    assert err < 5e-2, f"max abs err {err} (bf16 MXU operands, f32 accumulation)"
    print("KERNEL_OK")
</pallas_src>

<mosaic_0001>
module attributes {stable_mosaic.version = 11 : i64} {
  func.func @upconv_bn_relu_kernel(%arg0: i32, %arg1: i32, %arg2: i32, %arg3: memref<32x64xbf16, #tpu.memory_space<vmem>>, %arg4: memref<1x64x256xbf16, #tpu.memory_space<vmem>>, %arg5: memref<1x32x16xbf16, #tpu.memory_space<vmem>>, %arg6: memref<1x256xf32, #tpu.memory_space<vmem>>, %arg7: memref<1x256xf32, #tpu.memory_space<vmem>>, %arg8: memref<1x256xf32, #tpu.memory_space<vmem>>, %arg9: memref<256x256xf32, #tpu.memory_space<vmem>>, %arg10: memref<2x32x256xf32, #tpu.memory_space<vmem>>, %arg11: memref<32x256xf32, #tpu.memory_space<vmem>>) attributes {dimension_semantics = [#tpu.dimension_semantics<parallel>, #tpu.dimension_semantics<arbitrary>, #tpu.dimension_semantics<arbitrary>], iteration_bounds = array<i64: 1, 3, 1>, scalar_prefetch = 0 : i64, scratch_operands = 1 : i64, tpu.core_type = #tpu.core_type<tc>, window_params = [{transform_indices = @transform_0, window_bounds = array<i64: 32, 64>}, {transform_indices = @transform_1, window_bounds = array<i64: 1, 64, 256>}, {transform_indices = @transform_2, window_bounds = array<i64: 1, 32, 16>}, {transform_indices = @transform_3, window_bounds = array<i64: 1, 256>}, {transform_indices = @transform_4, window_bounds = array<i64: 1, 256>}, {transform_indices = @transform_5, window_bounds = array<i64: 1, 256>}, {pipeline_mode = #tpu.pipeline_mode<synchronous>, transform_indices = @transform_6, window_bounds = array<i64: 256, 256>}, {transform_indices = @transform_7, window_bounds = array<i64: 2, 32, 256>}]} {
    %c0_i32 = arith.constant 0 : i32
    %0 = arith.cmpi eq, %arg2, %c0_i32 : i32
    %1 = arith.extui %0 : i1 to i32
    %c0_i32_0 = arith.constant 0 : i32
    %2 = arith.cmpi ne, %1, %c0_i32_0 : i32
    scf.if %2 {
      %cst_11 = arith.constant 0.000000e+00 : f32
      %13 = vector.broadcast %cst_11 : f32 to vector<32x256xf32>
      %c0_12 = arith.constant 0 : index
      %c0_13 = arith.constant 0 : index
      %14 = vector.load %arg11[%c0_12, %c0_13] : memref<32x256xf32, #tpu.memory_space<vmem>>, vector<32x256xf32>
      tpu.vector_store %arg11[%c0_12, %c0_13], %13 {strides = array<i32>} : memref<32x256xf32, #tpu.memory_space<vmem>>, vector<32x256xf32>,
    } else {
    }
    %c0 = arith.constant 0 : index
    %c0_1 = arith.constant 0 : index
    %3 = vector.load %arg11[%c0, %c0_1] : memref<32x256xf32, #tpu.memory_space<vmem>>, vector<32x256xf32>
    %c0_2 = arith.constant 0 : index
    %c0_3 = arith.constant 0 : index
    %4 = vector.load %arg3[%c0_2, %c0_3] : memref<32x64xbf16, #tpu.memory_space<vmem>>, vector<32x64xbf16>
    %c0_4 = arith.constant 0 : index
    %c0_5 = arith.constant 0 : index
    %c0_6 = arith.constant 0 : index
    %5 = vector.load %arg4[%c0_4, %c0_5, %c0_6] : memref<1x64x256xbf16, #tpu.memory_space<vmem>>, vector<1x64x256xbf16>
    %6 = vector.shape_cast %5 : vector<1x64x256xbf16> to vector<64x256xbf16>
    %cst = arith.constant dense<0.000000e+00> : vector<32x256xf32>
    %7 = tpu.matmul %4, %6, %cst {dimension_numbers = #tpu.dot_dimension_numbers<[1], [0], [0], [1], [0, 0, 1, 1], [], []>} : vector<32x64xbf16>, vector<64x256xbf16>, vector<32x256xf32> -> vector<32x256xf32>
    %8 = arith.addf %3, %7 : vector<32x256xf32>
    %c0_7 = arith.constant 0 : index
    %c0_8 = arith.constant 0 : index
    %9 = vector.load %arg11[%c0_7, %c0_8] : memref<32x256xf32, #tpu.memory_space<vmem>>, vector<32x256xf32>
    tpu.vector_store %arg11[%c0_7, %c0_8], %8 {strides = array<i32>} : memref<32x256xf32, #tpu.memory_space<vmem>>, vector<32x256xf32>,
    %c0_i32_9 = arith.constant 0 : i32
    %10 = arith.cmpi eq, %arg2, %c0_i32_9 : i32
    %11 = arith.extui %10 : i1 to i32
    %c0_i32_10 = arith.constant 0 : i32
    %12 = arith.cmpi ne, %11, %c0_i32_10 : i32
    scf.if %12 {
      %c0_11 = arith.constant 0 : index
      %c0_12 = arith.constant 0 : index
      %c0_13 = arith.constant 0 : index
      %13 = vector.load %arg5[%c0_11, %c0_12, %c0_13] : memref<1x32x16xbf16, #tpu.memory_space<vmem>>, vector<1x32x16xbf16>
      %14 = vector.shape_cast %13 : vector<1x32x16xbf16> to vector<32x16xbf16>
      %c0_14 = arith.constant 0 : index
      %c0_15 = arith.constant 0 : index
      %15 = vector.load %arg11[%c0_14, %c0_15] : memref<32x256xf32, #tpu.memory_space<vmem>>, vector<32x256xf32>
      %16 = arith.truncf %15 : vector<32x256xf32> to vector<32x256xbf16>
      %17 = vector.extract_strided_slice %16 {offsets = [0, 0], sizes = [16, 256], strides = [1, 1]} : vector<32x256xbf16> to vector<16x256xbf16>
      %cst_16 = arith.constant dense<0.000000e+00> : vector<32x256xf32>
      %18 = tpu.matmul %14, %17, %cst_16 {dimension_numbers = #tpu.dot_dimension_numbers<[1], [0], [0], [1], [0, 0, 1, 1], [], []>} : vector<32x16xbf16>, vector<16x256xbf16>, vector<32x256xf32> -> vector<32x256xf32>
      %c0_i32_17 = arith.constant 0 : i32
      %19 = arith.cmpi eq, %arg1, %c0_i32_17 : i32
      %20 = arith.extui %19 : i1 to i32
      %c0_i32_18 = arith.constant 0 : i32
      %21 = arith.cmpi ne, %20, %c0_i32_18 : i32
      scf.if %21 {
        %c0_27 = arith.constant 0 : index
        %c0_28 = arith.constant 0 : index
        %36 = vector.load %arg6[%c0_27, %c0_28] : memref<1x256xf32, #tpu.memory_space<vmem>>, vector<1x256xf32>
        %37 = vector.broadcast %36 : vector<1x256xf32> to vector<32x256xf32>
        %38 = arith.addf %18, %37 : vector<32x256xf32>
        %c0_29 = arith.constant 0 : index
        %c0_30 = arith.constant 0 : index
        %c0_31 = arith.constant 0 : index
        %39 = vector.load %arg10[%c0_29, %c0_30, %c0_31] : memref<2x32x256xf32, #tpu.memory_space<vmem>>, vector<1x32x256xf32>
        %40 = vector.shape_cast %39 : vector<1x32x256xf32> to vector<32x256xf32>
        %41 = vector.shape_cast %38 : vector<32x256xf32> to vector<1x32x256xf32>
        tpu.vector_store %arg10[%c0_29, %c0_30, %c0_31], %41 {strides = array<i32>} : memref<2x32x256xf32, #tpu.memory_space<vmem>>, vector<1x32x256xf32>,
      } else {
      }
      %c0_i32_19 = arith.constant 0 : i32
      %22 = arith.cmpi sgt, %arg1, %c0_i32_19 : i32
      %23 = arith.extui %22 : i1 to i32
      %c0_i32_20 = arith.constant 0 : i32
      %24 = arith.cmpi ne, %23, %c0_i32_20 : i32
      scf.if %24 {
        %c0_27 = arith.constant 0 : index
        %c0_28 = arith.constant 0 : index
        %c0_29 = arith.constant 0 : index
        %36 = vector.load %arg10[%c0_27, %c0_28, %c0_29] : memref<2x32x256xf32, #tpu.memory_space<vmem>>, vector<1x32x256xf32>
        %37 = vector.shape_cast %36 : vector<1x32x256xf32> to vector<32x256xf32>
        %38 = arith.addf %37, %18 : vector<32x256xf32>
        %c0_30 = arith.constant 0 : index
        %c0_31 = arith.constant 0 : index
        %c0_32 = arith.constant 0 : index
        %39 = vector.load %arg10[%c0_30, %c0_31, %c0_32] : memref<2x32x256xf32, #tpu.memory_space<vmem>>, vector<1x32x256xf32>
        %40 = vector.shape_cast %39 : vector<1x32x256xf32> to vector<32x256xf32>
        %41 = vector.shape_cast %38 : vector<32x256xf32> to vector<1x32x256xf32>
        tpu.vector_store %arg10[%c0_30, %c0_31, %c0_32], %41 {strides = array<i32>} : memref<2x32x256xf32, #tpu.memory_space<vmem>>, vector<1x32x256xf32>,
      } else {
      }
      %25 = vector.extract_strided_slice %16 {offsets = [16, 0], sizes = [16, 256], strides = [1, 1]} : vector<32x256xbf16> to vector<16x256xbf16>
      %cst_21 = arith.constant dense<0.000000e+00> : vector<32x256xf32>
      %26 = tpu.matmul %14, %25, %cst_21 {dimension_numbers = #tpu.dot_dimension_numbers<[1], [0], [0], [1], [0, 0, 1, 1], [], []>} : vector<32x16xbf16>, vector<16x256xbf16>, vector<32x256xf32> -> vector<32x256xf32>
      %c0_i32_22 = arith.constant 0 : i32
      %27 = arith.cmpi eq, %arg1, %c0_i32_22 : i32
      %28 = arith.extui %27 : i1 to i32
      %c0_i32_23 = arith.constant 0 : i32
      %29 = arith.cmpi ne, %28, %c0_i32_23 : i32
      scf.if %29 {
        %c0_27 = arith.constant 0 : index
        %c0_28 = arith.constant 0 : index
        %36 = vector.load %arg6[%c0_27, %c0_28] : memref<1x256xf32, #tpu.memory_space<vmem>>, vector<1x256xf32>
        %37 = vector.broadcast %36 : vector<1x256xf32> to vector<32x256xf32>
        %38 = arith.addf %26, %37 : vector<32x256xf32>
        %c1 = arith.constant 1 : index
        %c0_29 = arith.constant 0 : index
        %c0_30 = arith.constant 0 : index
        %39 = vector.load %arg10[%c1, %c0_29, %c0_30] : memref<2x32x256xf32, #tpu.memory_space<vmem>>, vector<1x32x256xf32>
        %40 = vector.shape_cast %39 : vector<1x32x256xf32> to vector<32x256xf32>
        %41 = vector.shape_cast %38 : vector<32x256xf32> to vector<1x32x256xf32>
        tpu.vector_store %arg10[%c1, %c0_29, %c0_30], %41 {strides = array<i32>} : memref<2x32x256xf32, #tpu.memory_space<vmem>>, vector<1x32x256xf32>,
      } else {
      }
      %c0_i32_24 = arith.constant 0 : i32
      %30 = arith.cmpi sgt, %arg1, %c0_i32_24 : i32
      %31 = arith.extui %30 : i1 to i32
      %c0_i32_25 = arith.constant 0 : i32
      %32 = arith.cmpi ne, %31, %c0_i32_25 : i32
      scf.if %32 {
        %c1 = arith.constant 1 : index
        %c0_27 = arith.constant 0 : index
        %c0_28 = arith.constant 0 : index
        %36 = vector.load %arg10[%c1, %c0_27, %c0_28] : memref<2x32x256xf32, #tpu.memory_space<vmem>>, vector<1x32x256xf32>
        %37 = vector.shape_cast %36 : vector<1x32x256xf32> to vector<32x256xf32>
        %38 = arith.addf %37, %26 : vector<32x256xf32>
        %c1_29 = arith.constant 1 : index
        %c0_30 = arith.constant 0 : index
        %c0_31 = arith.constant 0 : index
        %39 = vector.load %arg10[%c1_29, %c0_30, %c0_31] : memref<2x32x256xf32, #tpu.memory_space<vmem>>, vector<1x32x256xf32>
        %40 = vector.shape_cast %39 : vector<1x32x256xf32> to vector<32x256xf32>
        %41 = vector.shape_cast %38 : vector<32x256xf32> to vector<1x32x256xf32>
        tpu.vector_store %arg10[%c1_29, %c0_30, %c0_31], %41 {strides = array<i32>} : memref<2x32x256xf32, #tpu.memory_space<vmem>>, vector<1x32x256xf32>,
      } else {
      }
      %c2_i32 = arith.constant 2 : i32
      %33 = arith.cmpi eq, %arg1, %c2_i32 : i32
      %34 = arith.extui %33 : i1 to i32
      %c0_i32_26 = arith.constant 0 : i32
      %35 = arith.cmpi ne, %34, %c0_i32_26 : i32
      scf.if %35 {
        %c0_27 = arith.constant 0 : index
        %c0_28 = arith.constant 0 : index
        %c0_29 = arith.constant 0 : index
        %36 = vector.load %arg10[%c0_27, %c0_28, %c0_29] : memref<2x32x256xf32, #tpu.memory_space<vmem>>, vector<2x32x256xf32>
        %37 = vector.shape_cast %36 : vector<2x32x256xf32> to vector<64x256xf32>
        %cst_30 = arith.constant dense<0.000000e+00> : vector<256xf32>
        %38 = vector.multi_reduction <add>, %37, %cst_30 [0] : vector<64x256xf32> to vector<256xf32>
        %39 = vector.shape_cast %38 : vector<256xf32> to vector<1x256xf32>
        %40 = arith.mulf %37, %37 : vector<64x256xf32>
        %cst_31 = arith.constant dense<0.000000e+00> : vector<256xf32>
        %41 = vector.multi_reduction <add>, %40, %cst_31 [0] : vector<64x256xf32> to vector<256xf32>
        %42 = vector.shape_cast %41 : vector<256xf32> to vector<1x256xf32>
        %c0_32 = arith.constant 0 : index
        %c0_33 = arith.constant 0 : index
        %43 = vector.load %arg9[%c0_32, %c0_33] : memref<256x256xf32, #tpu.memory_space<vmem>>, vector<256x256xf32>
        %cst_34 = arith.constant dense<0.000000e+00> : vector<1x256xf32>
        %44 = tpu.matmul %39, %43, %cst_34 {dimension_numbers = #tpu.dot_dimension_numbers<[1], [0], [0], [1], [0, 0, 1, 1], [], []>, precision = #tpu.contract_precision<fp32>} : vector<1x256xf32>, vector<256x256xf32>, vector<1x256xf32> -> vector<1x256xf32>
        %c0_35 = arith.constant 0 : index
        %c0_36 = arith.constant 0 : index
        %45 = vector.load %arg9[%c0_35, %c0_36] : memref<256x256xf32, #tpu.memory_space<vmem>>, vector<256x256xf32>
        %cst_37 = arith.constant dense<0.000000e+00> : vector<1x256xf32>
        %46 = tpu.matmul %42, %45, %cst_37 {dimension_numbers = #tpu.dot_dimension_numbers<[1], [0], [0], [1], [0, 0, 1, 1], [], []>, precision = #tpu.contract_precision<fp32>} : vector<1x256xf32>, vector<256x256xf32>, vector<1x256xf32> -> vector<1x256xf32>
        %cst_38 = arith.constant 4.8828125E-4 : f32
        %47 = vector.broadcast %cst_38 : f32 to vector<1x256xf32>
        %48 = arith.mulf %44, %47 : vector<1x256xf32>
        %cst_39 = arith.constant 4.8828125E-4 : f32
        %49 = vector.broadcast %cst_39 : f32 to vector<1x256xf32>
        %50 = arith.mulf %46, %49 : vector<1x256xf32>
        %51 = arith.mulf %48, %48 : vector<1x256xf32>
        %52 = arith.subf %50, %51 : vector<1x256xf32>
        %c0_40 = arith.constant 0 : index
        %c0_41 = arith.constant 0 : index
        %53 = vector.load %arg7[%c0_40, %c0_41] : memref<1x256xf32, #tpu.memory_space<vmem>>, vector<1x256xf32>
        %cst_42 = arith.constant 9.99999974E-6 : f32
        %54 = vector.broadcast %cst_42 : f32 to vector<1x256xf32>
        %55 = arith.addf %52, %54 : vector<1x256xf32>
        %56 = math.rsqrt %55 : vector<1x256xf32>
        %57 = arith.mulf %53, %56 : vector<1x256xf32>
        %c0_43 = arith.constant 0 : index
        %c0_44 = arith.constant 0 : index
        %58 = vector.load %arg8[%c0_43, %c0_44] : memref<1x256xf32, #tpu.memory_space<vmem>>, vector<1x256xf32>
        %59 = arith.mulf %48, %57 : vector<1x256xf32>
        %60 = arith.subf %58, %59 : vector<1x256xf32>
        %61 = vector.broadcast %57 : vector<1x256xf32> to vector<64x256xf32>
        %62 = arith.mulf %37, %61 : vector<64x256xf32>
        %63 = vector.broadcast %60 : vector<1x256xf32> to vector<64x256xf32>
        %64 = arith.addf %62, %63 : vector<64x256xf32>
        %cst_45 = arith.constant 0.000000e+00 : f32
        %65 = vector.broadcast %cst_45 : f32 to vector<64x256xf32>
        %66 = arith.maximumf %64, %65 : vector<64x256xf32>
        %67 = vector.shape_cast %66 : vector<64x256xf32> to vector<2x32x256xf32>
        %c0_46 = arith.constant 0 : index
        %c0_47 = arith.constant 0 : index
        %c0_48 = arith.constant 0 : index
        %68 = vector.load %arg10[%c0_46, %c0_47, %c0_48] : memref<2x32x256xf32, #tpu.memory_space<vmem>>, vector<2x32x256xf32>
        tpu.vector_store %arg10[%c0_46, %c0_47, %c0_48], %67 {strides = array<i32>} : memref<2x32x256xf32, #tpu.memory_space<vmem>>, vector<2x32x256xf32>,
      } else {
      }
    } else {
    }
    return
  }
  func.func @transform_0(%arg0: i32, %arg1: i32, %arg2: i32) -> (i32, i32) {
    %c0_i32 = arith.constant 0 : i32
    %c0_i32_0 = arith.constant 0 : i32
    return %c0_i32, %arg2 : i32, i32
  }
  func.func @transform_1(%arg0: i32, %arg1: i32, %arg2: i32) -> (i32, i32, i32) {
    %c0_i32 = arith.constant 0 : i32
    return %arg1, %arg2, %arg0 : i32, i32, i32
  }
  func.func @transform_2(%arg0: i32, %arg1: i32, %arg2: i32) -> (i32, i32, i32) {
    %c0_i32 = arith.constant 0 : i32
    %c0_i32_0 = arith.constant 0 : i32
    %c0_i32_1 = arith.constant 0 : i32
    return %arg1, %c0_i32, %c0_i32_0 : i32, i32, i32
  }
  func.func @transform_3(%arg0: i32, %arg1: i32, %arg2: i32) -> (i32, i32) {
    %c0_i32 = arith.constant 0 : i32
    %c0_i32_0 = arith.constant 0 : i32
    return %c0_i32, %arg0 : i32, i32
  }
  func.func @transform_4(%arg0: i32, %arg1: i32, %arg2: i32) -> (i32, i32) {
    %c0_i32 = arith.constant 0 : i32
    %c0_i32_0 = arith.constant 0 : i32
    return %c0_i32, %arg0 : i32, i32
  }
  func.func @transform_5(%arg0: i32, %arg1: i32, %arg2: i32) -> (i32, i32) {
    %c0_i32 = arith.constant 0 : i32
    %c0_i32_0 = arith.constant 0 : i32
    return %c0_i32, %arg0 : i32, i32
  }
  func.func @transform_6(%arg0: i32, %arg1: i32, %arg2: i32) -> (i32, i32) {
    %c0_i32 = arith.constant 0 : i32
    %c0_i32_0 = arith.constant 0 : i32
    %c0_i32_1 = arith.constant 0 : i32
    return %c0_i32, %c0_i32_0 : i32, i32
  }
  func.func @transform_7(%arg0: i32, %arg1: i32, %arg2: i32) -> (i32, i32, i32) {
    %c0_i32 = arith.constant 0 : i32
    %c0_i32_0 = arith.constant 0 : i32
    %c0_i32_1 = arith.constant 0 : i32
    return %c0_i32, %c0_i32_0, %arg0 : i32, i32, i32
  }
}

</mosaic_0001>

<bundles_post_ra>
// kernel: tpu_custom_call.1
= control target key start
LH: loop header
LB: loop body
LE: loop exit
PB: predicated region body
PF: predicated region fallthrough
CT: control target
= control target key end

     0   :  { %12 = vsyncpa [#allocation4], 0  ;;  %s6310_s0 = inlined_call_operand.vmem [shape: bf16[32,64], index: 0, kind: input, shape index: {}]   ;;  %s6311_s1 = inlined_call_operand.hbm [shape: bf16[3,64,256], index: 1, kind: input, shape index: {}]   ;;  %s6312_s2 = inlined_call_operand.vmem [shape: bf16[3,32,16], index: 2, kind: input, shape index: {}]   ;;  %s6313_s3 = inlined_call_operand.vmem [shape: f32[1,256], index: 3, kind: input, shape index: {}]   ;;  %s6314_s4 = inlined_call_operand.vmem [shape: f32[1,256], index: 4, kind: input, shape index: {}]   ;;  %s6315_s5 = inlined_call_operand.vmem [shape: f32[1,256], index: 5, kind: input, shape index: {}]   ;;  %s6316_s6 = inlined_call_operand.hbm [shape: f32[256,256], index: 6, kind: input, shape index: {}]   ;;  %s6317_s7 = inlined_call_operand.hbm [shape: f32[2,32,256], index: 7, kind: output, shape index: {}]  }
   0x1   :  { %14 = vsyncpa [#allocation4 + $0x1], 0 }
   0x2   :  { %15 = vsyncpa [#allocation7], 0 }
   0x3   :  { %16 = vsyncpa [#allocation5], 0  ;;  %s4216_s24 = smov 0   ;;  %s4218_s25 = smov 0  }
   0x4   :  { %s4220_s26 = smov 0   ;;  %s4222_s27 = smov 0  }
   0x5   :  { %s4224_s28 = smov 0   ;;  %s4226_s29 = smov 0  }
   0x6 LB: > { %s6318_s30 = sadd.s32 4294967295, %s4163_s29   ;;  %p91_p0 = scmp.ne.s32.totalorder %s4147_s25, %s4143_s24  ;;  %s4163_s29 = sphi %s4226_s29, %s22_s29   ;;  %s4159_s28 = sphi %s4224_s28, %s7432_s28   ;;  %s4155_s27 = sphi %s4222_s27, %s7431_s27   ;;  %s4151_s26 = sphi %s4220_s26, %s7430_s26   ;;  %s4147_s25 = sphi %s4218_s25, %s7429_s25   ;;  %s4143_s24 = sphi %s4216_s24, %s7428_s24  }
   0x7   : > { %p4248_p1 = scmp.eq.s32.totalorder %s6318_s30, 0  ;;  %p3866_p2 = scmp.ge.s32.totalorder %s4163_s29, 1 }
   0x8   : > { %p253_p3 = scmp.lt.s32.totalorder %s4163_s29, 4  ;;  %s4165_s11 = smov [#allocation6]  }
   0x9   : > { %p4256_p4 = por %p4248_p1, %p91_p0  ;;  %s296_s12 = sshll.u32 %s4165_s11, 4  ;;  %s297_s12 = int_to_ptr.vmem [resolvable:$true] %s296_s12 }
   0xa   : > { %p4260_p5 = pnand %p3866_p2, %p253_p3  ;;  %s37_s14 = sadd.s32 1, %s4159_s28 }
   0xb   : > { %s4038_s15 = scalar_lea.vmem %s297_s12, 8192  ;;  %p4046_p12 = scmp.lt.s32.totalorder %s297_s12, %s297_s12 }
   0xc   : > { %p3920_p6 = pneg %p4260_p5  ;;  %p4039_p9 = scmp.ne.s32.totalorder %s297_s12, %s4038_s15 }
   0xd   : > { %p4047_p13 = scmp.lt.s32.totalorder %s4038_s15, %s4038_s15 }
   0xe   : > { %p4268_p7 = pnand %p3920_p6, %p4248_p1 }
   0xf   : > { %p4048_p0 = por %p4047_p13, %p4046_p12 }
  0x10   : > { %p4029_p8 = pneg %p4268_p7 }
  0x12   : > { %p4041_p10 = pnand %p4039_p9, %p4029_p8 }
  0x14   : > { %p4042_p11 = pneg %p4041_p10 }
  0x16   : > { %p4049_p2 = pnand %p4048_p0, %p4042_p11 }
  0x18   : > { %4052 = shalt.err (!%p4049_p2)
}
  0x19   : > { %s4166_s16 = smov 256   ;;  %s4167_s17 = smov 16  }
  0x1a   : > { %3923 = dma.hbm_to_vmem [thread:$0]  (!%p4268_p7), %s6316_s6, 8192, %s297_s12, [#allocation7], %s4166_s16, %s4166_s16, %s4167_s17  }
  0x1b   : > { %p39_p3 = scmp.ge.s32.totalorder %s37_s14, 3  ;;  %s78_s20 = sadd.s32 1, %s4151_s26 }
  0x1c   : > { %p85_p6 = scmp.ne.s32.totalorder %s4151_s26, %s4147_s25  ;;  %p86_p8 = scmp.eq.s32.totalorder %s4163_s29, 0 }
  0x1d   : > { %s7434_s14 = smov (%p39_p3, %s37_s14), 0  ;;  %p3929_p10 = scmp.lt.s32.totalorder %s4163_s29, 3 }
  0x1e   : > { %p87_p9 = por %p86_p8, %p85_p6  ;;  %s71_s21 = ssub.s32 %s4159_s28, %s7434_s14 }
  0x1f   : > { %s310_s22 = sand.u32 1, %s4151_s26   ;;  %p76_p11 = scmp.eq.s32.totalorder %s71_s21, 0 }
  0x20   : > { %s3873_s23 = sshll.u32 %s310_s22, 6  ;;  %s3908_s24 = sshll.u32 %s4159_s28, 10 }
  0x21   : > { %s4292_s11 = scalar_select %p76_p11, %s4151_s26, %s78_s20  }
  0x22   : > { %s325_s12 = scalar_lea.hbm %s6311_s1, %s3908_s24  ;;  %s314_s16 = scalar_lea.vmem [#allocation3], %s3873_s23 }
  0x23   : > { %s326_s17 = sshll.u32 %s314_s16, 4  ;;  %p4297_p7 = pnand %p3929_p10, %p87_p9  ;;  %s327_s17 = int_to_ptr.vmem [resolvable:$true] %s326_s17 }
  0x24   : > { %s311_s19 = scalar_lea.sflag [#allocation4], %s310_s22  ;;  %s4066_s21 = scalar_lea.vmem %s327_s17, 1024 }
  0x25   : > { %p4055_p12 = pneg %p4297_p7  ;;  %p4067_p13 = scmp.ne.s32.totalorder %s327_s17, %s4066_s21 }
  0x26   : > { %s4168_s20 = smov [#allocation3]  }
  0x27   : > { %p4069_p0 = pnand %p4067_p13, %p4055_p12  ;;  %s4071_s30 = sshll.u32 %s4168_s20, 4  ;;  %s4072_s30 = int_to_ptr.vmem [resolvable:$false] %s4071_s30 }
  0x28   : > { %s4073_s13 = scalar_lea.vmem %s4072_s30, 2048  ;;  %p4074_p3 = scmp.lt.s32.totalorder %s327_s17, %s4072_s30 }
  0x29   : > { %p4070_p2 = pneg %p4069_p0  ;;  %p4075_p6 = scmp.lt.s32.totalorder %s4073_s13, %s4066_s21 }
  0x2b   : > { %p4076_p8 = por %p4075_p6, %p4074_p3 }
  0x2d   : > { %p4077_p9 = pnand %p4076_p8, %p4070_p2 }
  0x2f   : > { %4080 = shalt.err (!%p4077_p9)
}
  0x30   : > { %s4169_s23 = smov 128   ;;  %s4170_s24 = smov 8  }
  0x31   : > { %3927 = dma.hbm_to_vmem [thread:$0]  (!%p4297_p7), %s325_s12, 1024, %s327_s17, %s311_s19, %s4169_s23, %s4169_s23, %s4170_s24  }
  0x32   : > { %346 = sbr.rel (%p4260_p5) target bundleno = 1506 (0x5e2), region = 48  ;;  %s348_s22 = sand.u32 (!%p4260_p5), 1, %s4147_s25  }
  0x33   : > { %s3877_s15 = sshll.u32 (!%p4260_p5), %s348_s22, 6  ;;  %s349_s16 = scalar_lea.sflag (!%p4260_p5), [#allocation4], %s348_s22 }
  0x34   : > { %s352_s20 = scalar_lea.vmem (!%p4260_p5), [#allocation3], %s3877_s15 }
  0x37   : > { %4130 = dma.done.wait (%p4256_p4), %s349_s16, 1024  }
  0x38   : > { %4132 = vsyncadd (%p4256_p4), %s349_s16, 4294966272 }
  0x39   : > { %4134 = dma.done.wait (%p4248_p1), [#allocation7], 8192  }
  0x3a   : > { %4136 = vsyncadd (%p4248_p1), [#allocation7], 4294959104  ;;  %v4171_v0 = vmov 0   ;;  %v3991_v1 = vld [vmem:[%s352_s20 + $0x34] ss:$8 sps:$4 sm:$0xff]   ;;  %v4003_v9 = vld [vmem:[%s6310_s0] sm:$0xff]  }
  0x3b   : > { %552 = vmatprep.mubr.bf16.mxu0 %v4171_v0  ;;  %657 = vmatprep.mubr.bf16.mxu1 %v4171_v0  ;;  %v3993_v2 = vld [vmem:[%s352_s20 + $0x30] ss:$8 sps:$4 sm:$0xff]   ;;  %v3994_v3 = vld [vmem:[%s352_s20 + $0x24] ss:$8 sps:$4 sm:$0xff]   ;;  %v3996_v4 = vld [vmem:[%s352_s20 + $0x20] ss:$8 sps:$4 sm:$0xff]  }
  0x3c   : > { %528 = vmatprep.subr.bf16.mxu0 %v3991_v1  ;;  %v3997_v5 = vld [vmem:[%s352_s20 + $0x14] ss:$8 sps:$4 sm:$0xff]   ;;  %v3999_v6 = vld [vmem:[%s352_s20 + $0x10] ss:$8 sps:$4 sm:$0xff]   ;;  %v4000_v7 = vld [vmem:[%s352_s20 + $0x4] ss:$8 sps:$4 sm:$0xff]  }
  0x3d   : > { %529 = vmatpush1.bf16.msra.mxu0 %v3993_v2  ;;  %v4002_v8 = vld [vmem:[%s352_s20] ss:$8 sps:$4 sm:$0xff]   ;;  %vm513_vm0 = vcmask 523264   ;;  %p409_p1 = scmp.lt.s32.totalorder %s4155_s27, 2  ;;  %vm618_vm1 = vcmask 130048   ;;  %p3897_p4 = scmp.ne.s32.totalorder %s4155_s27, 0 }
  0x3e   : > { %530 = vmatprep.subr.bf16.mxu0 %v3994_v3  ;;  %v4005_v10 = vld [vmem:[%s6310_s0 + $0x8] sm:$0xff]  }
  0x3f   : > { %s410_s9 = scalar_select %p409_p1, %s4155_s27, 2 }
  0x41   : > { %531 = vmatpush1.bf16.msra.mxu0 %v3996_v4  ;;  %s3909_s10 = sshll.u32 %s410_s9, 4 }
  0x42   : > { %532 = vmatprep.subr.bf16.mxu0 %v3997_v5  ;;  %s413_s18 = scalar_lea.vmem %s6312_s2, %s3909_s10 }
  0x43   : > { %v4330_v17 = vld [vmem:[%s413_s18] sm:$0xff]   ;;  %v4335_v18 = vld [vmem:[%s413_s18 + $0x8] sm:$0xff]  }
  0x45   : > { %533 = vmatpush1.bf16.msra.mxu0 %v3999_v6 }
  0x46   : > { %534 = vmatprep.subr.bf16.mxu0 %v4000_v7 }
  0x49   : > { %535 = vmatpush1.bf16.msra.mxu0 %v4002_v8 }
  0x4c   : > { %3891 = vmatmul.mubr.msk.bf16.vlgmr.msra.gmra.mxu0 %vm513_vm0, %v4003_v9 }
  0x4d   : > { %562 = vmatprep.mubr.bf16.mxu0 %v4171_v0 }
  0x54   : > { %3892 = vmatmul.mubr.msk.bf16.gmra.mxu0 %vm513_vm0, %v4005_v10 }
 0x10c   : > { %v554_v11 = vpop.f32.mrf.mxu0 }
 0x10e   : > { %v556_v12 = vpop.f32.mrf.mxu0 }
 0x110   : > { %v558_v13 = vpop.f32.mrf.mxu0 }
 0x111   : > { %v604_v16 = vpack.c.bf16 %v558_v13, %v554_v11 }
 0x112   : > { %v560_v14 = vpop.f32.mrf.mxu0 }
 0x113   : > { %v605_v15 = vpack.c.bf16 %v560_v14, %v556_v12 }
 0x114   : > { %v4339_v19 = vpop.f32.mrf.mxu0 }
 0x115   : > { %639 = vmatprep.subr.bf16.mxu1 %v605_v15 }
 0x116   : > { %640 = vmatpush1.bf16.msra.mxu1 %v604_v16  ;;  %v4341_v20 = vpop.f32.mrf.mxu0 }
 0x118   : > { %v4343_v21 = vpop.f32.mrf.mxu0 }
 0x119   : > { %3895 = vmatmul.mubr.msk.bf16.vlgmr.msra.gmra.mxu1 %vm618_vm1, %v4330_v17  ;;  %v606_v22 = vpack.c.bf16 %v4343_v21, %v4339_v19 }
 0x11a   : > { %667 = vmatprep.mubr.bf16.mxu1 %v4171_v0  ;;  %v4347_v23 = vpop.f32.mrf.mxu0 }
 0x11b   : > { %v607_v24 = vpack.c.bf16 %v4347_v23, %v4341_v20 }
 0x121   : > { %3896 = vmatmul.mubr.msk.bf16.gmra.mxu1 %vm618_vm1, %v4335_v18 }
 0x1d9   : > { %v659_v25 = vpop.f32.mrf.mxu1 }
 0x1db   : > { %v661_v26 = vpop.f32.mrf.mxu1 }
 0x1dd   : > { %v663_v27 = vpop.f32.mrf.mxu1 }
 0x1df   : > { %v665_v28 = vpop.f32.mrf.mxu1 }
 0x1e1   : > { %v669_v29 = vpop.f32.mrf.mxu1 }
 0x1e3   : > { %v671_v30 = vpop.f32.mrf.mxu1  ;;  %681 = sbr.rel (%p3897_p4) target bundleno = 502 (0x1f6), region = 68 }
 0x1e5   : > { %v673_v31 = vpop.f32.mrf.mxu1 }
 0x1e7   : > { %v675_v32 = vpop.f32.mrf.mxu1 }
 0x1e8   : > { %v684_v33 = vlaneseq  ;;  %v682_v35 = vld [vmem:[%s6313_s3] sm:$0x3] }
 0x1ea   : > { %v685_v34 = vshrl.u32 %v684_v33, 7 }
 0x1ec   : > { %v686_v36 = vsub.s32 0, %v685_v34  ;;  %v690_v37 = vsub.s32 1, %v685_v34 }
 0x1ee   : > { %v687_v38 = vrot.slane %v682_v35, %v686_v36  ;;  %v691_v39 = vrot.slane %v682_v35, %v690_v37 }
 0x1f0   : > { %v694_v40 = vadd.f32 %v687_v38, %v659_v25  ;;  %v695_v41 = vadd.f32 %v691_v39, %v661_v26  ;;  %v696_v42 = vadd.f32 %v687_v38, %v663_v27  ;;  %v697_v43 = vadd.f32 %v691_v39, %v665_v28 }
 0x1f1   : > { %v698_v44 = vadd.f32 %v687_v38, %v669_v29  ;;  %v699_v45 = vadd.f32 %v691_v39, %v671_v30  ;;  %v700_v46 = vadd.f32 %v687_v38, %v673_v31  ;;  %v701_v47 = vadd.f32 %v691_v39, %v675_v32 }
 0x1f2   : > { %702 = vst [vmem:[#allocation8] sm:$0xff] %v694_v40  ;;  %703 = vst [vmem:[#allocation8 + $0x8] sm:$0xff] %v695_v41 }
 0x1f3   : > { %704 = vst [vmem:[#allocation8 + $0x10] sm:$0xff] %v696_v42  ;;  %705 = vst [vmem:[#allocation8 + $0x18] sm:$0xff] %v697_v43 }
 0x1f4   : > { %706 = vst [vmem:[#allocation8 + $0x20] sm:$0xff] %v698_v44  ;;  %707 = vst [vmem:[#allocation8 + $0x28] sm:$0xff] %v699_v45 }
 0x1f5   : > { %708 = vst [vmem:[#allocation8 + $0x30] sm:$0xff] %v700_v46  ;;  %709 = vst [vmem:[#allocation8 + $0x38] sm:$0xff] %v701_v47 }
 0x1f6 PF: > { %p3898_p5 = scmp.le.s32.totalorder %s4155_s27, 0 }
 0x1f8   : > { %713 = sbr.rel (%p3898_p5) target bundleno = 516 (0x204), region = 72 }
 0x1fd   : > { %v714_v48 = vld [vmem:[#allocation8] sm:$0xff]  ;;  %v715_v49 = vld [vmem:[#allocation8 + $0x8] sm:$0xff]  ;;  %v716_v50 = vld [vmem:[#allocation8 + $0x10] sm:$0xff] }
 0x1fe   : > { %v722_v51 = vadd.f32 %v714_v48, %v659_v25  ;;  %v723_v52 = vadd.f32 %v715_v49, %v661_v26  ;;  %v724_v53 = vadd.f32 %v716_v50, %v663_v27  ;;  %v717_v54 = vld [vmem:[#allocation8 + $0x18] sm:$0xff]  ;;  %v718_v55 = vld [vmem:[#allocation8 + $0x20] sm:$0xff]  ;;  %v719_v56 = vld [vmem:[#allocation8 + $0x28] sm:$0xff] }
 0x1ff   : > { %v725_v57 = vadd.f32 %v717_v54, %v665_v28  ;;  %v726_v58 = vadd.f32 %v718_v55, %v669_v29  ;;  %v727_v59 = vadd.f32 %v719_v56, %v671_v30  ;;  %v720_v60 = vld [vmem:[#allocation8 + $0x30] sm:$0xff]  ;;  %v721_v61 = vld [vmem:[#allocation8 + $0x38] sm:$0xff] }
 0x200   : > { %730 = vst [vmem:[#allocation8] sm:$0xff] %v722_v51  ;;  %731 = vst [vmem:[#allocation8 + $0x8] sm:$0xff] %v723_v52  ;;  %v728_v62 = vadd.f32 %v720_v60, %v673_v31  ;;  %v729_v63 = vadd.f32 %v721_v61, %v675_v32 }
 0x201   : > { %732 = vst [vmem:[#allocation8 + $0x10] sm:$0xff] %v724_v53  ;;  %733 = vst [vmem:[#allocation8 + $0x18] sm:$0xff] %v725_v57 }
 0x202   : > { %734 = vst [vmem:[#allocation8 + $0x20] sm:$0xff] %v726_v58  ;;  %735 = vst [vmem:[#allocation8 + $0x28] sm:$0xff] %v727_v59 }
 0x203   : > { %736 = vst [vmem:[#allocation8 + $0x30] sm:$0xff] %v728_v62  ;;  %737 = vst [vmem:[#allocation8 + $0x38] sm:$0xff] %v729_v63 }
 0x204 PF: > { %752 = vmatprep.subr.bf16.mxu1 %v607_v24  ;;  %770 = vmatprep.mubr.bf16.mxu1 %v4171_v0 }
 0x205   : > { %753 = vmatpush1.bf16.msra.mxu1 %v606_v22 }
 0x208   : > { %3899 = vmatmul.mubr.msk.bf16.vlgmr.msra.gmra.mxu1 %vm618_vm1, %v4330_v17 }
 0x209   : > { %780 = vmatprep.mubr.bf16.mxu1 %v4171_v0 }
 0x210   : > { %3900 = vmatmul.mubr.msk.bf16.gmra.mxu1 %vm618_vm1, %v4335_v18 }
 0x2c8   : > { %v772_v1 = vpop.f32.mrf.mxu1 }
 0x2ca   : > { %v774_v2 = vpop.f32.mrf.mxu1 }
 0x2cc   : > { %v776_v3 = vpop.f32.mrf.mxu1 }
 0x2ce   : > { %v778_v4 = vpop.f32.mrf.mxu1 }
 0x2d0   : > { %v782_v5 = vpop.f32.mrf.mxu1 }
 0x2d2   : > { %v784_v6 = vpop.f32.mrf.mxu1  ;;  %793 = sbr.rel (%p3897_p4) target bundleno = 741 (0x2e5), region = 76 }
 0x2d4   : > { %v786_v7 = vpop.f32.mrf.mxu1 }
 0x2d6   : > { %v788_v8 = vpop.f32.mrf.mxu1 }
 0x2d7   : > { %v796_v9 = vlaneseq  ;;  %v794_v0 = vld [vmem:[%s6313_s3] sm:$0x3] }
 0x2d9   : > { %v797_v10 = vshrl.u32 %v796_v9, 7 }
 0x2db   : > { %v798_v11 = vsub.s32 0, %v797_v10  ;;  %v802_v12 = vsub.s32 1, %v797_v10 }
 0x2dd   : > { %v799_v13 = vrot.slane %v794_v0, %v798_v11  ;;  %v803_v14 = vrot.slane %v794_v0, %v802_v12 }
 0x2df   : > { %v806_v15 = vadd.f32 %v799_v13, %v772_v1  ;;  %v807_v16 = vadd.f32 %v803_v14, %v774_v2  ;;  %v808_v17 = vadd.f32 %v799_v13, %v776_v3  ;;  %v809_v18 = vadd.f32 %v803_v14, %v778_v4 }
 0x2e0   : > { %v810_v19 = vadd.f32 %v799_v13, %v782_v5  ;;  %v811_v20 = vadd.f32 %v803_v14, %v784_v6  ;;  %v812_v21 = vadd.f32 %v799_v13, %v786_v7  ;;  %v813_v22 = vadd.f32 %v803_v14, %v788_v8 }
 0x2e1   : > { %815 = vst [vmem:[#allocation8 + $0x40] sm:$0xff] %v806_v15  ;;  %816 = vst [vmem:[#allocation8 + $0x48] sm:$0xff] %v807_v16 }
 0x2e2   : > { %817 = vst [vmem:[#allocation8 + $0x50] sm:$0xff] %v808_v17  ;;  %818 = vst [vmem:[#allocation8 + $0x58] sm:$0xff] %v809_v18 }
 0x2e3   : > { %819 = vst [vmem:[#allocation8 + $0x60] sm:$0xff] %v810_v19  ;;  %820 = vst [vmem:[#allocation8 + $0x68] sm:$0xff] %v811_v20 }
 0x2e4   : > { %821 = vst [vmem:[#allocation8 + $0x70] sm:$0xff] %v812_v21  ;;  %822 = vst [vmem:[#allocation8 + $0x78] sm:$0xff] %v813_v22 }
 0x2e5 PF: > { %825 = sbr.rel (%p3898_p5) target bundleno = 753 (0x2f1), region = 80 }
 0x2ea   : > { %v827_v23 = vld [vmem:[#allocation8 + $0x40] sm:$0xff]  ;;  %v828_v24 = vld [vmem:[#allocation8 + $0x48] sm:$0xff]  ;;  %v829_v25 = vld [vmem:[#allocation8 + $0x50] sm:$0xff] }
 0x2eb   : > { %v835_v26 = vadd.f32 %v827_v23, %v772_v1  ;;  %v836_v27 = vadd.f32 %v828_v24, %v774_v2  ;;  %v837_v28 = vadd.f32 %v829_v25, %v776_v3  ;;  %v830_v29 = vld [vmem:[#allocation8 + $0x58] sm:$0xff]  ;;  %v831_v30 = vld [vmem:[#allocation8 + $0x60] sm:$0xff]  ;;  %v832_v31 = vld [vmem:[#allocation8 + $0x68] sm:$0xff] }
 0x2ec   : > { %v838_v32 = vadd.f32 %v830_v29, %v778_v4  ;;  %v839_v33 = vadd.f32 %v831_v30, %v782_v5  ;;  %v840_v34 = vadd.f32 %v832_v31, %v784_v6  ;;  %v833_v35 = vld [vmem:[#allocation8 + $0x70] sm:$0xff]  ;;  %v834_v36 = vld [vmem:[#allocation8 + $0x78] sm:$0xff] }
 0x2ed   : > { %843 = vst [vmem:[#allocation8 + $0x40] sm:$0xff] %v835_v26  ;;  %844 = vst [vmem:[#allocation8 + $0x48] sm:$0xff] %v836_v27  ;;  %v841_v37 = vadd.f32 %v833_v35, %v786_v7  ;;  %v842_v38 = vadd.f32 %v834_v36, %v788_v8 }
 0x2ee   : > { %845 = vst [vmem:[#allocation8 + $0x50] sm:$0xff] %v837_v28  ;;  %846 = vst [vmem:[#allocation8 + $0x58] sm:$0xff] %v838_v32 }
 0x2ef   : > { %847 = vst [vmem:[#allocation8 + $0x60] sm:$0xff] %v839_v33  ;;  %848 = vst [vmem:[#allocation8 + $0x68] sm:$0xff] %v840_v34 }
 0x2f0   : > { %849 = vst [vmem:[#allocation8 + $0x70] sm:$0xff] %v841_v37  ;;  %850 = vst [vmem:[#allocation8 + $0x78] sm:$0xff] %v842_v38 }
 0x2f1 PF: > { %p3903_p10 = scmp.ne.s32.totalorder %s4155_s27, 2 }
 0x2f3   : > { %854 = sbr.rel (%p3903_p10) target bundleno = 1490 (0x5d2), region = 84 }
 0x2f8   : > { %v970_v39 = vld [vmem:[#allocation6 + $0xf8] sm:$0xff]  ;;  %v969_v40 = vld [vmem:[#allocation6 + $0xf0] sm:$0xff]  ;;  %v968_v41 = vld [vmem:[#allocation6 + $0xe8] sm:$0xff] }
 0x2f9   : > { %v4377_v42 = vand.u32 4294901760, %v970_v39  ;;  %v4379_v43 = vand.u32 4294901760, %v969_v40  ;;  %v4381_v44 = vand.u32 4294901760, %v968_v41  ;;  %v967_v45 = vld [vmem:[#allocation6 + $0xe0] sm:$0xff]  ;;  %v966_v46 = vld [vmem:[#allocation6 + $0xd8] sm:$0xff]  ;;  %v965_v47 = vld [vmem:[#allocation6 + $0xd0] sm:$0xff] }
 0x2fa   : > { %v4383_v48 = vand.u32 4294901760, %v967_v45  ;;  %v4385_v49 = vand.u32 4294901760, %v966_v46  ;;  %v4387_v50 = vand.u32 4294901760, %v965_v47  ;;  %v964_v51 = vld [vmem:[#allocation6 + $0xc8] sm:$0xff]  ;;  %v963_v52 = vld [vmem:[#allocation6 + $0xc0] sm:$0xff]  ;;  %v962_v53 = vld [vmem:[#allocation6 + $0xb8] sm:$0xff] }
 0x2fb   : > { %1004 = vmatprep.subr.mxu0 %v4377_v42  ;;  %v4390_v54 = vand.u32 4294901760, %v964_v51  ;;  %v4392_v55 = vand.u32 4294901760, %v963_v52  ;;  %v4394_v56 = vand.u32 4294901760, %v962_v53  ;;  %v4397_v57 = vsub.f32 %v970_v39, %v4377_v42  ;;  %v4399_v58 = vld [vmem:[#allocation6 + $0xb0] sm:$0xff]  ;;  %v4401_v59 = vld [vmem:[#allocation6 + $0xa8] sm:$0xff]  ;;  %v4403_v60 = vld [vmem:[#allocation6 + $0xa0] sm:$0xff] }
 0x2fc   : > { %1006 = vmatpush1.msra.mxu0 %v4379_v43  ;;  %v4407_v61 = vand.u32 4294901760, %v4399_v58  ;;  %v4410_v62 = vsub.f32 %v969_v40, %v4379_v43  ;;  %v4413_v63 = vand.u32 4294901760, %v4401_v59  ;;  %v4416_v1 = vsub.f32 %v968_v41, %v4381_v44  ;;  %v4418_v2 = vld [vmem:[#allocation6 + $0x98] sm:$0xff]  ;;  %v4420_v3 = vld [vmem:[#allocation6 + $0x90] sm:$0xff]  ;;  %v4422_v4 = vld [vmem:[#allocation6 + $0x88] sm:$0xff] }
 0x2fd   : > { %6751 = vst [vmem:[#allocation12_spill] sm:$0xff] %v4397_v57  ;;  %1008 = vmatprep.subr.mxu0 %v4381_v44  ;;  %v4426_v5 = vand.u32 4294901760, %v4397_v57  ;;  %v4429_v6 = vand.u32 4294901760, %v4403_v60  ;;  %v4432_v7 = vsub.f32 %v967_v45, %v4383_v48  ;;  %v4435_v8 = vand.u32 4294901760, %v4418_v2  ;;  %v4450_v12 = vld [vmem:[#allocation6 + $0x80] sm:$0xff]  ;;  %v4475_v21 = vld [vmem:[#allocation6 + $0x78] sm:$0xff] }
 0x2fe   : > { %6752 = vst [vmem:[#allocation13_spill] sm:$0xff] %v4410_v62  ;;  %6753 = vst [vmem:[#allocation14_spill] sm:$0xff] %v4416_v1  ;;  %1010 = vmatpush1.msra.mxu0 %v4383_v48  ;;  %v4439_v9 = vand.u32 4294901760, %v4410_v62  ;;  %v4442_v10 = vand.u32 4294901760, %v4416_v1  ;;  %v4445_v0 = vsub.f32 %v966_v46, %v4385_v49  ;;  %v4448_v11 = vand.u32 4294901760, %v4420_v3  ;;  %v4488_v26 = vld [vmem:[#allocation6 + $0x70] sm:$0xff] }
 0x2ff   : > { %6754 = vst [vmem:[#allocation15_spill] sm:$0xff] %v4426_v5  ;;  %6755 = vst [vmem:[#allocation16_spill] sm:$0xff] %v4432_v7  ;;  %1012 = vmatprep.subr.mxu0 %v4385_v49  ;;  %v1151_v13 = vsub.f32 %v4397_v57, %v4426_v5  ;;  %v4456_v14 = vand.u32 4294901760, %v4432_v7  ;;  %v4459_v15 = vsub.f32 %v965_v47, %v4387_v50  ;;  %v4462_v16 = vand.u32 4294901760, %v4422_v4  ;;  %v4500_v31 = vld [vmem:[#allocation6 + $0x68] sm:$0xff]  ;;  %v4514_v36 = vld [vmem:[#allocation6 + $0x60] sm:$0xff] }
 0x300   : > { %6756 = vst [vmem:[#allocation17_spill] sm:$0xff] %v4439_v9  ;;  %6757 = vst [vmem:[#allocation18_spill] sm:$0xff] %v4442_v10  ;;  %1014 = vmatpush1.msra.mxu0 %v4387_v50  ;;  %v1157_v17 = vsub.f32 %v4410_v62, %v4439_v9  ;;  %v1163_v18 = vsub.f32 %v4416_v1, %v4442_v10  ;;  %v4470_v19 = vand.u32 4294901760, %v4445_v0  ;;  %v4486_v25 = vand.u32 4294901760, %v4450_v12  ;;  %v4528_v41 = vld [vmem:[#allocation6 + $0x58] sm:$0xff]  ;;  %v4660_v10 = vld [vmem:[#allocation6 + $0x20] sm:$0xff] }
 0x301   : > { %6758 = vst [vmem:[#allocation19_spill] sm:$0xff] %v4445_v0  ;;  %6759 = vst [vmem:[#allocation20_spill] sm:$0xff] %v4456_v14  ;;  %v4473_v20 = vsub.f32 %v964_v51, %v4390_v54  ;;  %1016 = vmatprep.subr.mxu0 %v4390_v54  ;;  %v4478_v22 = vand.u32 4294901760, %v1151_v13  ;;  %v1169_v23 = vsub.f32 %v4432_v7, %v4456_v14  ;;  %v4483_v24 = vand.u32 4294901760, %v4459_v15  ;;  %v4676_v9 = vld [vmem:[#allocation6 + $0x18] sm:$0xff] }
 0x302   : > { %6760 = vst [vmem:[#allocation21_spill] sm:$0xff] %v4459_v15  ;;  %6761 = vst [vmem:[#allocation22_spill] sm:$0xff] %v4470_v19  ;;  %1018 = vmatpush1.msra.mxu0 %v4392_v55  ;;  %v4491_v27 = vand.u32 4294901760, %v1157_v17  ;;  %v4493_v28 = vand.u32 4294901760, %v1163_v18  ;;  %v1175_v29 = vsub.f32 %v4445_v0, %v4470_v19  ;;  %v4509_v34 = vsub.f32 %v963_v52, %v4392_v55  ;;  %v4544_v52 = vld [vmem:[#allocation6 + $0x50] sm:$0xff] }
 0x303   : > { %6762 = vst [vmem:[#allocation23_spill] sm:$0xff] %v4473_v20  ;;  %6763 = vst [vmem:[#allocation24_spill] sm:$0xff] %v4478_v22  ;;  %v4498_v30 = vand.u32 4294901760, %v4473_v20  ;;  %1020 = vmatprep.subr.mxu0 %v4394_v56  ;;  %1153 = vmatprep.subr.mxu1 %v4478_v22  ;;  %v4504_v32 = vand.u32 4294901760, %v1169_v23  ;;  %v1181_v33 = vsub.f32 %v4459_v15, %v4483_v24  ;;  %v4512_v35 = vand.u32 4294901760, %v4475_v21 }
 0x304   : > { %6764 = vst [vmem:[#allocation25_spill] sm:$0xff] %v4483_v24  ;;  %6765 = vst [vmem:[#allocation26_spill] sm:$0xff] %v4491_v27  ;;  %1022 = vmatpush1.msra.mxu0 %v4407_v61  ;;  %1159 = vmatpush1.msra.mxu1 %v4491_v27  ;;  %v4518_v37 = vand.u32 4294901760, %v1175_v29  ;;  %v4523_v39 = vsub.f32 %v962_v53, %v4394_v56  ;;  %v4526_v40 = vand.u32 4294901760, %v4488_v26  ;;  %v4535_v46 = vand.u32 4294901760, %v4509_v34  ;;  %v4631_v24 = vld [vmem:[#allocation6 + $0x30] sm:$0xff] }
 0x305   : > { %6766 = vst [vmem:[#allocation27_spill] sm:$0xff] %v4493_v28  ;;  %6767 = vst [vmem:[#allocation28_spill] sm:$0xff] %v4498_v30  ;;  %v1187_v38 = vsub.f32 %v4473_v20, %v4498_v30  ;;  %1024 = vmatprep.subr.mxu0 %v4413_v63  ;;  %1165 = vmatprep.subr.mxu1 %v4493_v28  ;;  %v4532_v45 = vand.u32 4294901760, %v1181_v33  ;;  %v4539_v47 = vsub.f32 %v4399_v58, %v4407_v61  ;;  %v4574_v33 = vld [vmem:[#allocation6 + $0x48] sm:$0xff] }
 0x306   : > { %6768 = vst [vmem:[#allocation29_spill] sm:$0xff] %v4504_v32  ;;  %6769 = vst [vmem:[#allocation30_spill] sm:$0xff] %v4509_v34  ;;  %v4542_v51 = vand.u32 4294901760, %v4500_v31  ;;  %1026 = vmatpush1.msra.mxu0 %v4429_v6  ;;  %1171 = vmatpush1.msra.mxu1 %v4504_v32  ;;  %v4551_v13 = vand.u32 4294901760, %v4523_v39  ;;  %v4555_v17 = vsub.f32 %v4401_v59, %v4413_v63  ;;  %v4558_v58 = vand.u32 4294901760, %v4514_v36 }
 0x307   : > { %6770 = vst [vmem:[#allocation31_spill] sm:$0xff] %v4518_v37  ;;  %6771 = vst [vmem:[#allocation32_spill] sm:$0xff] %v4523_v39  ;;  %v4548_v53 = vand.u32 4294901760, %v1187_v38  ;;  %1028 = vmatprep.subr.mxu0 %v4435_v8  ;;  %1177 = vmatprep.subr.mxu1 %v4518_v37  ;;  %v1193_v18 = vsub.f32 %v4509_v34, %v4535_v46  ;;  %v4565_v23 = vand.u32 4294901760, %v4539_v47  ;;  %v4572_v59 = vand.u32 4294901760, %v4528_v41 }
 0x308   : > { %6772 = vst [vmem:[#allocation33_spill] sm:$0xff] %v4532_v45  ;;  %6773 = vst [vmem:[#allocation34_spill] sm:$0xff] %v4535_v46  ;;  %v4569_v29 = vsub.f32 %v4403_v60, %v4429_v6  ;;  %1030 = vmatpush1.msra.mxu0 %v4448_v11  ;;  %1183 = vmatpush1.msra.mxu1 %v4532_v45  ;;  %v1199_v38 = vsub.f32 %v4523_v39, %v4551_v13  ;;  %v4581_v37 = vand.u32 4294901760, %v4555_v17  ;;  %v4616_v46 = vld [vmem:[#allocation6 + $0x38] sm:$0xff] }
 0x309   : > { %6774 = vst [vmem:[#allocation35_spill] sm:$0xff] %v4539_v47  ;;  %6775 = vst [vmem:[#allocation36_spill] sm:$0xff] %v4542_v51  ;;  %v4585_v32 = vsub.f32 %v4418_v2, %v4435_v8  ;;  %v4588_v60 = vand.u32 4294901760, %v4544_v52  ;;  %1032 = vmatprep.subr.mxu0 %v4462_v16  ;;  %1189 = vmatprep.subr.mxu1 %v4548_v53  ;;  %v4592_v28 = vand.u32 4294901760, %v1193_v18  ;;  %v4603_v2 = vld [vmem:[#allocation6 + $0x40] sm:$0xff]  ;;  %v4658_v14 = vand.u32 4294901760, %v4616_v46 }
 0x30a   : > { %6776 = vst [vmem:[#allocation37_spill] sm:$0xff] %v4548_v53  ;;  %6777 = vst [vmem:[#allocation38_spill] sm:$0xff] %v4551_v13  ;;  %v1205_v45 = vsub.f32 %v4539_v47, %v4565_v23  ;;  %v4597_v27 = vand.u32 4294901760, %v4569_v29  ;;  %v4601_v22 = vsub.f32 %v4420_v3, %v4448_v11  ;;  %1034 = vmatpush1.msra.mxu0 %v4486_v25  ;;  %v4606_v13 = vand.u32 4294901760, %v1199_v38 }
 0x30b   : > { %6778 = vst [vmem:[#allocation39_spill] sm:$0xff] %v4555_v17  ;;  %6779 = vst [vmem:[#allocation40_spill] sm:$0xff] %v4558_v58  ;;  %v1211_v18 = vsub.f32 %v4555_v17, %v4581_v37  ;;  %v4611_v53 = vand.u32 4294901760, %v4585_v32  ;;  %1195 = vmatpush1.msra.mxu1 %v4592_v28  ;;  %1036 = vmatprep.subr.mxu0 %v4512_v35  ;;  %v4644_v19 = vsub.f32 %v4450_v12, %v4486_v25 }
 0x30c   : > { %6780 = vst [vmem:[#allocation41_spill] sm:$0xff] %v4565_v23  ;;  %6781 = vst [vmem:[#allocation42_spill] sm:$0xff] %v4569_v29  ;;  %v4614_v23 = vand.u32 4294901760, %v4574_v33  ;;  %v4620_v3 = vand.u32 4294901760, %v1205_v45  ;;  %v1217_v38 = vsub.f32 %v4569_v29, %v4597_v27  ;;  %v4625_v30 = vand.u32 4294901760, %v4601_v22  ;;  %1201 = vmatprep.subr.mxu1 %v4606_v13  ;;  %1038 = vmatpush1.msra.mxu0 %v4526_v40 }
 0x30d   : > { %6782 = vst [vmem:[#allocation43_spill] sm:$0xff] %v4572_v59  ;;  %6783 = vst [vmem:[#allocation44_spill] sm:$0xff] %v4581_v37  ;;  %v4629_v37 = vsub.f32 %v4422_v4, %v4462_v16  ;;  %v1223_v45 = vsub.f32 %v4585_v32, %v4611_v53  ;;  %v4646_v4 = vld [vmem:[#allocation6 + $0x28] sm:$0xff]  ;;  %1040 = vmatprep.subr.mxu0 %v4542_v51  ;;  %v4686_v5 = vsub.f32 %v4488_v26, %v4526_v40 }
 0x30e   : > { %6784 = vst [vmem:[#allocation45_spill] sm:$0xff] %v4585_v32  ;;  %6785 = vst [vmem:[#allocation46_spill] sm:$0xff] %v4588_v60  ;;  %1207 = vmatpush1.msra.mxu1 %v4620_v3  ;;  %1042 = vmatpush1.msra.mxu0 %v4558_v58  ;;  %v4703_v26 = vand.u32 4294901760, %v4660_v10  ;;  %v4733_v29 = vsub.f32 %v4528_v41, %v4572_v59 }
 0x30f   : > { %6786 = vst [vmem:[#allocation47_spill] sm:$0xff] %v4592_v28  ;;  %6787 = vst [vmem:[#allocation48_spill] sm:$0xff] %v4597_v27  ;;  %v4635_v28 = vand.u32 4294901760, %v1211_v18  ;;  %v4640_v27 = vand.u32 4294901760, %v4603_v2  ;;  %v1229_v18 = vsub.f32 %v4601_v22, %v4625_v30  ;;  %v4664_v12 = vand.u32 4294901760, %v1223_v45  ;;  %1044 = vmatprep.subr.mxu0 %v4572_v59  ;;  %v4763_v59 = vld [vmem:[#allocation6 + $0x1f8] sm:$0xff] }
 0x310   : > { %6788 = vst [vmem:[#allocation49_spill] sm:$0xff] %v4601_v22  ;;  %6789 = vst [vmem:[#allocation50_spill] sm:$0xff] %v4606_v13  ;;  %v4650_v13 = vand.u32 4294901760, %v1217_v38  ;;  %v4667_v38 = vand.u32 4294901760, %v4644_v19  ;;  %1046 = vmatpush1.msra.mxu0 %v4588_v60  ;;  %v4721_v22 = vld [vmem:[#allocation6 + $0x8] sm:$0xff] }
 0x311   : > { %6790 = vst [vmem:[#allocation51_spill] sm:$0xff] %v4611_v53  ;;  %6791 = vst [vmem:[#allocation52_spill] sm:$0xff] %v4614_v23  ;;  %v4655_v53 = vand.u32 4294901760, %v4629_v37  ;;  %1213 = vmatprep.subr.mxu1 %v4635_v28  ;;  %1048 = vmatprep.subr.mxu0 %v4614_v23 }
 0x312   : > { %6792 = vst [vmem:[#allocation53_spill] sm:$0xff] %v4620_v3  ;;  %6793 = vst [vmem:[#allocation54_spill] sm:$0xff] %v4625_v30  ;;  %v4671_v3 = vsub.f32 %v4475_v21, %v4512_v35  ;;  %v4674_v30 = vand.u32 4294901760, %v4631_v24  ;;  %1219 = vmatpush1.msra.mxu1 %v4650_v13  ;;  %v4689_v21 = vand.u32 4294901760, %v4646_v4  ;;  %1050 = vmatpush1.msra.mxu0 %v4640_v27 }
 0x313   : > { %6794 = vst [vmem:[#allocation55_spill] sm:$0xff] %v4629_v37  ;;  %6795 = vst [vmem:[#allocation56_spill] sm:$0xff] %v4635_v28  ;;  %v4680_v28 = vand.u32 4294901760, %v1229_v18  ;;  %v1235_v45 = vsub.f32 %v4629_v37, %v4655_v53  ;;  %1225 = vmatprep.subr.mxu1 %v4664_v12  ;;  %v4705_v37 = vld [vmem:[#allocation6 + $0x10] sm:$0xff]  ;;  %1052 = vmatprep.subr.mxu0 %v4658_v14 }
 0x314   : > { %6796 = vst [vmem:[#allocation57_spill] sm:$0xff] %v4640_v27  ;;  %6797 = vst [vmem:[#allocation58_spill] sm:$0xff] %v4644_v19  ;;  %v4696_v18 = vand.u32 4294901760, %v4671_v3  ;;  %1054 = vmatpush1.msra.mxu0 %v4674_v30 }
 0x315   : > { %6798 = vst [vmem:[#allocation59_spill] sm:$0xff] %v4650_v13  ;;  %6799 = vst [vmem:[#allocation60_spill] sm:$0xff] %v4655_v53  ;;  %v1241_v13 = vsub.f32 %v4644_v19, %v4667_v38  ;;  %v4700_v53 = vsub.f32 %v4500_v31, %v4542_v51  ;;  %1231 = vmatpush1.msra.mxu1 %v4680_v28  ;;  %v4716_v19 = vsub.f32 %v4514_v36, %v4558_v58 }
 0x316   : > { %6800 = vst [vmem:[#allocation61_spill] sm:$0xff] %v4658_v14  ;;  %6801 = vst [vmem:[#allocation62_spill] sm:$0xff] %v4664_v12  ;;  %v4709_v12 = vand.u32 4294901760, %v1235_v45  ;;  %v4719_v31 = vand.u32 4294901760, %v4676_v9  ;;  %v1247_v45 = vsub.f32 %v4671_v3, %v4696_v18  ;;  %v4743_v58 = vand.u32 4294901760, %v4705_v37  ;;  %1056 = vmatprep.subr.mxu0 %v4689_v21 }
 0x317   : > { %6802 = vst [vmem:[#allocation63_spill] sm:$0xff] %v4667_v38  ;;  %6803 = vst [vmem:[#allocation64_spill] sm:$0xff] %v4671_v3  ;;  %v4712_v38 = vand.u32 4294901760, %v4686_v5  ;;  %v4724_v32 = vand.u32 4294901760, %v1241_v13  ;;  %v4740_v13 = vand.u32 4294901760, %v4716_v19  ;;  %v4749_v3 = vld [vmem:[#allocation6] sm:$0xff]  ;;  %1058 = vmatpush1.msra.mxu0 %v4703_v26 }
 0x318   : > { %6804 = vst [vmem:[#allocation65_spill] sm:$0xff] %v4674_v30  ;;  %6805 = vst [vmem:[#allocation66_spill] sm:$0xff] %v4680_v28  ;;  %v4729_v28 = vand.u32 4294901760, %v4700_v53  ;;  %1237 = vmatprep.subr.mxu1 %v4709_v12  ;;  %v4752_v41 = vand.u32 4294901760, %v1247_v45  ;;  %1060 = vmatprep.subr.mxu0 %v4719_v31 }
 0x319   : > { %6806 = vst [vmem:[#allocation67_spill] sm:$0xff] %v4686_v5  ;;  %6807 = vst [vmem:[#allocation68_spill] sm:$0xff] %v4689_v21  ;;  %v1253_v36 = vsub.f32 %v4686_v5, %v4712_v38  ;;  %1243 = vmatpush1.msra.mxu1 %v4724_v32  ;;  %v4761_v5 = vand.u32 4294901760, %v4721_v22  ;;  %v1265_v45 = vsub.f32 %v4716_v19, %v4740_v13  ;;  %1062 = vmatpush1.msra.mxu0 %v4743_v58 }
 0x31a   : > { %6808 = vst [vmem:[#allocation69_spill] sm:$0xff] %v4696_v18  ;;  %6809 = vst [vmem:[#allocation70_spill] sm:$0xff] %v4700_v53  ;;  %v4747_v18 = vsub.f32 %v4544_v52, %v4588_v60  ;;  %1249 = vmatprep.subr.mxu1 %v4752_v41 }
 0x31b   : > { %6810 = vst [vmem:[#allocation71_spill] sm:$0xff] %v4703_v26  ;;  %6811 = vst [vmem:[#allocation72_spill] sm:$0xff] %v4709_v12  ;;  %v1259_v12 = vsub.f32 %v4700_v53, %v4729_v28  ;;  %v4765_v52 = vand.u32 4294901760, %v1253_v36  ;;  %v4777_v53 = vld [vmem:[#allocation6 + $0x1f0] sm:$0xff]  ;;  %1064 = vmatprep.subr.mxu0 %v4761_v5 }
 0x31c   : > { %6812 = vst [vmem:[#allocation73_spill] sm:$0xff] %v4712_v38  ;;  %6813 = vst [vmem:[#allocation74_spill] sm:$0xff] %v4716_v19  ;;  %v4758_v38 = vand.u32 4294901760, %v4733_v29  ;;  %v4790_v19 = vsub.f32 %v4603_v2, %v4640_v27 }
 0x31d   : > { %6814 = vst [vmem:[#allocation75_spill] sm:$0xff] %v4719_v31  ;;  %6815 = vst [vmem:[#allocation76_spill] sm:$0xff] %v4724_v32  ;;  %v4771_v32 = vand.u32 4294901760, %v4747_v18  ;;  %v4780_v60 = vand.u32 4294901760, %v1259_v12  ;;  %1255 = vmatpush1.msra.mxu1 %v4765_v52 }
 0x31e   : > { %6816 = vst [vmem:[#allocation77_spill] sm:$0xff] %v4729_v28  ;;  %6817 = vst [vmem:[#allocation78_spill] sm:$0xff] %v4733_v29  ;;  %v4775_v28 = vsub.f32 %v4574_v33, %v4614_v23  ;;  %v1271_v36 = vsub.f32 %v4733_v29, %v4758_v38  ;;  %v4792_v33 = vld [vmem:[#allocation6 + $0x1e8] sm:$0xff]  ;;  %v4795_v23 = vand.u32 4294901760, %v1265_v45  ;;  %v4806_v29 = vld [vmem:[#allocation6 + $0x1e0] sm:$0xff]  ;;  %v4813_v45 = vand.u32 4294901760, %v4790_v19 }
 0x31f   : > { %6818 = vst [vmem:[#allocation79_spill] sm:$0xff] %v4740_v13  ;;  %6819 = vst [vmem:[#allocation80_spill] sm:$0xff] %v4743_v58  ;;  %v4786_v13 = vand.u32 4294901760, %v4749_v3  ;;  %v1277_v12 = vsub.f32 %v4747_v18, %v4771_v32  ;;  %1261 = vmatprep.subr.mxu1 %v4780_v60 }
 0x320   : > { %6820 = vst [vmem:[#allocation81_spill] sm:$0xff] %v4747_v18  ;;  %6821 = vst [vmem:[#allocation82_spill] sm:$0xff] %v4752_v41  ;;  %v4801_v41 = vand.u32 4294901760, %v4775_v28  ;;  %v4809_v2 = vand.u32 4294901760, %v1271_v36  ;;  %v4822_v18 = vld [vmem:[#allocation6 + $0x1d8] sm:$0xff]  ;;  %1267 = vmatpush1.msra.mxu1 %v4795_v23 }
 0x321   : > { %6822 = vst [vmem:[#allocation83_spill] sm:$0xff] %v4758_v38  ;;  %6823 = vst [vmem:[#allocation84_spill] sm:$0xff] %v4761_v5  ;;  %v4804_v38 = vand.u32 4294901760, %v4763_v59  ;;  %v4825_v27 = vand.u32 4294901760, %v1277_v12  ;;  %1066 = vmatpush1.msra.mxu0 %v4786_v13  ;;  %v1289_v12 = vsub.f32 %v4790_v19, %v4813_v45 }
 0x322   : > { %6824 = vst [vmem:[#allocation85_spill] sm:$0xff] %v4765_v52  ;;  %6825 = vst [vmem:[#allocation86_spill] sm:$0xff] %v4771_v32  ;;  %v4817_v52 = vsub.f32 %v4616_v46, %v4658_v14  ;;  %v4820_v32 = vand.u32 4294901760, %v4777_v53  ;;  %v1283_v36 = vsub.f32 %v4775_v28, %v4801_v41  ;;  %v4835_v46 = vand.u32 4294901760, %v4792_v33  ;;  %1273 = vmatprep.subr.mxu1 %v4809_v2 }
 0x323   : > { %6826 = vst [vmem:[#allocation87_spill] sm:$0xff] %v4775_v28  ;;  %6827 = vst [vmem:[#allocation88_spill] sm:$0xff] %v4780_v60  ;;  %v4832_v60 = vsub.f32 %v4631_v24, %v4674_v30  ;;  %v4849_v24 = vand.u32 4294901760, %v4806_v29  ;;  %v4851_v28 = vld [vmem:[#allocation6 + $0x1d0] sm:$0xff]  ;;  %1279 = vmatpush1.msra.mxu1 %v4825_v27  ;;  %1068 = vmatprep.subr.mxu0 %v4804_v38  ;;  %v4869_v30 = vand.u32 4294901760, %v1289_v12 }
 0x324   : > { %6828 = vst [vmem:[#allocation89_spill] sm:$0xff] %v4786_v13  ;;  %6829 = vst [vmem:[#allocation90_spill] sm:$0xff] %v4790_v19  ;;  %v4862_v19 = vsub.f32 %v4660_v10, %v4703_v26  ;;  %1070 = vmatpush2.msra.mxu0 %v4820_v32  ;;  %v4879_v14 = vsub.f32 %v4676_v9, %v4719_v31  ;;  %v4895_v26 = vld [vmem:[#allocation6 + $0x1c0] sm:$0xff]  ;;  %v4909_v31 = vld [vmem:[#allocation6 + $0x1b8] sm:$0xff] }
 0x325   : > { %6830 = vst [vmem:[#allocation91_spill] sm:$0xff] %v4795_v23  ;;  %6831 = vst [vmem:[#allocation92_spill] sm:$0xff] %v4801_v41  ;;  %v4842_v23 = vand.u32 4294901760, %v4817_v52  ;;  %v4846_v41 = vsub.f32 %v4646_v4, %v4689_v21  ;;  %v4865_v4 = vand.u32 4294901760, %v4822_v18  ;;  %v4867_v21 = vld [vmem:[#allocation6 + $0x1c8] sm:$0xff]  ;;  %1072 = vmatprep.subr.mxu0 %v4835_v46 }
 0x326   : > { %6832 = vst [vmem:[#allocation93_spill] sm:$0xff] %v4804_v38  ;;  %6833 = vst [vmem:[#allocation94_spill] sm:$0xff] %v4809_v2  ;;  %v4854_v2 = vand.u32 4294901760, %v1283_v36  ;;  %v4886_v12 = vand.u32 4294901760, %v4862_v19  ;;  %1074 = vmatpush2.msra.mxu0 %v4849_v24 }
 0x327   : > { %6834 = vst [vmem:[#allocation95_spill] sm:$0xff] %v4813_v45  ;;  %6835 = vst [vmem:[#allocation96_spill] sm:$0xff] %v4817_v52  ;;  %v4858_v45 = vand.u32 4294901760, %v4832_v60  ;;  %v1295_v36 = vsub.f32 %v4817_v52, %v4842_v23  ;;  %v4893_v52 = vsub.f32 %v4705_v37, %v4743_v58  ;;  %1076 = vmatprep.subr.mxu0 %v4865_v4 }
 0x328   : > { %6836 = vst [vmem:[#allocation97_spill] sm:$0xff] %v4820_v32  ;;  %6837 = vst [vmem:[#allocation98_spill] sm:$0xff] %v4825_v27  ;;  %v4875_v27 = vand.u32 4294901760, %v4846_v41  ;;  %1285 = vmatprep.subr.mxu1 %v4854_v2 }
 0x329   : > { %6838 = vst [vmem:[#allocation99_spill] sm:$0xff] %v4832_v60  ;;  %6839 = vst [vmem:[#allocation100_spill] sm:$0xff] %v4835_v46  ;;  %v1301_v10 = vsub.f32 %v4832_v60, %v4858_v45  ;;  %1291 = vmatpush1.msra.mxu1 %v4869_v30  ;;  %v4898_v9 = vand.u32 4294901760, %v1295_v36  ;;  %v4907_v60 = vand.u32 4294901760, %v4867_v21  ;;  %v4917_v36 = vand.u32 4294901760, %v4893_v52 }
 0x32a   : > { %6840 = vst [vmem:[#allocation101_spill] sm:$0xff] %v4842_v23  ;;  %6841 = vst [vmem:[#allocation102_spill] sm:$0xff] %v4846_v41  ;;  %v4889_v23 = vand.u32 4294901760, %v4851_v28 }
 0x32b   : > { %6842 = vst [vmem:[#allocation103_spill] sm:$0xff] %v4849_v24  ;;  %6843 = vst [vmem:[#allocation104_spill] sm:$0xff] %v4854_v2  ;;  %v1307_v2 = vsub.f32 %v4846_v41, %v4875_v27  ;;  %v4911_v37 = vand.u32 4294901760, %v1301_v10  ;;  %v4923_v41 = vld [vmem:[#allocation6 + $0x1b0] sm:$0xff]  ;;  %1297 = vmatprep.subr.mxu1 %v4898_v9 }
 0x32c   : > { %6844 = vst [vmem:[#allocation105_spill] sm:$0xff] %v4858_v45  ;;  %6845 = vst [vmem:[#allocation106_spill] sm:$0xff] %v4862_v19  ;;  %v4904_v45 = vand.u32 4294901760, %v4879_v14  ;;  %1078 = vmatpush2.msra.mxu0 %v4889_v23 }
 0x32d   : > { %6846 = vst [vmem:[#allocation107_spill] sm:$0xff] %v4865_v4  ;;  %6847 = vst [vmem:[#allocation108_spill] sm:$0xff] %v4869_v30  ;;  %v1313_v30 = vsub.f32 %v4862_v19, %v4886_v12  ;;  %v4926_v58 = vand.u32 4294901760, %v1307_v2  ;;  %v4936_v19 = vsub.f32 %v4749_v3, %v4786_v13  ;;  %1303 = vmatpush1.msra.mxu1 %v4911_v37  ;;  %1080 = vmatprep.subr.mxu0 %v4907_v60 }
 0x32e   : > { %6848 = vst [vmem:[#allocation109_spill] sm:$0xff] %v4875_v27  ;;  %6849 = vst [vmem:[#allocation110_spill] sm:$0xff] %v4879_v14  ;;  %v4921_v27 = vsub.f32 %v4721_v22, %v4761_v5  ;;  %v1319_v10 = vsub.f32 %v4879_v14, %v4904_v45  ;;  %v4938_v22 = vld [vmem:[#allocation6 + $0x1a8] sm:$0xff]  ;;  %v1325_v2 = vsub.f32 %v4893_v52, %v4917_v36  ;;  %v4952_v14 = vld [vmem:[#allocation6 + $0x1a0] sm:$0xff] }
 0x32f   : > { %6850 = vst [vmem:[#allocation111_spill] sm:$0xff] %v4886_v12  ;;  %6851 = vst [vmem:[#allocation112_spill] sm:$0xff] %v4889_v23  ;;  %v4932_v12 = vand.u32 4294901760, %v4895_v26  ;;  %v4941_v5 = vand.u32 4294901760, %v1313_v30  ;;  %1309 = vmatprep.subr.mxu1 %v4926_v58  ;;  %v4959_v30 = vand.u32 4294901760, %v4936_v19 }
 0x330   : > { %6852 = vst [vmem:[#allocation113_spill] sm:$0xff] %v4893_v52  ;;  %6853 = vst [vmem:[#allocation114_spill] sm:$0xff] %v4898_v9  ;;  %v4947_v9 = vand.u32 4294901760, %v4921_v27  ;;  %v4955_v3 = vand.u32 4294901760, %v1319_v10  ;;  %v4968_v52 = vld [vmem:[#allocation6 + $0x198] sm:$0xff]  ;;  %v4971_v13 = vand.u32 4294901760, %v1325_v2 }
 0x331   : > { %6854 = vst [vmem:[#allocation115_spill] sm:$0xff] %v4904_v45  ;;  %6855 = vst [vmem:[#allocation116_spill] sm:$0xff] %v4907_v60  ;;  %v4950_v45 = vand.u32 4294901760, %v4909_v31  ;;  %1082 = vmatpush2.msra.mxu0 %v4932_v12  ;;  %1315 = vmatpush1.msra.mxu1 %v4941_v5 }
 0x332   : > { %6856 = vst [vmem:[#allocation117_spill] sm:$0xff] %v4911_v37  ;;  %6857 = vst [vmem:[#allocation118_spill] sm:$0xff] %v4917_v36  ;;  %v4963_v37 = vsub.f32 %v4763_v59, %v4804_v38  ;;  %v4966_v36 = vand.u32 4294901760, %v4923_v41  ;;  %v1331_v10 = vsub.f32 %v4921_v27, %v4947_v9  ;;  %v4981_v59 = vand.u32 4294901760, %v4938_v22  ;;  %1321 = vmatprep.subr.mxu1 %v4955_v3 }
 0x333   : > { %6858 = vst [vmem:[#allocation119_spill] sm:$0xff] %v4921_v27  ;;  %6859 = vst [vmem:[#allocation120_spill] sm:$0xff] %v4926_v58  ;;  %1084 = vmatprep.subr.mxu0 %v4950_v45  ;;  %v4978_v58 = vsub.f32 %v4777_v53, %v4820_v32  ;;  %v1337_v38 = vsub.f32 %v4936_v19, %v4959_v30  ;;  %v4995_v53 = vand.u32 4294901760, %v4952_v14  ;;  %1327 = vmatpush1.msra.mxu1 %v4971_v13  ;;  %v5013_v27 = vld [vmem:[#allocation6 + $0x188] sm:$0xff] }
 0x334   : > { %6860 = vst [vmem:[#allocation121_spill] sm:$0xff] %v4932_v12  ;;  %6861 = vst [vmem:[#allocation122_spill] sm:$0xff] %v4936_v19  ;;  %v4987_v2 = vand.u32 4294901760, %v4963_v37  ;;  %1086 = vmatpush2.msra.mxu0 %v4966_v36  ;;  %v5008_v19 = vsub.f32 %v4806_v29, %v4849_v24  ;;  %v5025_v32 = vsub.f32 %v4822_v18, %v4865_v4  ;;  %v5041_v24 = vld [vmem:[#allocation6 + $0x180] sm:$0xff]  ;;  %v5054_v4 = vld [vmem:[#allocation6 + $0x178] sm:$0xff] }
 0x335   : > { %6862 = vst [vmem:[#allocation123_spill] sm:$0xff] %v4941_v5  ;;  %6863 = vst [vmem:[#allocation124_spill] sm:$0xff] %v4947_v9  ;;  %v4992_v5 = vsub.f32 %v4792_v33, %v4835_v46  ;;  %v4997_v9 = vld [vmem:[#allocation6 + $0x190] sm:$0xff]  ;;  %1088 = vmatprep.subr.mxu0 %v4981_v59  ;;  %v5011_v33 = vand.u32 4294901760, %v4968_v52  ;;  %v5015_v46 = vand.u32 4294901760, %v1337_v38 }
 0x336   : > { %6864 = vst [vmem:[#allocation125_spill] sm:$0xff] %v4950_v45  ;;  %6865 = vst [vmem:[#allocation126_spill] sm:$0xff] %v4955_v3  ;;  %v5000_v3 = vand.u32 4294901760, %v1331_v10  ;;  %v1343_v10 = vsub.f32 %v4963_v37, %v4987_v2  ;;  %1090 = vmatpush2.msra.mxu0 %v4995_v53  ;;  %v5031_v38 = vand.u32 4294901760, %v5008_v19 }
 0x337   : > { %6866 = vst [vmem:[#allocation127_spill] sm:$0xff] %v4959_v30  ;;  %6867 = vst [vmem:[#allocation128_spill] sm:$0xff] %v4963_v37  ;;  %v5003_v30 = vand.u32 4294901760, %v4978_v58  ;;  %1092 = vmatprep.subr.mxu0 %v5011_v33  ;;  %v5039_v37 = vsub.f32 %v4851_v28, %v4889_v23 }
 0x338   : > { %6868 = vst [vmem:[#allocation129_spill] sm:$0xff] %v4966_v36  ;;  %6869 = vst [vmem:[#allocation130_spill] sm:$0xff] %v4971_v13  ;;  %v5020_v13 = vand.u32 4294901760, %v4992_v5  ;;  %1333 = vmatprep.subr.mxu1 %v5000_v3  ;;  %v5044_v18 = vand.u32 4294901760, %v1343_v10  ;;  %v1361_v28 = vsub.f32 %v5008_v19, %v5031_v38 }
 0x339   : > { %6870 = vst [vmem:[#allocation131_spill] sm:$0xff] %v4978_v58  ;;  %6871 = vst [vmem:[#allocation132_spill] sm:$0xff] %v4981_v59  ;;  %v1349_v29 = vsub.f32 %v4978_v58, %v5003_v30  ;;  %1339 = vmatpush1.msra.mxu1 %v5015_v46  ;;  %v5052_v58 = vand.u32 4294901760, %v5013_v27  ;;  %v5062_v10 = vand.u32 4294901760, %v5039_v37 }
 0x33a   : > { %6872 = vst [vmem:[#allocation133_spill] sm:$0xff] %v4987_v2  ;;  %6873 = vst [vmem:[#allocation134_spill] sm:$0xff] %v4992_v5  ;;  %v5035_v2 = vand.u32 4294901760, %v4997_v9  ;;  %1345 = vmatprep.subr.mxu1 %v5044_v18 }
 0x33b   : > { %6874 = vst [vmem:[#allocation135_spill] sm:$0xff] %v4995_v53  ;;  %6875 = vst [vmem:[#allocation136_spill] sm:$0xff] %v5000_v3  ;;  %v1355_v3 = vsub.f32 %v4992_v5, %v5020_v13  ;;  %v5056_v51 = vand.u32 4294901760, %v1349_v29 }
 0x33c   : > { %6876 = vst [vmem:[#allocation137_spill] sm:$0xff] %v5003_v30  ;;  %6877 = vst [vmem:[#allocation138_spill] sm:$0xff] %v5008_v19  ;;  %v5049_v30 = vand.u32 4294901760, %v5025_v32  ;;  %1094 = vmatpush2.msra.mxu0 %v5035_v2  ;;  %v5081_v19 = vsub.f32 %v4895_v26, %v4932_v12 }
 0x33d   : > { %6878 = vst [vmem:[#allocation139_spill] sm:$0xff] %v5011_v33  ;;  %6879 = vst [vmem:[#allocation140_spill] sm:$0xff] %v5015_v46  ;;  %v5066_v46 = vsub.f32 %v4867_v21, %v4907_v60  ;;  %v5071_v5 = vand.u32 4294901760, %v1355_v3  ;;  %1096 = vmatprep.subr.mxu0 %v5052_v58  ;;  %v5083_v21 = vld [vmem:[#allocation6 + $0x168] sm:$0xff]  ;;  %1351 = vmatpush2.msra.mxu1 %v5056_v51  ;;  %v5086_v60 = vand.u32 4294901760, %v1361_v28 }
 0x33e   : > { %6880 = vst [vmem:[#allocation141_spill] sm:$0xff] %v5020_v13  ;;  %6881 = vst [vmem:[#allocation142_spill] sm:$0xff] %v5025_v32  ;;  %v5068_v13 = vld [vmem:[#allocation6 + $0x170] sm:$0xff]  ;;  %v1367_v29 = vsub.f32 %v5025_v32, %v5049_v30  ;;  %v1373_v3 = vsub.f32 %v5039_v37, %v5062_v10  ;;  %v5096_v32 = vld [vmem:[#allocation6 + $0x160] sm:$0xff]  ;;  %v5103_v28 = vand.u32 4294901760, %v5081_v19 }
 0x33f   : > { %6882 = vst [vmem:[#allocation143_spill] sm:$0xff] %v5031_v38  ;;  %6883 = vst [vmem:[#allocation144_spill] sm:$0xff] %v5035_v2  ;;  %v5077_v38 = vand.u32 4294901760, %v5041_v24  ;;  %1357 = vmatprep.subr.mxu1 %v5071_v5 }
 0x340   : > { %6884 = vst [vmem:[#allocation145_spill] sm:$0xff] %v5039_v37  ;;  %6885 = vst [vmem:[#allocation146_spill] sm:$0xff] %v5044_v18  ;;  %v5091_v18 = vand.u32 4294901760, %v5066_v46  ;;  %v5099_v26 = vand.u32 4294901760, %v1367_v29  ;;  %v5112_v37 = vld [vmem:[#allocation6 + $0x158] sm:$0xff]  ;;  %1363 = vmatpush2.msra.mxu1 %v5086_v60  ;;  %v5115_v12 = vand.u32 4294901760, %v1373_v3 }
 0x341   : > { %6886 = vst [vmem:[#allocation147_spill] sm:$0xff] %v5049_v30  ;;  %6887 = vst [vmem:[#allocation148_spill] sm:$0xff] %v5052_v58  ;;  %v5094_v30 = vand.u32 4294901760, %v5054_v4  ;;  %1098 = vmatpush2.msra.mxu0 %v5077_v38 }
 0x342   : > { %6888 = vst [vmem:[#allocation149_spill] sm:$0xff] %v5056_v51  ;;  %6889 = vst [vmem:[#allocation150_spill] sm:$0xff] %v5062_v10  ;;  %v5107_v51 = vsub.f32 %v4909_v31, %v4950_v45  ;;  %v5110_v10 = vand.u32 4294901760, %v5068_v13  ;;  %v1379_v29 = vsub.f32 %v5066_v46, %v5091_v18  ;;  %v5125_v31 = vand.u32 4294901760, %v5083_v21  ;;  %1369 = vmatprep.subr.mxu1 %v5099_v26 }
 0x343   : > { %6890 = vst [vmem:[#allocation151_spill] sm:$0xff] %v5066_v46  ;;  %6891 = vst [vmem:[#allocation152_spill] sm:$0xff] %v5071_v5  ;;  %1100 = vmatprep.subr.mxu0 %v5094_v30  ;;  %v5122_v5 = vsub.f32 %v4923_v41, %v4966_v36  ;;  %v1385_v45 = vsub.f32 %v5081_v19, %v5103_v28  ;;  %v5139_v41 = vand.u32 4294901760, %v5096_v32  ;;  %1375 = vmatpush2.msra.mxu1 %v5115_v12  ;;  %v5157_v46 = vld [vmem:[#allocation6 + $0x148] sm:$0xff] }
 0x344   : > { %6892 = vst [vmem:[#allocation153_spill] sm:$0xff] %v5077_v38  ;;  %6893 = vst [vmem:[#allocation154_spill] sm:$0xff] %v5081_v19  ;;  %v5131_v3 = vand.u32 4294901760, %v5107_v51  ;;  %1102 = vmatpush2.msra.mxu0 %v5110_v10  ;;  %v5152_v19 = vsub.f32 %v4952_v14, %v4995_v53  ;;  %v5169_v36 = vsub.f32 %v4968_v52, %v5011_v33  ;;  %v5185_v53 = vld [vmem:[#allocation6 + $0x140] sm:$0xff]  ;;  %v5198_v33 = vld [vmem:[#allocation6 + $0x138] sm:$0xff] }
 0x345   : > { %6894 = vst [vmem:[#allocation155_spill] sm:$0xff] %v5086_v60  ;;  %6895 = vst [vmem:[#allocation156_spill] sm:$0xff] %v5091_v18  ;;  %v5136_v60 = vsub.f32 %v4938_v22, %v4981_v59  ;;  %v5141_v18 = vld [vmem:[#allocation6 + $0x150] sm:$0xff]  ;;  %1104 = vmatprep.subr.mxu0 %v5125_v31  ;;  %v5155_v22 = vand.u32 4294901760, %v5112_v37  ;;  %v5159_v59 = vand.u32 4294901760, %v1385_v45 }
 0x346   : > { %6896 = vst [vmem:[#allocation157_spill] sm:$0xff] %v5094_v30  ;;  %6897 = vst [vmem:[#allocation158_spill] sm:$0xff] %v5099_v26  ;;  %v5144_v26 = vand.u32 4294901760, %v1379_v29  ;;  %v1391_v29 = vsub.f32 %v5107_v51, %v5131_v3  ;;  %1106 = vmatpush2.msra.mxu0 %v5139_v41  ;;  %v5175_v45 = vand.u32 4294901760, %v5152_v19 }
 0x347   : > { %6898 = vst [vmem:[#allocation159_spill] sm:$0xff] %v5103_v28  ;;  %6899 = vst [vmem:[#allocation160_spill] sm:$0xff] %v5107_v51  ;;  %v5147_v28 = vand.u32 4294901760, %v5122_v5  ;;  %1108 = vmatprep.subr.mxu0 %v5155_v22  ;;  %v5183_v51 = vsub.f32 %v4997_v9, %v5035_v2  ;;  %v5344_v2 = vld [vmem:[#allocation8 + $0x18] sm:$0xff] }
 0x348   : > { %6900 = vst [vmem:[#allocation161_spill] sm:$0xff] %v5110_v10  ;;  %6901 = vst [vmem:[#allocation162_spill] sm:$0xff] %v5115_v12  ;;  %v5164_v12 = vand.u32 4294901760, %v5136_v60  ;;  %1381 = vmatprep.subr.mxu1 %v5144_v26  ;;  %v5188_v52 = vand.u32 4294901760, %v1391_v29  ;;  %v1409_v9 = vsub.f32 %v5152_v19, %v5175_v45 }
 0x349   : > { %6902 = vst [vmem:[#allocation163_spill] sm:$0xff] %v5122_v5  ;;  %6903 = vst [vmem:[#allocation164_spill] sm:$0xff] %v5125_v31  ;;  %v1397_v14 = vsub.f32 %v5122_v5, %v5147_v28  ;;  %1387 = vmatpush2.msra.mxu1 %v5159_v59  ;;  %v5196_v5 = vand.u32 4294901760, %v5157_v46  ;;  %v5206_v29 = vand.u32 4294901760, %v5183_v51 }
 0x34a   : > { %6904 = vst [vmem:[#allocation165_spill] sm:$0xff] %v5131_v3  ;;  %6905 = vst [vmem:[#allocation166_spill] sm:$0xff] %v5136_v60  ;;  %v5179_v3 = vand.u32 4294901760, %v5141_v18  ;;  %1393 = vmatprep.subr.mxu1 %v5188_v52 }
 0x34b   : > { %6906 = vst [vmem:[#allocation167_spill] sm:$0xff] %v5139_v41  ;;  %6907 = vst [vmem:[#allocation168_spill] sm:$0xff] %v5144_v26  ;;  %v1403_v26 = vsub.f32 %v5136_v60, %v5164_v12  ;;  %v5200_v23 = vand.u32 4294901760, %v1397_v14 }
 0x34c   : > { %6908 = vst [vmem:[#allocation169_spill] sm:$0xff] %v5147_v28  ;;  %6909 = vst [vmem:[#allocation170_spill] sm:$0xff] %v5152_v19  ;;  %v5193_v28 = vand.u32 4294901760, %v5169_v36  ;;  %1110 = vmatpush2.msra.mxu0 %v5179_v3  ;;  %v5225_v19 = vsub.f32 %v5041_v24, %v5077_v38 }
 0x34d   : > { %6910 = vst [vmem:[#allocation171_spill] sm:$0xff] %v5155_v22  ;;  %6911 = vst [vmem:[#allocation172_spill] sm:$0xff] %v5159_v59  ;;  %v5210_v59 = vsub.f32 %v5013_v27, %v5052_v58  ;;  %v5215_v60 = vand.u32 4294901760, %v1403_v26  ;;  %1112 = vmatprep.subr.mxu0 %v5196_v5  ;;  %v5227_v27 = vld [vmem:[#allocation6 + $0x128] sm:$0xff]  ;;  %1399 = vmatpush2.msra.mxu1 %v5200_v23  ;;  %v5230_v58 = vand.u32 4294901760, %v1409_v9 }
 0x34e   : > { %6912 = vst [vmem:[#allocation173_spill] sm:$0xff] %v5164_v12  ;;  %6913 = vst [vmem:[#allocation174_spill] sm:$0xff] %v5169_v36  ;;  %v5212_v12 = vld [vmem:[#allocation6 + $0x130] sm:$0xff]  ;;  %v1415_v14 = vsub.f32 %v5169_v36, %v5193_v28  ;;  %v1421_v26 = vsub.f32 %v5183_v51, %v5206_v29  ;;  %v5240_v36 = vld [vmem:[#allocation6 + $0x120] sm:$0xff]  ;;  %v5247_v9 = vand.u32 4294901760, %v5225_v19 }
 0x34f   : > { %6914 = vst [vmem:[#allocation175_spill] sm:$0xff] %v5175_v45  ;;  %6915 = vst [vmem:[#allocation176_spill] sm:$0xff] %v5179_v3  ;;  %v5221_v45 = vand.u32 4294901760, %v5185_v53  ;;  %1405 = vmatprep.subr.mxu1 %v5215_v60 }
 0x350   : > { %6916 = vst [vmem:[#allocation177_spill] sm:$0xff] %v5183_v51  ;;  %6917 = vst [vmem:[#allocation178_spill] sm:$0xff] %v5188_v52  ;;  %v5235_v52 = vand.u32 4294901760, %v5210_v59  ;;  %v5243_v24 = vand.u32 4294901760, %v1415_v14  ;;  %v5256_v51 = vld [vmem:[#allocation6 + $0x118] sm:$0xff]  ;;  %1411 = vmatpush2.msra.mxu1 %v5230_v58  ;;  %v5259_v38 = vand.u32 4294901760, %v1421_v26 }
 0x351   : > { %6918 = vst [vmem:[#allocation179_spill] sm:$0xff] %v5193_v28  ;;  %6919 = vst [vmem:[#allocation180_spill] sm:$0xff] %v5196_v5  ;;  %v5238_v28 = vand.u32 4294901760, %v5198_v33  ;;  %1114 = vmatpush2.msra.mxu0 %v5221_v45 }
 0x352   : > { %6920 = vst [vmem:[#allocation181_spill] sm:$0xff] %v5200_v23  ;;  %6921 = vst [vmem:[#allocation182_spill] sm:$0xff] %v5206_v29  ;;  %v5251_v23 = vsub.f32 %v5054_v4, %v5094_v30  ;;  %v5254_v29 = vand.u32 4294901760, %v5212_v12  ;;  %v1427_v14 = vsub.f32 %v5210_v59, %v5235_v52  ;;  %v5269_v4 = vand.u32 4294901760, %v5227_v27  ;;  %1417 = vmatprep.subr.mxu1 %v5243_v24 }
 0x353   : > { %6922 = vst [vmem:[#allocation183_spill] sm:$0xff] %v5210_v59  ;;  %6923 = vst [vmem:[#allocation184_spill] sm:$0xff] %v5215_v60  ;;  %1116 = vmatprep.subr.mxu0 %v5238_v28  ;;  %v5266_v60 = vsub.f32 %v5068_v13, %v5110_v10  ;;  %v1433_v30 = vsub.f32 %v5225_v19, %v5247_v9  ;;  %v5283_v13 = vand.u32 4294901760, %v5240_v36  ;;  %1423 = vmatpush2.msra.mxu1 %v5259_v38  ;;  %v5301_v59 = vld [vmem:[#allocation6 + $0x108] sm:$0xff] }
 0x354   : > { %6924 = vst [vmem:[#allocation185_spill] sm:$0xff] %v5221_v45  ;;  %6925 = vst [vmem:[#allocation186_spill] sm:$0xff] %v5225_v19  ;;  %v5275_v26 = vand.u32 4294901760, %v5251_v23  ;;  %1118 = vmatpush2.msra.mxu0 %v5254_v29  ;;  %v5296_v19 = vsub.f32 %v5096_v32, %v5139_v41  ;;  %v5313_v10 = vsub.f32 %v5112_v37, %v5155_v22  ;;  %v5329_v41 = vld [vmem:[#allocation6 + $0x100] sm:$0xff]  ;;  %v5342_v22 = vld [vmem:[#allocation8 + $0x8] sm:$0xff] }
 0x355   : > { %6926 = vst [vmem:[#allocation187_spill] sm:$0xff] %v5230_v58  ;;  %6927 = vst [vmem:[#allocation188_spill] sm:$0xff] %v5235_v52  ;;  %v5280_v58 = vsub.f32 %v5083_v21, %v5125_v31  ;;  %v5285_v52 = vld [vmem:[#allocation6 + $0x110] sm:$0xff]  ;;  %1120 = vmatprep.subr.mxu0 %v5269_v4  ;;  %v5299_v21 = vand.u32 4294901760, %v5256_v51  ;;  %v5303_v31 = vand.u32 4294901760, %v1433_v30 }
 0x356   : > { %6928 = vst [vmem:[#allocation189_spill] sm:$0xff] %v5238_v28  ;;  %6929 = vst [vmem:[#allocation190_spill] sm:$0xff] %v5243_v24  ;;  %v5288_v24 = vand.u32 4294901760, %v1427_v14  ;;  %v1439_v14 = vsub.f32 %v5251_v23, %v5275_v26  ;;  %1122 = vmatpush2.msra.mxu0 %v5283_v13  ;;  %v5319_v30 = vand.u32 4294901760, %v5296_v19 }
 0x357   : > { %6930 = vst [vmem:[#allocation191_spill] sm:$0xff] %v5247_v9  ;;  %6931 = vst [vmem:[#allocation192_spill] sm:$0xff] %v5251_v23  ;;  %v5291_v9 = vand.u32 4294901760, %v5266_v60  ;;  %1124 = vmatprep.subr.mxu0 %v5299_v21  ;;  %v5327_v23 = vsub.f32 %v5141_v18, %v5179_v3  ;;  %v5360_v3 = vld [vmem:[#allocation8 + $0x10] sm:$0xff] }
 0x358   : > { %6932 = vst [vmem:[#allocation193_spill] sm:$0xff] %v5254_v29  ;;  %6933 = vst [vmem:[#allocation194_spill] sm:$0xff] %v5259_v38  ;;  %v5308_v38 = vand.u32 4294901760, %v5280_v58  ;;  %1429 = vmatprep.subr.mxu1 %v5288_v24  ;;  %v5332_v37 = vand.u32 4294901760, %v1439_v14 }
 0x359   : > { %6934 = vst [vmem:[#allocation195_spill] sm:$0xff] %v5266_v60  ;;  %6935 = vst [vmem:[#allocation196_spill] sm:$0xff] %v5269_v4  ;;  %v1445_v32 = vsub.f32 %v5266_v60, %v5291_v9  ;;  %1435 = vmatpush2.msra.mxu1 %v5303_v31  ;;  %v5340_v60 = vand.u32 4294901760, %v5301_v59  ;;  %v5352_v14 = vand.u32 4294901760, %v5327_v23 }
 0x35a   : > { %6936 = vst [vmem:[#allocation197_spill] sm:$0xff] %v5275_v26  ;;  %6937 = vst [vmem:[#allocation198_spill] sm:$0xff] %v5280_v58  ;;  %v5323_v26 = vand.u32 4294901760, %v5285_v52  ;;  %1441 = vmatprep.subr.mxu1 %v5332_v37 }
 0x35b   : > { %6938 = vst [vmem:[#allocation199_spill] sm:$0xff] %v5283_v13  ;;  %6939 = vst [vmem:[#allocation200_spill] sm:$0xff] %v5288_v24  ;;  %v1451_v24 = vsub.f32 %v5280_v58, %v5308_v38  ;;  %v5346_v18 = vand.u32 4294901760, %v1445_v32  ;;  %v5358_v58 = vld [vmem:[#allocation8] sm:$0xff] }
 0x35c   : > { %6940 = vst [vmem:[#allocation201_spill] sm:$0xff] %v5291_v9  ;;  %6941 = vst [vmem:[#allocation202_spill] sm:$0xff] %v5296_v19  ;;  %v5337_v9 = vand.u32 4294901760, %v5313_v10  ;;  %1126 = vmatpush2.msra.mxu0 %v5323_v26 }
 0x35d   : > { %6942 = vst [vmem:[#allocation203_spill] sm:$0xff] %v5299_v21  ;;  %6943 = vst [vmem:[#allocation204_spill] sm:$0xff] %v5303_v31  ;;  %v1457_v31 = vsub.f32 %v5296_v19, %v5319_v30  ;;  %v5363_v32 = vand.u32 4294901760, %v1451_v24  ;;  %1128 = vmatprep.subr.mxu0 %v5340_v60  ;;  %v5369_v19 = vand.u32 4294901760, %v5329_v41  ;;  %1447 = vmatpush2.msra.mxu1 %v5346_v18 }
 0x35e   : > { %6944 = vst [vmem:[#allocation205_spill] sm:$0xff] %v5308_v38  ;;  %6945 = vst [vmem:[#allocation206_spill] sm:$0xff] %v5313_v10  ;;  %v5356_v38 = vsub.f32 %v5157_v46, %v5196_v5  ;;  %v5373_v46 = vsub.f32 %v5185_v53, %v5221_v45  ;;  %v5375_v5 = vld [vmem:[#allocation8 + $0x28] sm:$0xff]  ;;  %v1469_v24 = vsub.f32 %v5327_v23, %v5352_v14 }
 0x35f   : > { %6946 = vst [vmem:[#allocation207_spill] sm:$0xff] %v5319_v30  ;;  %6947 = vst [vmem:[#allocation208_spill] sm:$0xff] %v5327_v23  ;;  %v1463_v30 = vsub.f32 %v5313_v10, %v5337_v9  ;;  %v5378_v17 = vand.u32 4294901760, %v1457_v31  ;;  %v5387_v10 = vld [vmem:[#allocation8 + $0x20] sm:$0xff]  ;;  %1453 = vmatprep.subr.mxu1 %v5363_v32  ;;  %1130 = vmatpush2.msra.mxu0 %v5369_v19  ;;  %v5411_v23 = vld [vmem:[#allocation8 + $0x30] sm:$0xff] }
 0x360   : > { %6948 = vst [vmem:[#allocation209_spill] sm:$0xff] %v5332_v37  ;;  %6949 = vst [vmem:[#allocation210_spill] sm:$0xff] %v5337_v9  ;;  %v5383_v37 = vand.u32 4294901760, %v5356_v38  ;;  %v884_v9 = vadd.f32 %v5344_v2, %v5342_v22  ;;  %v5394_v31 = vand.u32 4294901760, %v5373_v46  ;;  %1543 = vmatprep.subr.mxu0 %v4397_v57  ;;  %v5428_v57 = vsub.f32 %v5227_v27, %v5269_v4 }
 0x361   : > { %6950 = vst [vmem:[#allocation211_spill] sm:$0xff] %v5340_v60  ;;  %6951 = vst [vmem:[#allocation212_spill] sm:$0xff] %v5342_v22  ;;  %v5390_v53 = vand.u32 4294901760, %v1463_v30  ;;  %1459 = vmatpush2.msra.mxu1 %v5378_v17  ;;  %v5405_v22 = vand.u32 4294901760, %v1469_v24  ;;  %v5420_v24 = vld [vmem:[#allocation8 + $0x48] sm:$0xff] }
 0x362   : > { %6952 = vst [vmem:[#allocation213_spill] sm:$0xff] %v5344_v2  ;;  %6953 = vst [vmem:[#allocation214_spill] sm:$0xff] %v5346_v18  ;;  %v5396_v18 = vld [vmem:[#allocation8 + $0x38] sm:$0xff]  ;;  %v871_v2 = vadd.f32 %v5360_v3, %v5358_v58  ;;  %v1475_v30 = vsub.f32 %v5356_v38, %v5383_v37 }
 0x363   : > { %6954 = vst [vmem:[#allocation215_spill] sm:$0xff] %v5352_v14  ;;  %6955 = vst [vmem:[#allocation216_spill] sm:$0xff] %v5356_v38  ;;  %v5400_v14 = vsub.f32 %v5198_v33, %v5238_v28  ;;  %v5415_v33 = vsub.f32 %v5212_v12, %v5254_v29  ;;  %1465 = vmatprep.subr.mxu1 %v5390_v53 }
 0x364   : > { %6956 = vst [vmem:[#allocation217_spill] sm:$0xff] %v5358_v58  ;;  %6957 = vst [vmem:[#allocation218_spill] sm:$0xff] %v5360_v3  ;;  %1471 = vmatpush2.msra.mxu1 %v5405_v22  ;;  %v5431_v12 = vand.u32 4294901760, %v1475_v30  ;;  %v5441_v58 = vsub.f32 %v5240_v36, %v5283_v13 }
 0x365   : > { %6958 = vst [vmem:[#allocation219_spill] sm:$0xff] %v5363_v32  ;;  %6959 = vst [vmem:[#allocation220_spill] sm:$0xff] %v5369_v19  ;;  %v885_v32 = vadd.f32 %v884_v9, %v5375_v5  ;;  %v5423_v3 = vand.u32 4294901760, %v5400_v14  ;;  %v872_v9 = vadd.f32 %v871_v2, %v5387_v10 }
 0x366   : > { %6960 = vst [vmem:[#allocation221_spill] sm:$0xff] %v5373_v46  ;;  %6961 = vst [vmem:[#allocation222_spill] sm:$0xff] %v5375_v5  ;;  %1477 = vmatprep.subr.mxu1 %v5431_v12  ;;  %v5460_v36 = vand.u32 4294901760, %v5441_v58  ;;  %v5479_v5 = vld [vmem:[#allocation8 + $0x60] sm:$0xff] }
 0x367   : > { %6962 = vst [vmem:[#allocation223_spill] sm:$0xff] %v5378_v17  ;;  %6963 = vst [vmem:[#allocation224_spill] sm:$0xff] %v5383_v37  ;;  %v1481_v17 = vsub.f32 %v5373_v46, %v5394_v31  ;;  %v5434_v37 = vld [vmem:[#allocation8 + $0x40] sm:$0xff]  ;;  %v1487_v27 = vsub.f32 %v5400_v14, %v5423_v3  ;;  %v873_v30 = vadd.f32 %v872_v9, %v5411_v23  ;;  %v5467_v9 = vld [vmem:[#allocation8 + $0x68] sm:$0xff] }
 0x368   : > { %6964 = vst [vmem:[#allocation225_spill] sm:$0xff] %v5387_v10  ;;  %6965 = vst [vmem:[#allocation226_spill] sm:$0xff] %v5390_v53  ;;  %v886_v53 = vadd.f32 %v885_v32, %v5396_v18  ;;  %v5445_v10 = vld [vmem:[#allocation8 + $0x58] sm:$0xff]  ;;  %v5451_v32 = vand.u32 4294901760, %v5428_v57 }
 0x369   : > { %6966 = vst [vmem:[#allocation227_spill] sm:$0xff] %v5394_v31  ;;  %6967 = vst [vmem:[#allocation228_spill] sm:$0xff] %v5396_v18  ;;  %v5437_v31 = vand.u32 4294901760, %v5415_v33  ;;  %v5443_v2 = vand.u32 4294901760, %v1481_v17  ;;  %v5455_v18 = vld [vmem:[#allocation8 + $0x50] sm:$0xff] }
 0x36a   : > { %6968 = vst [vmem:[#allocation229_spill] sm:$0xff] %v5400_v14  ;;  %6969 = vst [vmem:[#allocation230_spill] sm:$0xff] %v5405_v22  ;;  %v887_v22 = vadd.f32 %v886_v53, %v5420_v24  ;;  %v874_v53 = vadd.f32 %v873_v30, %v5434_v37  ;;  %v5488_v30 = vld [vmem:[#allocation8 + $0x78] sm:$0xff] }
 0x36b   : > { %6970 = vst [vmem:[#allocation231_spill] sm:$0xff] %v5411_v23  ;;  %6971 = vst [vmem:[#allocation232_spill] sm:$0xff] %v5415_v33  ;;  %v1493_v17 = vsub.f32 %v5415_v33, %v5437_v31  ;;  %1483 = vmatpush2.msra.mxu1 %v5443_v2  ;;  %v5469_v23 = vand.u32 4294901760, %v1487_v27 }
 0x36c   : > { %6972 = vst [vmem:[#allocation233_spill] sm:$0xff] %v5420_v24  ;;  %6973 = vst [vmem:[#allocation234_spill] sm:$0xff] %v5423_v3  ;;  %v5464_v3 = vsub.f32 %v5256_v51, %v5299_v21  ;;  %v888_v24 = vadd.f32 %v887_v22, %v5445_v10 }
 0x36d   : > { %6974 = vst [vmem:[#allocation235_spill] sm:$0xff] %v5428_v57  ;;  %6975 = vst [vmem:[#allocation236_spill] sm:$0xff] %v5431_v12  ;;  %v1499_v12 = vsub.f32 %v5428_v57, %v5451_v32  ;;  %v5481_v51 = vand.u32 4294901760, %v1493_v17  ;;  %1489 = vmatprep.subr.mxu1 %v5469_v23  ;;  %v5499_v17 = vsub.f32 %v5301_v59, %v5340_v60 }
 0x36e   : > { %6976 = vst [vmem:[#allocation237_spill] sm:$0xff] %v5434_v37  ;;  %6977 = vst [vmem:[#allocation238_spill] sm:$0xff] %v5437_v31  ;;  %v5476_v31 = vsub.f32 %v5285_v52, %v5323_v26  ;;  %v5486_v27 = vand.u32 4294901760, %v5464_v3  ;;  %v875_v37 = vadd.f32 %v874_v53, %v5455_v18 }
 0x36f   : > { %6978 = vst [vmem:[#allocation239_spill] sm:$0xff] %v5441_v58  ;;  %6979 = vst [vmem:[#allocation240_spill] sm:$0xff] %v5443_v2  ;;  %v1505_v2 = vsub.f32 %v5441_v58, %v5460_v36  ;;  %v5492_v52 = vand.u32 4294901760, %v1499_v12  ;;  %1495 = vmatpush2.msra.mxu1 %v5481_v51  ;;  %v5511_v12 = vsub.f32 %v5329_v41, %v5369_v19 }
 0x370   : > { %6980 = vst [vmem:[#allocation241_spill] sm:$0xff] %v5445_v10  ;;  %6981 = vst [vmem:[#allocation242_spill] sm:$0xff] %v5451_v32  ;;  %v5495_v22 = vand.u32 4294901760, %v5476_v31  ;;  %v889_v10 = vadd.f32 %v888_v24, %v5467_v9  ;;  %v1511_v53 = vsub.f32 %v5464_v3, %v5486_v27  ;;  %v5518_v24 = vand.u32 4294901760, %v5499_v17 }
 0x371   : > { %6982 = vst [vmem:[#allocation243_spill] sm:$0xff] %v5455_v18  ;;  %6983 = vst [vmem:[#allocation244_spill] sm:$0xff] %v5460_v36  ;;  %v5502_v36 = vld [vmem:[#allocation8 + $0x70] sm:$0xff]  ;;  %v5505_v32 = vand.u32 4294901760, %v1505_v2  ;;  %1501 = vmatprep.subr.mxu1 %v5492_v52  ;;  %v5525_v18 = vand.u32 4294901760, %v5511_v12 }
 0x372   : > { %6984 = vst [vmem:[#allocation245_spill] sm:$0xff] %v5464_v3  ;;  %6985 = vst [vmem:[#allocation246_spill] sm:$0xff] %v5467_v9  ;;  %v1517_v59 = vsub.f32 %v5476_v31, %v5495_v22  ;;  %v890_v2 = vadd.f32 %v889_v10, %v5488_v30 }
 0x373   : > { %6986 = vst [vmem:[#allocation247_spill] sm:$0xff] %v5469_v23  ;;  %6987 = vst [vmem:[#allocation248_spill] sm:$0xff] %v5476_v31  ;;  %v876_v23 = vadd.f32 %v875_v37, %v5479_v5  ;;  %1507 = vmatpush2.msra.mxu1 %v5505_v32  ;;  %v1529_v10 = vsub.f32 %v5511_v12, %v5525_v18 }
 0x374   : > { %6988 = vst [vmem:[#allocation249_spill] sm:$0xff] %v5479_v5  ;;  %6989 = vst [vmem:[#allocation250_spill] sm:$0xff] %v5481_v51  ;;  %v5522_v51 = vand.u32 4294901760, %v1511_v53  ;;  %v5528_v37 = vand.u32 4294901760, %v1517_v59  ;;  %v891_v5 = vrot.slane %v890_v2, 4 }
 0x375   : > { %6990 = vst [vmem:[#allocation251_spill] sm:$0xff] %v5486_v27  ;;  %6991 = vst [vmem:[#allocation252_spill] sm:$0xff] %v5488_v30  ;;  %v877_v41 = vadd.f32 %v876_v23, %v5502_v36  ;;  %v5538_v9 = vand.u32 4294901760, %v1529_v10  ;;  %v7009_v10 = vld [vmem:[#allocation40_spill] sm:$0xff] }
 0x376   : > { %6992 = vst [vmem:[#allocation253_spill] sm:$0xff] %v5492_v52  ;;  %6993 = vst [vmem:[#allocation254_spill] sm:$0xff] %v5495_v22  ;;  %v1523_v52 = vsub.f32 %v5499_v17, %v5518_v24  ;;  %1513 = vmatprep.subr.mxu1 %v5522_v51 }
 0x377   : > { %6994 = vst [vmem:[#allocation255_spill] sm:$0xff] %v5499_v17  ;;  %6995 = vst [vmem:[#allocation256_spill] sm:$0xff] %v5502_v36  ;;  %v878_v30 = vrot.slane %v877_v41, 4  ;;  %1519 = vmatpush2.msra.mxu1 %v5528_v37 }
 0x378   : > { %6996 = vst [vmem:[#allocation257_spill] sm:$0xff] %v5505_v32  ;;  %6997 = vst [vmem:[#allocation258_spill] sm:$0xff] %v5511_v12  ;;  %v5536_v53 = vand.u32 4294901760, %v1523_v52  ;;  %v892_v32 = vadd.f32 %v891_v5, %v890_v2 }
 0x379   : > { %6998 = vst [vmem:[#allocation259_spill] sm:$0xff] %v5518_v24  ;;  %6999 = vst [vmem:[#allocation260_spill] sm:$0xff] %v5522_v51  ;;  %v879_v23 = vadd.f32 %v878_v30, %v877_v41  ;;  %v7007_v41 = vld [vmem:[#allocation36_spill] sm:$0xff] }
 0x37a   : > { %7000 = vst [vmem:[#allocation261_spill] sm:$0xff] %v5525_v18  ;;  %7001 = vst [vmem:[#allocation262_spill] sm:$0xff] %v5528_v37  ;;  %1525 = vmatprep.subr.mxu1 %v5536_v53  ;;  %v893_v59 = vrot.slane %v892_v32, 2 }
 0x37b   : > { %7002 = vst [vmem:[#allocation263_spill] sm:$0xff] %v5536_v53  ;;  %7003 = vst [vmem:[#allocation264_spill] sm:$0xff] %v5538_v9  ;;  %1531 = vmatpush2.msra.mxu1 %v5538_v9  ;;  %v880_v36 = vrot.slane %v879_v23, 2  ;;  %v7038_v9 = vld [vmem:[#allocation102_spill] sm:$0xff] }
 0x37c   : > { %1745 = vmatprep.subr.mxu1 %v4377_v42  ;;  %v894_v51 = vadd.f32 %v893_v59, %v892_v32  ;;  %v7011_v59 = vld [vmem:[#allocation43_spill] sm:$0xff]  ;;  %v7040_v53 = vld [vmem:[#allocation106_spill] sm:$0xff] }
 0x37d   : > { %v881_v24 = vadd.f32 %v880_v36, %v879_v23  ;;  %v7010_v23 = vld [vmem:[#allocation45_spill] sm:$0xff] }
 0x37e   : > { %v895_v18 = vrot.slane %v894_v51, 1 }
 0x37f   : > { %v882_v22 = vrot.slane %v881_v24, 1 }
 0x380   : > { %v896_v27 = vadd.f32 %v895_v18, %v894_v51 }
 0x381   : > { %v883_v37 = vadd.f32 %v882_v22, %v881_v24  ;;  %v7006_v24 = vld [vmem:[#allocation39_spill] sm:$0xff] }
 0x382   : > { %v5543_v52 = vand.u32 4294901760, %v896_v27 }
 0x383   : > { %v5545_v5 = vand.u32 4294901760, %v883_v37 }
 0x384   : > { %7004 = vst [vmem:[#allocation265_spill] sm:$0xff] %v5543_v52  ;;  %v5548_v30 = vsub.f32 %v896_v27, %v5543_v52  ;;  %1533 = vmatprep.mubr.f32.mxu1 %v5543_v52  ;;  %v7044_v52 = vld [vmem:[#allocation113_spill] sm:$0xff] }
 0x385   : > { %7005 = vst [vmem:[#allocation266_spill] sm:$0xff] %v5545_v5  ;;  %v5552_v2 = vsub.f32 %v883_v37, %v5545_v5  ;;  %1535 = vmatmul.mubr.f32.vlgmr.msra.gmra.mxu1 %v5545_v5  ;;  %v7008_v37 = vld [vmem:[#allocation42_spill] sm:$0xff] }
 0x386   : > { %v1133_v32 = vand.u32 4294901760, %v5548_v30  ;;  %1747 = vmatpush1.msra.mxu1 %v4379_v43  ;;  %v7042_v5 = vld [vmem:[#allocation110_spill] sm:$0xff] }
 0x387   : > { %v6688_v18 = vand.u32 4294901760, %v5552_v2  ;;  %1749 = vmatprep.subr.mxu1 %v4381_v44 }
 0x388   : > { %v1134_v36 = vsub.f32 %v5548_v30, %v1133_v32  ;;  %1751 = vmatpush1.msra.mxu1 %v4383_v48  ;;  %1875 = vmatprep.mubr.f32.mxu1 %v1133_v32  ;;  %v7012_v32 = vld [vmem:[#allocation49_spill] sm:$0xff] }
 0x389   : > { %v1140_v51 = vsub.f32 %v5552_v2, %v6688_v18  ;;  %1753 = vmatprep.subr.mxu1 %v4385_v49  ;;  %v7017_v18 = vld [vmem:[#allocation57_spill] sm:$0xff] }
 0x38a   : > { %v1135_v27 = vand.u32 4294901760, %v1134_v36  ;;  %1755 = vmatpush1.msra.mxu1 %v4387_v50  ;;  %v7013_v36 = vld [vmem:[#allocation46_spill] sm:$0xff] }
 0x38b   : > { %v1141_v22 = vand.u32 4294901760, %v1140_v51  ;;  %1757 = vmatprep.subr.mxu1 %v4390_v54  ;;  %v7014_v51 = vld [vmem:[#allocation55_spill] sm:$0xff] }
 0x38c   : > { %1136 = vmatprep.mubr.f32.mxu0 %v1135_v27  ;;  %1759 = vmatpush1.msra.mxu1 %v4392_v55  ;;  %v7015_v27 = vld [vmem:[#allocation52_spill] sm:$0xff] }
 0x38d   : > { %1142 = vmatmul.mubr.f32.vlgmr.msra.gmra.mxu0 %v1141_v22  ;;  %1761 = vmatprep.subr.mxu1 %v4394_v56  ;;  %v7016_v22 = vld [vmem:[#allocation58_spill] sm:$0xff] }
 0x38e   : > { %1546 = vmatpush1.msra.mxu0 %v4410_v62  ;;  %1763 = vmatpush1.msra.mxu1 %v4407_v61  ;;  %v7036_v62 = vld [vmem:[#allocation99_spill] sm:$0xff] }
 0x38f   : > { %1549 = vmatprep.subr.mxu0 %v4416_v1  ;;  %1765 = vmatprep.subr.mxu1 %v4413_v63  ;;  %v7034_v1 = vld [vmem:[#allocation96_spill] sm:$0xff] }
 0x390   : > { %1552 = vmatpush1.msra.mxu0 %v4432_v7  ;;  %1767 = vmatpush1.msra.mxu1 %v4429_v6  ;;  %v7032_v7 = vld [vmem:[#allocation90_spill] sm:$0xff] }
 0x391   : > { %1555 = vmatprep.subr.mxu0 %v4445_v0  ;;  %1769 = vmatprep.subr.mxu1 %v4435_v8  ;;  %v7030_v0 = vld [vmem:[#allocation87_spill] sm:$0xff] }
 0x392   : > { %1558 = vmatpush1.msra.mxu0 %v4459_v15  ;;  %1771 = vmatpush1.msra.mxu1 %v4448_v11  ;;  %v7028_v15 = vld [vmem:[#allocation81_spill] sm:$0xff] }
 0x393   : > { %1561 = vmatprep.subr.mxu0 %v4473_v20  ;;  %1773 = vmatprep.subr.mxu1 %v4462_v16  ;;  %v7026_v20 = vld [vmem:[#allocation78_spill] sm:$0xff] }
 0x394   : > { %1564 = vmatpush1.msra.mxu0 %v4509_v34  ;;  %1775 = vmatpush1.msra.mxu1 %v4486_v25  ;;  %v7024_v34 = vld [vmem:[#allocation74_spill] sm:$0xff] }
 0x395   : > { %1567 = vmatprep.subr.mxu0 %v4523_v39  ;;  %1777 = vmatprep.subr.mxu1 %v4512_v35  ;;  %v7022_v39 = vld [vmem:[#allocation70_spill] sm:$0xff] }
 0x396   : > { %1570 = vmatpush1.msra.mxu0 %v4539_v47  ;;  %1779 = vmatpush1.msra.mxu1 %v4526_v40  ;;  %v7020_v47 = vld [vmem:[#allocation67_spill] sm:$0xff] }
 0x397   : > { %1573 = vmatprep.subr.mxu0 %v7006_v24  ;;  %1781 = vmatprep.subr.mxu1 %v7007_v41  ;;  %v7018_v24 = vld [vmem:[#allocation64_spill] sm:$0xff] }
 0x398   : > { %1576 = vmatpush1.msra.mxu0 %v7008_v37  ;;  %1783 = vmatpush1.msra.mxu1 %v7009_v10  ;;  %v7019_v37 = vld [vmem:[#allocation61_spill] sm:$0xff] }
 0x399   : > { %1579 = vmatprep.subr.mxu0 %v7010_v23  ;;  %1785 = vmatprep.subr.mxu1 %v7011_v59  ;;  %v7021_v23 = vld [vmem:[#allocation65_spill] sm:$0xff] }
 0x39a   : > { %1582 = vmatpush1.msra.mxu0 %v7012_v32  ;;  %1787 = vmatpush1.msra.mxu1 %v7013_v36  ;;  %v7023_v32 = vld [vmem:[#allocation68_spill] sm:$0xff] }
 0x39b   : > { %1585 = vmatprep.subr.mxu0 %v7014_v51  ;;  %1789 = vmatprep.subr.mxu1 %v7015_v27  ;;  %v7025_v51 = vld [vmem:[#allocation71_spill] sm:$0xff] }
 0x39c   : > { %1588 = vmatpush1.msra.mxu0 %v7016_v22  ;;  %1791 = vmatpush1.msra.mxu1 %v7017_v18  ;;  %v7027_v22 = vld [vmem:[#allocation75_spill] sm:$0xff] }
 0x39d   : > { %1591 = vmatprep.subr.mxu0 %v7018_v24  ;;  %1793 = vmatprep.subr.mxu1 %v7019_v37  ;;  %v7029_v24 = vld [vmem:[#allocation80_spill] sm:$0xff] }
 0x39e   : > { %1594 = vmatpush1.msra.mxu0 %v7020_v47  ;;  %1795 = vmatpush1.msra.mxu1 %v7021_v23  ;;  %v7031_v47 = vld [vmem:[#allocation84_spill] sm:$0xff] }
 0x39f   : > { %1597 = vmatprep.subr.mxu0 %v7022_v39  ;;  %1797 = vmatprep.subr.mxu1 %v7023_v32  ;;  %v7033_v39 = vld [vmem:[#allocation89_spill] sm:$0xff] }
 0x3a0   : > { %1600 = vmatpush1.msra.mxu0 %v7024_v34  ;;  %1799 = vmatpush1.msra.mxu1 %v7025_v51  ;;  %v7035_v34 = vld [vmem:[#allocation93_spill] sm:$0xff] }
 0x3a1   : > { %1603 = vmatprep.subr.mxu0 %v7026_v20  ;;  %1801 = vmatprep.subr.mxu1 %v7027_v22  ;;  %v7037_v20 = vld [vmem:[#allocation97_spill] sm:$0xff] }
 0x3a2   : > { %1606 = vmatpush1.msra.mxu0 %v7028_v15  ;;  %1803 = vmatpush1.msra.mxu1 %v7029_v24  ;;  %v7039_v15 = vld [vmem:[#allocation100_spill] sm:$0xff] }
 0x3a3   : > { %1609 = vmatprep.subr.mxu0 %v7030_v0  ;;  %1805 = vmatprep.subr.mxu1 %v7031_v47  ;;  %v7041_v0 = vld [vmem:[#allocation103_spill] sm:$0xff] }
 0x3a4   : > { %1612 = vmatpush1.msra.mxu0 %v7032_v7  ;;  %1807 = vmatpush1.msra.mxu1 %v7033_v39  ;;  %v7043_v7 = vld [vmem:[#allocation107_spill] sm:$0xff] }
 0x3a5   : > { %1615 = vmatprep.subr.mxu0 %v7034_v1  ;;  %1809 = vmatprep.subr.mxu1 %v7035_v34  ;;  %v7045_v1 = vld [vmem:[#allocation112_spill] sm:$0xff]  ;;  %v7046_v34 = vld [vmem:[#allocation119_spill] sm:$0xff] }
 0x3a6   : > { %1618 = vmatpush1.msra.mxu0 %v7036_v62  ;;  %1811 = vmatpush2.msra.mxu1 %v7037_v20  ;;  %v7047_v62 = vld [vmem:[#allocation116_spill] sm:$0xff]  ;;  %v7048_v20 = vld [vmem:[#allocation122_spill] sm:$0xff] }
 0x3a7   : > { %1621 = vmatprep.subr.mxu0 %v7038_v9  ;;  %1813 = vmatprep.subr.mxu1 %v7039_v15  ;;  %v7049_v9 = vld [vmem:[#allocation121_spill] sm:$0xff]  ;;  %v7050_v15 = vld [vmem:[#allocation128_spill] sm:$0xff] }
 0x3a8   : > { %1624 = vmatpush1.msra.mxu0 %v7040_v53  ;;  %1815 = vmatpush2.msra.mxu1 %v7041_v0  ;;  %v7051_v53 = vld [vmem:[#allocation125_spill] sm:$0xff]  ;;  %v7052_v0 = vld [vmem:[#allocation131_spill] sm:$0xff] }
 0x3a9   : > { %1627 = vmatprep.subr.mxu0 %v7042_v5  ;;  %1817 = vmatprep.subr.mxu1 %v7043_v7  ;;  %v7053_v5 = vld [vmem:[#allocation129_spill] sm:$0xff]  ;;  %v7054_v7 = vld [vmem:[#allocation134_spill] sm:$0xff] }
 0x3aa   : > { %1630 = vmatpush1.msra.mxu0 %v7044_v52  ;;  %1819 = vmatpush2.msra.mxu1 %v7045_v1  ;;  %v7055_v52 = vld [vmem:[#allocation132_spill] sm:$0xff]  ;;  %v7056_v1 = vld [vmem:[#allocation138_spill] sm:$0xff] }
 0x3ab   : > { %1633 = vmatprep.subr.mxu0 %v7046_v34  ;;  %1821 = vmatprep.subr.mxu1 %v7047_v62  ;;  %v7057_v34 = vld [vmem:[#allocation135_spill] sm:$0xff]  ;;  %v7058_v62 = vld [vmem:[#allocation142_spill] sm:$0xff] }
 0x3ac   : > { %1636 = vmatpush1.msra.mxu0 %v7048_v20  ;;  %1823 = vmatpush2.msra.mxu1 %v7049_v9  ;;  %v7059_v20 = vld [vmem:[#allocation139_spill] sm:$0xff]  ;;  %v7060_v9 = vld [vmem:[#allocation145_spill] sm:$0xff] }
 0x3ad   : > { %1639 = vmatprep.subr.mxu0 %v7050_v15  ;;  %1825 = vmatprep.subr.mxu1 %v7051_v53  ;;  %v7061_v15 = vld [vmem:[#allocation144_spill] sm:$0xff]  ;;  %v7062_v53 = vld [vmem:[#allocation151_spill] sm:$0xff] }
 0x3ae   : > { %1642 = vmatpush2.msra.mxu0 %v7052_v0  ;;  %1827 = vmatpush2.msra.mxu1 %v7053_v5  ;;  %v7063_v0 = vld [vmem:[#allocation148_spill] sm:$0xff]  ;;  %v7064_v5 = vld [vmem:[#allocation154_spill] sm:$0xff] }
 0x3af   : > { %1645 = vmatprep.subr.mxu0 %v7054_v7  ;;  %1829 = vmatprep.subr.mxu1 %v7055_v52  ;;  %v7065_v7 = vld [vmem:[#allocation153_spill] sm:$0xff]  ;;  %v7066_v52 = vld [vmem:[#allocation160_spill] sm:$0xff] }
 0x3b0   : > { %1648 = vmatpush2.msra.mxu0 %v7056_v1  ;;  %1831 = vmatpush2.msra.mxu1 %v7057_v34  ;;  %v7067_v1 = vld [vmem:[#allocation157_spill] sm:$0xff]  ;;  %v7068_v34 = vld [vmem:[#allocation163_spill] sm:$0xff] }
 0x3b1   : > { %1651 = vmatprep.subr.mxu0 %v7058_v62  ;;  %1833 = vmatprep.subr.mxu1 %v7059_v20  ;;  %v7069_v62 = vld [vmem:[#allocation161_spill] sm:$0xff]  ;;  %v7070_v20 = vld [vmem:[#allocation166_spill] sm:$0xff] }
 0x3b2   : > { %1654 = vmatpush2.msra.mxu0 %v7060_v9  ;;  %1835 = vmatpush2.msra.mxu1 %v7061_v15  ;;  %v7071_v9 = vld [vmem:[#allocation164_spill] sm:$0xff]  ;;  %v7072_v15 = vld [vmem:[#allocation170_spill] sm:$0xff] }
 0x3b3   : > { %1657 = vmatprep.subr.mxu0 %v7062_v53  ;;  %1837 = vmatprep.subr.mxu1 %v7063_v0  ;;  %v7073_v53 = vld [vmem:[#allocation167_spill] sm:$0xff]  ;;  %v7074_v0 = vld [vmem:[#allocation174_spill] sm:$0xff] }
 0x3b4   : > { %1660 = vmatpush2.msra.mxu0 %v7064_v5  ;;  %1839 = vmatpush2.msra.mxu1 %v7065_v7  ;;  %v7075_v5 = vld [vmem:[#allocation171_spill] sm:$0xff]  ;;  %v7076_v7 = vld [vmem:[#allocation177_spill] sm:$0xff] }
 0x3b5   : > { %1663 = vmatprep.subr.mxu0 %v7066_v52  ;;  %1841 = vmatprep.subr.mxu1 %v7067_v1  ;;  %v7077_v52 = vld [vmem:[#allocation176_spill] sm:$0xff]  ;;  %v7078_v1 = vld [vmem:[#allocation183_spill] sm:$0xff] }
 0x3b6   : > { %1666 = vmatpush2.msra.mxu0 %v7068_v34  ;;  %1843 = vmatpush2.msra.mxu1 %v7069_v62  ;;  %v7079_v34 = vld [vmem:[#allocation180_spill] sm:$0xff]  ;;  %v7080_v62 = vld [vmem:[#allocation186_spill] sm:$0xff] }
 0x3b7   : > { %1669 = vmatprep.subr.mxu0 %v7070_v20  ;;  %1845 = vmatprep.subr.mxu1 %v7071_v9  ;;  %v7081_v20 = vld [vmem:[#allocation192_spill] sm:$0xff] }
 0x3b8   : > { %1672 = vmatpush2.msra.mxu0 %v7072_v15  ;;  %1847 = vmatpush2.msra.mxu1 %v7073_v53  ;;  %v7082_v15 = vld [vmem:[#allocation195_spill] sm:$0xff] }
 0x3b9   : > { %1675 = vmatprep.subr.mxu0 %v7074_v0  ;;  %1849 = vmatprep.subr.mxu1 %v7075_v5  ;;  %v7083_v0 = vld [vmem:[#allocation198_spill] sm:$0xff] }
 0x3ba   : > { %1678 = vmatpush2.msra.mxu0 %v7076_v7  ;;  %1851 = vmatpush2.msra.mxu1 %v7077_v52  ;;  %v7084_v7 = vld [vmem:[#allocation202_spill] sm:$0xff] }
 0x3bb   : > { %1681 = vmatprep.subr.mxu0 %v7078_v1  ;;  %1853 = vmatprep.subr.mxu1 %v7079_v34  ;;  %v7085_v1 = vld [vmem:[#allocation206_spill] sm:$0xff] }
 0x3bc   : > { %1684 = vmatpush2.msra.mxu0 %v7080_v62  ;;  %1735 = vmatprep.mubr.f32.mxu0 %v5548_v30  ;;  %v7086_v30 = vld [vmem:[#allocation208_spill] sm:$0xff]  ;;  %v7139_v62 = vld [vmem:[#allocation159_spill] sm:$0xff] }
 0x3bd   : > { %1687 = vmatprep.subr.mxu0 %v7081_v20  ;;  %1855 = vmatpush2.msra.mxu1 %v5221_v45  ;;  %v7137_v20 = vld [vmem:[#allocation156_spill] sm:$0xff] }
 0x3be   : > { %1690 = vmatpush2.msra.mxu0 %v7082_v15  ;;  %1857 = vmatprep.subr.mxu1 %v5238_v28  ;;  %v7135_v15 = vld [vmem:[#allocation150_spill] sm:$0xff] }
 0x3bf   : > { %1693 = vmatprep.subr.mxu0 %v7083_v0  ;;  %1859 = vmatpush2.msra.mxu1 %v5254_v29  ;;  %v7133_v0 = vld [vmem:[#allocation147_spill] sm:$0xff] }
 0x3c0   : > { %1696 = vmatpush2.msra.mxu0 %v7084_v7  ;;  %1861 = vmatprep.subr.mxu1 %v5269_v4  ;;  %v7131_v7 = vld [vmem:[#allocation143_spill] sm:$0xff] }
 0x3c1   : > { %1699 = vmatprep.subr.mxu0 %v7085_v1  ;;  %1863 = vmatpush2.msra.mxu1 %v5283_v13  ;;  %v7087_v1 = vand.u32 4294901760, %v5552_v2 }
 0x3c2   : > { %1702 = vmatpush2.msra.mxu0 %v7086_v30  ;;  %1865 = vmatprep.subr.mxu1 %v5299_v21  ;;  %v7129_v30 = vld [vmem:[#allocation141_spill] sm:$0xff] }
 0x3c3   : > { %1705 = vmatprep.subr.mxu0 %v5356_v38  ;;  %1867 = vmatpush2.msra.mxu1 %v5323_v26  ;;  %v7127_v38 = vld [vmem:[#allocation137_spill] sm:$0xff] }
 0x3c4   : > { %1708 = vmatpush2.msra.mxu0 %v5373_v46  ;;  %1869 = vmatprep.subr.mxu1 %v5340_v60  ;;  %v7125_v46 = vld [vmem:[#allocation133_spill] sm:$0xff] }
 0x3c5   : > { %1711 = vmatprep.subr.mxu0 %v5400_v14  ;;  %1871 = vmatpush2.msra.mxu1 %v5369_v19  ;;  %v7123_v14 = vld [vmem:[#allocation127_spill] sm:$0xff] }
 0x3c6   : > { %1714 = vmatpush2.msra.mxu0 %v5415_v33  ;;  %1879 = vmatmul.mubr.f32.vlgmr.msra.gmra.mxu1 %v7087_v1  ;;  %v7088_v1 = vld [vmem:[#allocation15_spill] sm:$0xff]  ;;  %v7121_v33 = vld [vmem:[#allocation124_spill] sm:$0xff] }
 0x3c7   : > { %1717 = vmatprep.subr.mxu0 %v5428_v57  ;;  %2151 = vmatprep.subr.mxu1 %v4377_v42  ;;  %v7119_v57 = vld [vmem:[#allocation118_spill] sm:$0xff] }
 0x3c8   : > { %1720 = vmatpush2.msra.mxu0 %v5441_v58  ;;  %2153 = vmatpush1.msra.mxu1 %v4379_v43  ;;  %v7089_v58 = vld [vmem:[#allocation17_spill] sm:$0xff] }
 0x3c9   : > { %1723 = vmatprep.subr.mxu0 %v5464_v3  ;;  %2155 = vmatprep.subr.mxu1 %v4381_v44  ;;  %v7090_v3 = vld [vmem:[#allocation18_spill] sm:$0xff] }
 0x3ca   : > { %1726 = vmatpush2.msra.mxu0 %v5476_v31  ;;  %2157 = vmatpush1.msra.mxu1 %v4383_v48  ;;  %v7091_v31 = vld [vmem:[#allocation20_spill] sm:$0xff] }
 0x3cb   : > { %1729 = vmatprep.subr.mxu0 %v5499_v17  ;;  %2159 = vmatprep.subr.mxu1 %v4385_v49  ;;  %v7092_v17 = vld [vmem:[#allocation22_spill] sm:$0xff] }
 0x3cc   : > { %1732 = vmatpush2.msra.mxu0 %v5511_v12  ;;  %2161 = vmatpush1.msra.mxu1 %v4387_v50  ;;  %v7093_v12 = vld [vmem:[#allocation25_spill] sm:$0xff] }
 0x3cd   : > { %1738 = vmatmul.mubr.f32.vlgmr.msra.gmra.mxu0 %v5552_v2  ;;  %1888 = vmatprep.subr.mxu0 %v7088_v1  ;;  %v7094_v2 = vld [vmem:[#allocation28_spill] sm:$0xff]  ;;  %v7117_v1 = vld [vmem:[#allocation115_spill] sm:$0xff] }
 0x3ce   : > { %1892 = vmatpush1.msra.mxu0 %v7089_v58  ;;  %2163 = vmatprep.subr.mxu1 %v4390_v54  ;;  %v7095_v58 = vld [vmem:[#allocation34_spill] sm:$0xff] }
 0x3cf   : > { %1896 = vmatprep.subr.mxu0 %v7090_v3  ;;  %2165 = vmatpush1.msra.mxu1 %v4392_v55  ;;  %v7096_v3 = vld [vmem:[#allocation38_spill] sm:$0xff] }
 0x3d0   : > { %1900 = vmatpush1.msra.mxu0 %v7091_v31  ;;  %2167 = vmatprep.subr.mxu1 %v4394_v56  ;;  %v7097_v31 = vld [vmem:[#allocation41_spill] sm:$0xff] }
 0x3d1   : > { %1904 = vmatprep.subr.mxu0 %v7092_v17  ;;  %2169 = vmatpush1.msra.mxu1 %v4407_v61  ;;  %v7098_v17 = vld [vmem:[#allocation44_spill] sm:$0xff] }
 0x3d2   : > { %1908 = vmatpush1.msra.mxu0 %v7093_v12  ;;  %2171 = vmatprep.subr.mxu1 %v4413_v63  ;;  %v7099_v12 = vld [vmem:[#allocation48_spill] sm:$0xff] }
 0x3d3   : > { %1912 = vmatprep.subr.mxu0 %v7094_v2  ;;  %2173 = vmatpush1.msra.mxu1 %v4429_v6  ;;  %v7100_v2 = vld [vmem:[#allocation51_spill] sm:$0xff] }
 0x3d4   : > { %1916 = vmatpush1.msra.mxu0 %v7095_v58  ;;  %2175 = vmatprep.subr.mxu1 %v4435_v8  ;;  %v7101_v58 = vld [vmem:[#allocation54_spill] sm:$0xff] }
 0x3d5   : > { %1920 = vmatprep.subr.mxu0 %v7096_v3  ;;  %2177 = vmatpush1.msra.mxu1 %v4448_v11  ;;  %v7102_v3 = vld [vmem:[#allocation60_spill] sm:$0xff] }
 0x3d6   : > { %1924 = vmatpush1.msra.mxu0 %v7097_v31  ;;  %2179 = vmatprep.subr.mxu1 %v4462_v16  ;;  %v7103_v31 = vld [vmem:[#allocation63_spill] sm:$0xff] }
 0x3d7   : > { %1928 = vmatprep.subr.mxu0 %v7098_v17  ;;  %2181 = vmatpush1.msra.mxu1 %v4486_v25  ;;  %v7104_v17 = vld [vmem:[#allocation69_spill] sm:$0xff] }
 0x3d8   : > { %1932 = vmatpush1.msra.mxu0 %v7099_v12  ;;  %2183 = vmatprep.subr.mxu1 %v4512_v35  ;;  %v7105_v12 = vld [vmem:[#allocation73_spill] sm:$0xff] }
 0x3d9   : > { %1936 = vmatprep.subr.mxu0 %v7100_v2  ;;  %2185 = vmatpush1.msra.mxu1 %v4526_v40  ;;  %v7106_v2 = vld [vmem:[#allocation77_spill] sm:$0xff] }
 0x3da   : > { %1940 = vmatpush1.msra.mxu0 %v7101_v58  ;;  %2187 = vmatprep.subr.mxu1 %v7007_v41  ;;  %v7107_v58 = vld [vmem:[#allocation79_spill] sm:$0xff] }
 0x3db   : > { %1944 = vmatprep.subr.mxu0 %v7102_v3  ;;  %2189 = vmatpush1.msra.mxu1 %v7009_v10  ;;  %v7108_v3 = vld [vmem:[#allocation83_spill] sm:$0xff] }
 0x3dc   : > { %1948 = vmatpush1.msra.mxu0 %v7103_v31  ;;  %2191 = vmatprep.subr.mxu1 %v7011_v59  ;;  %v7109_v31 = vld [vmem:[#allocation86_spill] sm:$0xff] }
 0x3dd   : > { %1952 = vmatprep.subr.mxu0 %v7104_v17  ;;  %2193 = vmatpush1.msra.mxu1 %v7013_v36  ;;  %v7110_v17 = vld [vmem:[#allocation92_spill] sm:$0xff] }
 0x3de   : > { %1956 = vmatpush1.msra.mxu0 %v7105_v12  ;;  %2195 = vmatprep.subr.mxu1 %v7015_v27  ;;  %v7111_v12 = vld [vmem:[#allocation95_spill] sm:$0xff] }
 0x3df   : > { %1960 = vmatprep.subr.mxu0 %v7106_v2  ;;  %2197 = vmatpush1.msra.mxu1 %v7017_v18  ;;  %v7112_v2 = vld [vmem:[#allocation101_spill] sm:$0xff] }
 0x3e0   : > { %1964 = vmatpush1.msra.mxu0 %v7107_v58  ;;  %2199 = vmatprep.subr.mxu1 %v7019_v37  ;;  %v7113_v58 = vld [vmem:[#allocation105_spill] sm:$0xff] }
 0x3e1   : > { %1968 = vmatprep.subr.mxu0 %v7108_v3  ;;  %2201 = vmatpush1.msra.mxu1 %v7021_v23  ;;  %v7114_v3 = vld [vmem:[#allocation109_spill] sm:$0xff] }
 0x3e2   : > { %1972 = vmatpush1.msra.mxu0 %v7109_v31  ;;  %2203 = vmatprep.subr.mxu1 %v7023_v32  ;;  %v7115_v31 = vld [vmem:[#allocation111_spill] sm:$0xff] }
 0x3e3   : > { %1976 = vmatprep.subr.mxu0 %v7110_v17  ;;  %2205 = vmatpush1.msra.mxu1 %v7025_v51  ;;  %v7116_v17 = vld [vmem:[#allocation93_spill] sm:$0xff] }
 0x3e4   : > { %1980 = vmatpush1.msra.mxu0 %v7111_v12  ;;  %2207 = vmatprep.subr.mxu1 %v7027_v22  ;;  %v7118_v12 = vld [vmem:[#allocation97_spill] sm:$0xff] }
 0x3e5   : > { %1984 = vmatprep.subr.mxu0 %v7112_v2  ;;  %2209 = vmatpush1.msra.mxu1 %v7029_v24  ;;  %v7120_v2 = vld [vmem:[#allocation100_spill] sm:$0xff] }
 0x3e6   : > { %1988 = vmatpush1.msra.mxu0 %v7113_v58  ;;  %2211 = vmatprep.subr.mxu1 %v7031_v47  ;;  %v7122_v58 = vld [vmem:[#allocation103_spill] sm:$0xff] }
 0x3e7   : > { %1992 = vmatprep.subr.mxu0 %v7114_v3  ;;  %2213 = vmatpush1.msra.mxu1 %v7033_v39  ;;  %v7124_v3 = vld [vmem:[#allocation107_spill] sm:$0xff] }
 0x3e8   : > { %1996 = vmatpush1.msra.mxu0 %v7115_v31  ;;  %2215 = vmatprep.subr.mxu1 %v7116_v17  ;;  %v7126_v31 = vld [vmem:[#allocation112_spill] sm:$0xff] }
 0x3e9   : > { %2000 = vmatprep.subr.mxu0 %v7117_v1  ;;  %2217 = vmatpush2.msra.mxu1 %v7118_v12  ;;  %v7128_v1 = vld [vmem:[#allocation116_spill] sm:$0xff] }
 0x3ea   : > { %2004 = vmatpush1.msra.mxu0 %v7119_v57  ;;  %2219 = vmatprep.subr.mxu1 %v7120_v2  ;;  %v7130_v57 = vld [vmem:[#allocation121_spill] sm:$0xff] }
 0x3eb   : > { %2008 = vmatprep.subr.mxu0 %v7121_v33  ;;  %2221 = vmatpush2.msra.mxu1 %v7122_v58  ;;  %v7132_v33 = vld [vmem:[#allocation125_spill] sm:$0xff] }
 0x3ec   : > { %2012 = vmatpush1.msra.mxu0 %v7123_v14  ;;  %2223 = vmatprep.subr.mxu1 %v7124_v3  ;;  %v7134_v14 = vld [vmem:[#allocation129_spill] sm:$0xff] }
 0x3ed   : > { %2016 = vmatprep.subr.mxu0 %v7125_v46  ;;  %2225 = vmatpush2.msra.mxu1 %v7126_v31  ;;  %v7136_v46 = vld [vmem:[#allocation132_spill] sm:$0xff] }
 0x3ee   : > { %2020 = vmatpush2.msra.mxu0 %v7127_v38  ;;  %2227 = vmatprep.subr.mxu1 %v7128_v1  ;;  %v7138_v38 = vld [vmem:[#allocation135_spill] sm:$0xff] }
 0x3ef   : > { %2024 = vmatprep.subr.mxu0 %v7129_v30  ;;  %2229 = vmatpush2.msra.mxu1 %v7130_v57  ;;  %v7140_v30 = vld [vmem:[#allocation139_spill] sm:$0xff]  ;;  %v7141_v57 = vld [vmem:[#allocation165_spill] sm:$0xff] }
 0x3f0   : > { %2028 = vmatpush2.msra.mxu0 %v7131_v7  ;;  %2231 = vmatprep.subr.mxu1 %v7132_v33  ;;  %v7142_v7 = vld [vmem:[#allocation144_spill] sm:$0xff]  ;;  %v7143_v33 = vld [vmem:[#allocation169_spill] sm:$0xff]  ;;  %v7151_v1 = vld [vmem:[#allocation179_spill] sm:$0xff] }
 0x3f1   : > { %2032 = vmatprep.subr.mxu0 %v7133_v0  ;;  %2233 = vmatpush2.msra.mxu1 %v7134_v14  ;;  %v7144_v0 = vld [vmem:[#allocation148_spill] sm:$0xff]  ;;  %v7145_v14 = vld [vmem:[#allocation173_spill] sm:$0xff] }
 0x3f2   : > { %2036 = vmatpush2.msra.mxu0 %v7135_v15  ;;  %2235 = vmatprep.subr.mxu1 %v7136_v46  ;;  %v7146_v15 = vld [vmem:[#allocation153_spill] sm:$0xff]  ;;  %v7147_v46 = vld [vmem:[#allocation175_spill] sm:$0xff] }
 0x3f3   : > { %2040 = vmatprep.subr.mxu0 %v7137_v20  ;;  %2237 = vmatpush2.msra.mxu1 %v7138_v38  ;;  %v7148_v20 = vld [vmem:[#allocation157_spill] sm:$0xff]  ;;  %v7149_v38 = vld [vmem:[#allocation212_spill] sm:$0xff] }
 0x3f4   : > { %2044 = vmatpush2.msra.mxu0 %v7139_v62  ;;  %2239 = vmatprep.subr.mxu1 %v7140_v30  ;;  %v898_v62 = vmul.f32 %v7149_v38, %v7149_v38  ;;  %v7150_v30 = vld [vmem:[#allocation213_spill] sm:$0xff]  ;;  %v7156_v38 = vld [vmem:[#allocation222_spill] sm:$0xff] }
 0x3f5   : > { %2048 = vmatprep.subr.mxu0 %v7141_v57  ;;  %2241 = vmatpush2.msra.mxu1 %v7142_v7  ;;  %v900_v57 = vmul.f32 %v7150_v30, %v7150_v30  ;;  %v7152_v7 = vld [vmem:[#allocation161_spill] sm:$0xff] }
 0x3f6   : > { %2052 = vmatpush2.msra.mxu0 %v7143_v33  ;;  %2243 = vmatprep.subr.mxu1 %v7144_v0  ;;  %v7153_v33 = vld [vmem:[#allocation182_spill] sm:$0xff] }
 0x3f7   : > { %2056 = vmatprep.subr.mxu0 %v7145_v14  ;;  %2245 = vmatpush2.msra.mxu1 %v7146_v15  ;;  %v7154_v14 = vld [vmem:[#allocation188_spill] sm:$0xff]  ;;  %v926_v30 = vadd.f32 %v900_v57, %v898_v62  ;;  %v7157_v15 = vld [vmem:[#allocation197_spill] sm:$0xff]  ;;  %v7163_v62 = vld [vmem:[#allocation210_spill] sm:$0xff] }
 0x3f8   : > { %2060 = vmatpush2.msra.mxu0 %v7147_v46  ;;  %2247 = vmatprep.subr.mxu1 %v7148_v20  ;;  %v7155_v46 = vld [vmem:[#allocation191_spill] sm:$0xff]  ;;  %v902_v20 = vmul.f32 %v7156_v38, %v7156_v38 }
 0x3f9   : > { %2064 = vmatprep.subr.mxu0 %v7151_v1  ;;  %2249 = vmatpush2.msra.mxu1 %v7152_v7  ;;  %v7158_v1 = vld [vmem:[#allocation201_spill] sm:$0xff] }
 0x3fa   : > { %2068 = vmatpush2.msra.mxu0 %v7153_v33  ;;  %2251 = vmatprep.subr.mxu1 %v7071_v9  ;;  %v7159_v33 = vld [vmem:[#allocation205_spill] sm:$0xff]  ;;  %v927_v57 = vadd.f32 %v926_v30, %v902_v20 }
 0x3fb   : > { %2072 = vmatprep.subr.mxu0 %v7154_v14  ;;  %2253 = vmatpush2.msra.mxu1 %v7073_v53  ;;  %v7160_v14 = vld [vmem:[#allocation265_spill] sm:$0xff]  ;;  %v7161_v53 = vld [vmem:[#allocation207_spill] sm:$0xff] }
 0x3fc   : > { %2076 = vmatpush2.msra.mxu0 %v7155_v46  ;;  %2255 = vmatprep.subr.mxu1 %v7075_v5  ;;  %v7162_v46 = vld [vmem:[#allocation228_spill] sm:$0xff]  ;;  %v7169_v20 = vld [vmem:[#allocation233_spill] sm:$0xff] }
 0x3fd   : > { %2080 = vmatprep.subr.mxu0 %v7157_v15  ;;  %2257 = vmatpush2.msra.mxu1 %v7077_v52  ;;  %v904_v38 = vmul.f32 %v7162_v46, %v7162_v46  ;;  %v7164_v15 = vld [vmem:[#allocation217_spill] sm:$0xff]  ;;  %v7166_v52 = vld [vmem:[#allocation215_spill] sm:$0xff]  ;;  %v906_v30 = vmul.f32 %v7169_v20, %v7169_v20 }
 0x3fe   : > { %2084 = vmatpush2.msra.mxu0 %v7158_v1  ;;  %2259 = vmatprep.subr.mxu1 %v7079_v34  ;;  %v897_v1 = vmul.f32 %v7164_v15, %v7164_v15  ;;  %v7165_v34 = vld [vmem:[#allocation218_spill] sm:$0xff]  ;;  %v7168_v46 = vld [vmem:[#allocation227_spill] sm:$0xff] }
 0x3ff   : > { %2088 = vmatprep.subr.mxu0 %v7159_v33  ;;  %2142 = vmatprep.mubr.f32.mxu0 %v7160_v14  ;;  %v899_v33 = vmul.f32 %v7165_v34, %v7165_v34  ;;  %v7170_v15 = vld [vmem:[#allocation234_spill] sm:$0xff]  ;;  %v7171_v34 = vld [vmem:[#allocation225_spill] sm:$0xff] }
 0x400   : > { %2092 = vmatpush2.msra.mxu0 %v7161_v53  ;;  %2261 = vmatpush2.msra.mxu1 %v5221_v45  ;;  %v7167_v53 = vld [vmem:[#allocation224_spill] sm:$0xff] }
 0x401   : > { %2096 = vmatprep.subr.mxu0 %v7163_v62  ;;  %2263 = vmatprep.subr.mxu1 %v5238_v28  ;;  %v928_v62 = vadd.f32 %v927_v57, %v904_v38  ;;  %v7172_v28 = vld [vmem:[#allocation238_spill] sm:$0xff]  ;;  %v7175_v38 = vld [vmem:[#allocation241_spill] sm:$0xff] }
 0x402   : > { %2100 = vmatpush2.msra.mxu0 %v7166_v52  ;;  %2265 = vmatpush2.msra.mxu1 %v5254_v29  ;;  %v901_v52 = vmul.f32 %v7171_v34, %v7171_v34  ;;  %v913_v29 = vadd.f32 %v899_v33, %v897_v1  ;;  %v908_v57 = vmul.f32 %v7175_v38, %v7175_v38  ;;  %v7177_v33 = vld [vmem:[#allocation231_spill] sm:$0xff]  ;;  %v7183_v38 = vld [vmem:[#allocation26_spill] sm:$0xff] }
 0x403   : > { %2104 = vmatprep.subr.mxu0 %v7167_v53  ;;  %2267 = vmatprep.subr.mxu1 %v5269_v4  ;;  %v7173_v53 = vld [vmem:[#allocation242_spill] sm:$0xff]  ;;  %v929_v20 = vadd.f32 %v928_v62, %v906_v30  ;;  %v903_v1 = vmul.f32 %v7177_v33, %v7177_v33 }
 0x404   : > { %2108 = vmatpush2.msra.mxu0 %v7168_v46  ;;  %2269 = vmatpush2.msra.mxu1 %v5283_v13  ;;  %v7174_v46 = vld [vmem:[#allocation244_spill] sm:$0xff]  ;;  %v914_v34 = vadd.f32 %v913_v29, %v901_v52  ;;  %v7184_v62 = vld [vmem:[#allocation246_spill] sm:$0xff]  ;;  %v7185_v29 = vld [vmem:[#allocation237_spill] sm:$0xff] }
 0x405   : > { %2112 = vmatprep.subr.mxu0 %v7170_v15  ;;  %2271 = vmatprep.subr.mxu1 %v5299_v21  ;;  %v7176_v15 = vld [vmem:[#allocation251_spill] sm:$0xff]  ;;  %v910_v30 = vmul.f32 %v7184_v62, %v7184_v62  ;;  %v905_v52 = vmul.f32 %v7185_v29, %v7185_v29  ;;  %v7190_v62 = vld [vmem:[#allocation33_spill] sm:$0xff] }
 0x406   : > { %2116 = vmatpush2.msra.mxu0 %v7172_v28  ;;  %2273 = vmatpush2.msra.mxu1 %v5323_v26  ;;  %v7178_v28 = vld [vmem:[#allocation254_spill] sm:$0xff]  ;;  %v915_v33 = vadd.f32 %v914_v34, %v903_v1  ;;  %v7191_v1 = vld [vmem:[#allocation243_spill] sm:$0xff]  ;;  %v7192_v29 = vld [vmem:[#allocation37_spill] sm:$0xff] }
 0x407   : > { %2120 = vmatprep.subr.mxu0 %v7173_v53  ;;  %2275 = vmatprep.subr.mxu1 %v5340_v60  ;;  %v7179_v53 = vld [vmem:[#allocation266_spill] sm:$0xff]  ;;  %v7180_v60 = vld [vmem:[#allocation259_spill] sm:$0xff]  ;;  %v907_v34 = vmul.f32 %v7191_v1, %v7191_v1 }
 0x408   : > { %2124 = vmatpush2.msra.mxu0 %v7174_v46  ;;  %2277 = vmatpush2.msra.mxu1 %v5369_v19  ;;  %v7181_v46 = vld [vmem:[#allocation24_spill] sm:$0xff]  ;;  %v7182_v19 = vld [vmem:[#allocation261_spill] sm:$0xff]  ;;  %v7198_v1 = vld [vmem:[#allocation59_spill] sm:$0xff] }
 0x409   : > { %2128 = vmatprep.subr.mxu0 %v7176_v15  ;;  %2279 = vmatprep.mubr.f32.mxu1 %v7160_v14  ;;  %v930_v14 = vadd.f32 %v929_v20, %v908_v57  ;;  %v7189_v57 = vld [vmem:[#allocation252_spill] sm:$0xff]  ;;  %v7240_v15 = vld [vmem:[#allocation190_spill] sm:$0xff] }
 0x40a   : > { %2132 = vmatpush2.msra.mxu0 %v7178_v28  ;;  %2281 = vmatmul.mubr.f32.vlgmr.msra.gmra.mxu1 %v7179_v53  ;;  %v7238_v28 = vld [vmem:[#allocation187_spill] sm:$0xff] }
 0x40b   : > { %2136 = vmatprep.subr.mxu0 %v7180_v60  ;;  %2437 = vmatprep.subr.mxu1 %v7181_v46  ;;  %v7186_v60 = vld [vmem:[#allocation27_spill] sm:$0xff]  ;;  %v7187_v46 = vld [vmem:[#allocation29_spill] sm:$0xff]  ;;  %v931_v20 = vadd.f32 %v930_v14, %v910_v30 }
 0x40c   : > { %2140 = vmatpush2.msra.mxu0 %v7182_v19  ;;  %2443 = vmatpush1.msra.mxu1 %v7183_v38  ;;  %v7188_v38 = vld [vmem:[#allocation31_spill] sm:$0xff]  ;;  %v7195_v14 = vld [vmem:[#allocation53_spill] sm:$0xff]  ;;  %v7236_v19 = vld [vmem:[#allocation184_spill] sm:$0xff] }
 0x40d   : > { %2144 = vmatmul.mubr.f32.vlgmr.msra.gmra.mxu0 %v7179_v53  ;;  %2288 = vmatprep.subr.mxu0 %v4377_v42  ;;  %v912_v53 = vmul.f32 %v7189_v57, %v7189_v57  ;;  %v7196_v57 = vld [vmem:[#allocation249_spill] sm:$0xff] }
 0x40e   : > { %2290 = vmatpush1.msra.mxu0 %v4379_v43  ;;  %2449 = vmatprep.subr.mxu1 %v7186_v60  ;;  %v916_v60 = vadd.f32 %v915_v33, %v905_v52  ;;  %v909_v52 = vmul.f32 %v7196_v57, %v7196_v57  ;;  %v7204_v57 = vld [vmem:[#allocation82_spill] sm:$0xff] }
 0x40f   : > { %2292 = vmatprep.subr.mxu0 %v4381_v44  ;;  %2455 = vmatpush1.msra.mxu1 %v7187_v46  ;;  %v7193_v46 = vld [vmem:[#allocation47_spill] sm:$0xff]  ;;  %v932_v30 = vadd.f32 %v931_v20, %v912_v53  ;;  %v7200_v20 = vld [vmem:[#allocation66_spill] sm:$0xff] }
 0x410   : > { %2294 = vmatpush1.msra.mxu0 %v4383_v48  ;;  %2461 = vmatprep.subr.mxu1 %v7188_v38  ;;  %v7194_v38 = vld [vmem:[#allocation50_spill] sm:$0xff]  ;;  %v917_v33 = vadd.f32 %v916_v60, %v907_v34 }
 0x411   : > { %2296 = vmatprep.subr.mxu0 %v4385_v49  ;;  %2467 = vmatpush1.msra.mxu1 %v7190_v62  ;;  %v7197_v62 = vld [vmem:[#allocation56_spill] sm:$0xff]  ;;  %v933_v53 = vrot.slane %v932_v30, 4 }
 0x412   : > { %2298 = vmatpush1.msra.mxu0 %v4387_v50  ;;  %2473 = vmatprep.subr.mxu1 %v7192_v29  ;;  %v7199_v29 = vld [vmem:[#allocation62_spill] sm:$0xff]  ;;  %v918_v60 = vadd.f32 %v917_v33, %v909_v52  ;;  %v7206_v52 = vld [vmem:[#allocation88_spill] sm:$0xff]  ;;  %v7207_v33 = vld [vmem:[#allocation91_spill] sm:$0xff] }
 0x413   : > { %2300 = vmatprep.subr.mxu0 %v4390_v54  ;;  %2479 = vmatpush1.msra.mxu1 %v7193_v46  ;;  %v7201_v46 = vld [vmem:[#allocation256_spill] sm:$0xff] }
 0x414   : > { %2302 = vmatpush1.msra.mxu0 %v4392_v55  ;;  %2485 = vmatprep.subr.mxu1 %v7194_v38  ;;  %v911_v34 = vmul.f32 %v7201_v46, %v7201_v46  ;;  %v7202_v38 = vld [vmem:[#allocation72_spill] sm:$0xff] }
 0x415   : > { %2304 = vmatprep.subr.mxu0 %v4394_v56  ;;  %2491 = vmatpush1.msra.mxu1 %v7195_v14  ;;  %v7203_v14 = vld [vmem:[#allocation76_spill] sm:$0xff] }
 0x416   : > { %2306 = vmatpush1.msra.mxu0 %v4407_v61  ;;  %2497 = vmatprep.subr.mxu1 %v7197_v62  ;;  %v934_v62 = vadd.f32 %v933_v53, %v932_v30  ;;  %v7209_v30 = vld [vmem:[#allocation98_spill] sm:$0xff] }
 0x417   : > { %2308 = vmatprep.subr.mxu0 %v4413_v63  ;;  %2503 = vmatpush1.msra.mxu1 %v7198_v1  ;;  %v7205_v1 = vld [vmem:[#allocation85_spill] sm:$0xff] }
 0x418   : > { %2310 = vmatpush1.msra.mxu0 %v4429_v6  ;;  %2509 = vmatprep.subr.mxu1 %v7199_v29  ;;  %v919_v29 = vadd.f32 %v918_v60, %v911_v34  ;;  %v935_v46 = vrot.slane %v934_v62, 2  ;;  %v7210_v34 = vld [vmem:[#allocation104_spill] sm:$0xff] }
 0x419   : > { %2312 = vmatprep.subr.mxu0 %v4435_v8  ;;  %2515 = vmatpush1.msra.mxu1 %v7200_v20  ;;  %v7208_v20 = vld [vmem:[#allocation94_spill] sm:$0xff]  ;;  %v7211_v60 = vld [vmem:[#allocation108_spill] sm:$0xff] }
 0x41a   : > { %2314 = vmatpush1.msra.mxu0 %v4448_v11  ;;  %2521 = vmatprep.subr.mxu1 %v7202_v38  ;;  %v920_v53 = vrot.slane %v919_v29, 4  ;;  %v7212_v38 = vld [vmem:[#allocation114_spill] sm:$0xff] }
 0x41b   : > { %2316 = vmatprep.subr.mxu0 %v4462_v16  ;;  %2527 = vmatpush1.msra.mxu1 %v7203_v14  ;;  %v936_v14 = vadd.f32 %v935_v46, %v934_v62  ;;  %v7217_v62 = vld [vmem:[#allocation130_spill] sm:$0xff] }
 0x41c   : > { %2318 = vmatpush1.msra.mxu0 %v4486_v25  ;;  %2533 = vmatprep.subr.mxu1 %v7204_v57  ;;  %v7213_v57 = vld [vmem:[#allocation117_spill] sm:$0xff] }
 0x41d   : > { %2320 = vmatprep.subr.mxu0 %v4512_v35  ;;  %2539 = vmatpush1.msra.mxu1 %v7205_v1  ;;  %v921_v1 = vadd.f32 %v920_v53, %v919_v29  ;;  %v7218_v29 = vld [vmem:[#allocation136_spill] sm:$0xff] }
 0x41e   : > { %2322 = vmatpush1.msra.mxu0 %v4526_v40  ;;  %2545 = vmatprep.subr.mxu1 %v7206_v52  ;;  %v7214_v52 = vld [vmem:[#allocation120_spill] sm:$0xff] }
 0x41f   : > { %2324 = vmatprep.subr.mxu0 %v7007_v41  ;;  %2551 = vmatpush1.msra.mxu1 %v7207_v33  ;;  %v7215_v33 = vld [vmem:[#allocation123_spill] sm:$0xff]  ;;  %v922_v46 = vrot.slane %v921_v1, 2  ;;  %v7219_v53 = vld [vmem:[#allocation140_spill] sm:$0xff] }
 0x420   : > { %2326 = vmatpush1.msra.mxu0 %v7009_v10  ;;  %2557 = vmatprep.subr.mxu1 %v7208_v20  ;;  %v7216_v20 = vld [vmem:[#allocation126_spill] sm:$0xff] }
 0x421   : > { %2328 = vmatprep.subr.mxu0 %v7011_v59  ;;  %2563 = vmatpush1.msra.mxu1 %v7209_v30  ;;  %v937_v30 = vrot.slane %v936_v14, 1 }
 0x422   : > { %2330 = vmatpush1.msra.mxu0 %v7013_v36  ;;  %2569 = vmatprep.subr.mxu1 %v7210_v34  ;;  %v7220_v34 = vld [vmem:[#allocation146_spill] sm:$0xff] }
 0x423   : > { %2332 = vmatprep.subr.mxu0 %v7015_v27  ;;  %2575 = vmatpush1.msra.mxu1 %v7211_v60  ;;  %v938_v60 = vadd.f32 %v937_v30, %v936_v14  ;;  %v7226_v14 = vld [vmem:[#allocation162_spill] sm:$0xff] }
 0x424   : > { %2334 = vmatpush1.msra.mxu0 %v7017_v18  ;;  %2581 = vmatprep.subr.mxu1 %v7212_v38  ;;  %v7221_v38 = vld [vmem:[#allocation149_spill] sm:$0xff] }
 0x425   : > { %2336 = vmatprep.subr.mxu0 %v7019_v37  ;;  %2587 = vmatpush1.msra.mxu1 %v7213_v57  ;;  %v923_v57 = vadd.f32 %v922_v46, %v921_v1  ;;  %v7227_v1 = vld [vmem:[#allocation168_spill] sm:$0xff] }
 0x426   : > { %2338 = vmatpush1.msra.mxu0 %v7021_v23  ;;  %2593 = vmatprep.subr.mxu1 %v7214_v52  ;;  %v7222_v52 = vld [vmem:[#allocation152_spill] sm:$0xff] }
 0x427   : > { %2340 = vmatprep.subr.mxu0 %v7023_v32  ;;  %2599 = vmatpush1.msra.mxu1 %v7215_v33  ;;  %v7223_v33 = vld [vmem:[#allocation155_spill] sm:$0xff]  ;;  %v924_v30 = vrot.slane %v923_v57, 1  ;;  %v7228_v46 = vld [vmem:[#allocation116_spill] sm:$0xff] }
 0x428   : > { %2342 = vmatpush1.msra.mxu0 %v7025_v51  ;;  %2605 = vmatprep.subr.mxu1 %v7216_v20  ;;  %v7224_v20 = vld [vmem:[#allocation158_spill] sm:$0xff] }
 0x429   : > { %2344 = vmatprep.subr.mxu0 %v7027_v22  ;;  %2611 = vmatpush1.msra.mxu1 %v7217_v62  ;;  %v5928_v62 = vand.u32 4294901760, %v938_v60 }
 0x42a   : > { %2346 = vmatpush1.msra.mxu0 %v7029_v24  ;;  %2617 = vmatprep.subr.mxu1 %v7218_v29  ;;  %v7229_v29 = vld [vmem:[#allocation172_spill] sm:$0xff] }
 0x42b   : > { %2348 = vmatprep.subr.mxu0 %v7031_v47  ;;  %2623 = vmatpush1.msra.mxu1 %v7219_v53  ;;  %7225 = vst [vmem:[#allocation36_spill] sm:$0xff] %v5928_v62  ;;  %v7230_v53 = vld [vmem:[#allocation121_spill] sm:$0xff] }
 0x42c   : > { %2350 = vmatpush1.msra.mxu0 %v7033_v39  ;;  %2629 = vmatprep.subr.mxu1 %v7220_v34  ;;  %v7231_v34 = vld [vmem:[#allocation178_spill] sm:$0xff] }
 0x42d   : > { %2352 = vmatprep.subr.mxu0 %v7116_v17  ;;  %2635 = vmatpush2.msra.mxu1 %v7221_v38  ;;  %v5939_v38 = vsub.f32 %v938_v60, %v5928_v62 }
 0x42e   : > { %2354 = vmatpush2.msra.mxu0 %v7118_v12  ;;  %2641 = vmatprep.subr.mxu1 %v7222_v52  ;;  %v7233_v52 = vld [vmem:[#allocation125_spill] sm:$0xff] }
 0x42f   : > { %2356 = vmatprep.subr.mxu0 %v7120_v2  ;;  %2647 = vmatpush2.msra.mxu1 %v7223_v33  ;;  %7232 = vst [vmem:[#allocation40_spill] sm:$0xff] %v5939_v38  ;;  %v7234_v33 = vld [vmem:[#allocation181_spill] sm:$0xff]  ;;  %v6725_v60 = vand.u32 4294901760, %v5939_v38 }
 0x430   : > { %2358 = vmatpush2.msra.mxu0 %v7122_v58  ;;  %2653 = vmatprep.subr.mxu1 %v7224_v20  ;;  %v925_v20 = vadd.f32 %v924_v30, %v923_v57  ;;  %v7244_v57 = vld [vmem:[#allocation144_spill] sm:$0xff] }
 0x431   : > { %2360 = vmatprep.subr.mxu0 %v7124_v3  ;;  %2659 = vmatpush2.msra.mxu1 %v7226_v14  ;;  %v7235_v14 = vld [vmem:[#allocation129_spill] sm:$0xff]  ;;  %v7245_v30 = vld [vmem:[#allocation200_spill] sm:$0xff] }
 0x432   : > { %2362 = vmatpush2.msra.mxu0 %v7126_v31  ;;  %2665 = vmatprep.subr.mxu1 %v7227_v1  ;;  %v7237_v1 = vld [vmem:[#allocation132_spill] sm:$0xff] }
 0x433   : > { %2364 = vmatprep.subr.mxu0 %v7228_v46  ;;  %2671 = vmatpush2.msra.mxu1 %v7229_v29  ;;  %v7239_v29 = vld [vmem:[#allocation135_spill] sm:$0xff] }
 0x434   : > { %2366 = vmatpush2.msra.mxu0 %v7230_v53  ;;  %2677 = vmatprep.subr.mxu1 %v7231_v34  ;;  %v7241_v34 = vld [vmem:[#allocation139_spill] sm:$0xff] }
 0x435   : > { %2368 = vmatprep.subr.mxu0 %v7233_v52  ;;  %2683 = vmatpush2.msra.mxu1 %v7234_v33  ;;  %v7242_v52 = vld [vmem:[#allocation194_spill] sm:$0xff]  ;;  %v5952_v33 = vand.u32 4294901760, %v925_v20 }
 0x436   : > { %2370 = vmatpush2.msra.mxu0 %v7235_v14  ;;  %2689 = vmatprep.subr.mxu1 %v7236_v19  ;;  %v7246_v19 = vld [vmem:[#allocation204_spill] sm:$0xff] }
 0x437   : > { %2372 = vmatprep.subr.mxu0 %v7237_v1  ;;  %2695 = vmatpush2.msra.mxu1 %v7238_v28  ;;  %7243 = vst [vmem:[#allocation43_spill] sm:$0xff] %v5952_v33  ;;  %v7247_v28 = vld [vmem:[#allocation153_spill] sm:$0xff] }
 0x438   : > { %2374 = vmatpush2.msra.mxu0 %v7239_v29  ;;  %2701 = vmatprep.subr.mxu1 %v7240_v15  ;;  %v7248_v29 = vld [vmem:[#allocation209_spill] sm:$0xff]  ;;  %v2418_v15 = vsub.f32 %v5939_v38, %v6725_v60  ;;  %v7256_v38 = vld [vmem:[#allocation230_spill] sm:$0xff] }
 0x439   : > { %2376 = vmatprep.subr.mxu0 %v7241_v34  ;;  %2707 = vmatpush2.msra.mxu1 %v7242_v52  ;;  %v7249_v34 = vld [vmem:[#allocation157_spill] sm:$0xff]  ;;  %v7250_v52 = vld [vmem:[#allocation214_spill] sm:$0xff] }
 0x43a   : > { %2378 = vmatpush2.msra.mxu0 %v7244_v57  ;;  %2713 = vmatprep.subr.mxu1 %v7245_v30  ;;  %v5966_v57 = vsub.f32 %v925_v20, %v5952_v33  ;;  %v7252_v30 = vld [vmem:[#allocation219_spill] sm:$0xff]  ;;  %v2419_v60 = vand.u32 4294901760, %v2418_v15  ;;  %v7263_v15 = vld [vmem:[#allocation193_spill] sm:$0xff] }
 0x43b   : > { %2380 = vmatprep.subr.mxu0 %v7144_v0  ;;  %2719 = vmatpush2.msra.mxu1 %v7246_v19  ;;  %v7253_v19 = vld [vmem:[#allocation223_spill] sm:$0xff] }
 0x43c   : > { %2382 = vmatpush2.msra.mxu0 %v7247_v28  ;;  %2725 = vmatprep.subr.mxu1 %v7248_v29  ;;  %7251 = vst [vmem:[#allocation46_spill] sm:$0xff] %v5966_v57  ;;  %v7254_v29 = vld [vmem:[#allocation167_spill] sm:$0xff]  ;;  %v7255_v28 = vld [vmem:[#allocation226_spill] sm:$0xff]  ;;  %v6730_v20 = vand.u32 4294901760, %v5966_v57 }
 0x43d   : > { %2384 = vmatprep.subr.mxu0 %v7249_v34  ;;  %2731 = vmatpush2.msra.mxu1 %v7250_v52  ;;  %v7257_v52 = vld [vmem:[#allocation176_spill] sm:$0xff] }
 0x43e   : > { %2386 = vmatpush2.msra.mxu0 %v7152_v7  ;;  %2737 = vmatprep.subr.mxu1 %v7252_v30  ;;  %v7258_v7 = vld [vmem:[#allocation236_spill] sm:$0xff] }
 0x43f   : > { %2388 = vmatprep.subr.mxu0 %v7071_v9  ;;  %2743 = vmatpush2.msra.mxu1 %v7253_v19  ;;  %v7259_v30 = vld [vmem:[#allocation180_spill] sm:$0xff]  ;;  %v7261_v19 = vld [vmem:[#allocation189_spill] sm:$0xff] }
 0x440   : > { %2390 = vmatpush2.msra.mxu0 %v7254_v29  ;;  %2749 = vmatprep.subr.mxu1 %v7255_v28  ;;  %v7260_v9 = vld [vmem:[#allocation240_spill] sm:$0xff]  ;;  %v7262_v28 = vld [vmem:[#allocation247_spill] sm:$0xff] }
 0x441   : > { %2392 = vmatprep.subr.mxu0 %v7075_v5  ;;  %2755 = vmatpush2.msra.mxu1 %v7256_v38  ;;  %v2424_v38 = vsub.f32 %v5966_v57, %v6730_v20  ;;  %v7268_v20 = vld [vmem:[#allocation262_spill] sm:$0xff]  ;;  %v7269_v57 = vld [vmem:[#allocation211_spill] sm:$0xff] }
 0x442   : > { %2394 = vmatpush2.msra.mxu0 %v7257_v52  ;;  %2761 = vmatprep.subr.mxu1 %v7258_v7  ;;  %v7264_v52 = vld [vmem:[#allocation250_spill] sm:$0xff]  ;;  %v7265_v7 = vld [vmem:[#allocation253_spill] sm:$0xff] }
 0x443   : > { %2396 = vmatprep.subr.mxu0 %v7259_v30  ;;  %2767 = vmatpush2.msra.mxu1 %v7260_v9  ;;  %v7266_v9 = vld [vmem:[#allocation257_spill] sm:$0xff] }
 0x444   : > { %2398 = vmatpush2.msra.mxu0 %v5221_v45  ;;  %2420 = vmatprep.mubr.f32.mxu0 %v2419_v60  ;;  %v2425_v60 = vand.u32 4294901760, %v2424_v38  ;;  %v7275_v38 = vld [vmem:[#allocation14_spill] sm:$0xff] }
 0x445   : > { %2400 = vmatprep.subr.mxu0 %v7261_v19  ;;  %2773 = vmatprep.subr.mxu1 %v7262_v28  ;;  %v7267_v28 = vld [vmem:[#allocation260_spill] sm:$0xff] }
 0x446   : > { %2402 = vmatpush2.msra.mxu0 %v7263_v15  ;;  %2779 = vmatpush2.msra.mxu1 %v7264_v52  ;;  %v7270_v52 = vld [vmem:[#allocation263_spill] sm:$0xff] }
 0x447   : > { %2404 = vmatprep.subr.mxu0 %v5269_v4  ;;  %2785 = vmatprep.subr.mxu1 %v7265_v7  ;;  %v7271_v4 = vld [vmem:[#allocation220_spill] sm:$0xff] }
 0x448   : > { %2406 = vmatpush2.msra.mxu0 %v5283_v13  ;;  %2791 = vmatpush2.msra.mxu1 %v7266_v9  ;;  %v7272_v7 = vld [vmem:[#allocation264_spill] sm:$0xff]  ;;  %v7274_v9 = vld [vmem:[#allocation13_spill] sm:$0xff] }
 0x449   : > { %2408 = vmatprep.subr.mxu0 %v5299_v21  ;;  %2797 = vmatprep.subr.mxu1 %v7267_v28  ;;  %v7273_v13 = vld [vmem:[#allocation12_spill] sm:$0xff]  ;;  %v7277_v28 = vld [vmem:[#allocation19_spill] sm:$0xff] }
 0x44a   : > { %2410 = vmatpush2.msra.mxu0 %v5323_v26  ;;  %2803 = vmatpush2.msra.mxu1 %v7268_v20  ;;  %v7276_v20 = vld [vmem:[#allocation16_spill] sm:$0xff] }
 0x44b   : > { %2412 = vmatprep.subr.mxu0 %v7269_v57  ;;  %2809 = vmatprep.subr.mxu1 %v7270_v52  ;;  %v7278_v52 = vld [vmem:[#allocation21_spill] sm:$0xff] }
 0x44c   : > { %2414 = vmatpush2.msra.mxu0 %v7271_v4  ;;  %2815 = vmatpush2.msra.mxu1 %v7272_v7  ;;  %v7281_v7 = vld [vmem:[#allocation32_spill] sm:$0xff] }
 0x44d   : > { %2827 = vmatprep.subr.mxu0 %v7273_v13  ;;  %2426 = vmatmul.mubr.f32.vlgmr.msra.gmra.mxu0 %v2425_v60  ;;  %v7279_v13 = vld [vmem:[#allocation23_spill] sm:$0xff]  ;;  %v7280_v60 = vld [vmem:[#allocation30_spill] sm:$0xff] }
 0x44e   : > { %2830 = vmatpush1.msra.mxu0 %v7274_v9  ;;  %2817 = vmatprep.mubr.f32.mxu1 %v5928_v62  ;;  %v7282_v9 = vld [vmem:[#allocation35_spill] sm:$0xff] }
 0x44f   : > { %2833 = vmatprep.subr.mxu0 %v7275_v38  ;;  %2819 = vmatmul.mubr.f32.vlgmr.msra.gmra.mxu1 %v5952_v33  ;;  %v7283_v38 = vld [vmem:[#allocation39_spill] sm:$0xff]  ;;  %v7324_v33 = vld [vmem:[#allocation192_spill] sm:$0xff] }
 0x450   : > { %2836 = vmatpush1.msra.mxu0 %v7276_v20  ;;  %3029 = vmatprep.subr.mxu1 %v4377_v42  ;;  %v7284_v20 = vld [vmem:[#allocation42_spill] sm:$0xff]  ;;  %v7326_v62 = vld [vmem:[#allocation195_spill] sm:$0xff] }
 0x451   : > { %2839 = vmatprep.subr.mxu0 %v7277_v28  ;;  %3031 = vmatpush1.msra.mxu1 %v4379_v43  ;;  %v7285_v28 = vld [vmem:[#allocation45_spill] sm:$0xff] }
 0x452   : > { %2842 = vmatpush1.msra.mxu0 %v7278_v52  ;;  %3033 = vmatprep.subr.mxu1 %v4381_v44  ;;  %v7286_v52 = vld [vmem:[#allocation49_spill] sm:$0xff] }
 0x453   : > { %2845 = vmatprep.subr.mxu0 %v7279_v13  ;;  %3035 = vmatpush1.msra.mxu1 %v4383_v48  ;;  %v7287_v13 = vld [vmem:[#allocation55_spill] sm:$0xff] }
 0x454   : > { %2848 = vmatpush1.msra.mxu0 %v7280_v60  ;;  %3037 = vmatprep.subr.mxu1 %v4385_v49  ;;  %v7288_v60 = vld [vmem:[#allocation58_spill] sm:$0xff] }
 0x455   : > { %2851 = vmatprep.subr.mxu0 %v7281_v7  ;;  %3039 = vmatpush1.msra.mxu1 %v4387_v50  ;;  %v7289_v7 = vld [vmem:[#allocation64_spill] sm:$0xff] }
 0x456   : > { %2854 = vmatpush1.msra.mxu0 %v7282_v9  ;;  %3041 = vmatprep.subr.mxu1 %v4390_v54  ;;  %v7290_v9 = vld [vmem:[#allocation67_spill] sm:$0xff] }
 0x457   : > { %2857 = vmatprep.subr.mxu0 %v7283_v38  ;;  %3043 = vmatpush1.msra.mxu1 %v4392_v55  ;;  %v7291_v38 = vld [vmem:[#allocation70_spill] sm:$0xff] }
 0x458   : > { %2860 = vmatpush1.msra.mxu0 %v7284_v20  ;;  %3045 = vmatprep.subr.mxu1 %v4394_v56  ;;  %v7292_v20 = vld [vmem:[#allocation74_spill] sm:$0xff] }
 0x459   : > { %2863 = vmatprep.subr.mxu0 %v7285_v28  ;;  %3047 = vmatpush1.msra.mxu1 %v4407_v61  ;;  %v7293_v28 = vld [vmem:[#allocation78_spill] sm:$0xff] }
 0x45a   : > { %2866 = vmatpush1.msra.mxu0 %v7286_v52  ;;  %3049 = vmatprep.subr.mxu1 %v4413_v63  ;;  %v7294_v52 = vld [vmem:[#allocation81_spill] sm:$0xff] }
 0x45b   : > { %2869 = vmatprep.subr.mxu0 %v7287_v13  ;;  %3051 = vmatpush1.msra.mxu1 %v4429_v6  ;;  %v7295_v13 = vld [vmem:[#allocation87_spill] sm:$0xff] }
 0x45c   : > { %2872 = vmatpush1.msra.mxu0 %v7288_v60  ;;  %3053 = vmatprep.subr.mxu1 %v4435_v8  ;;  %v7296_v60 = vld [vmem:[#allocation90_spill] sm:$0xff] }
 0x45d   : > { %2875 = vmatprep.subr.mxu0 %v7289_v7  ;;  %3055 = vmatpush1.msra.mxu1 %v4448_v11  ;;  %v7297_v7 = vld [vmem:[#allocation96_spill] sm:$0xff] }
 0x45e   : > { %2878 = vmatpush1.msra.mxu0 %v7290_v9  ;;  %3057 = vmatprep.subr.mxu1 %v4462_v16  ;;  %v7298_v9 = vld [vmem:[#allocation99_spill] sm:$0xff] }
 0x45f   : > { %2881 = vmatprep.subr.mxu0 %v7291_v38  ;;  %3059 = vmatpush1.msra.mxu1 %v4486_v25  ;;  %v7299_v38 = vld [vmem:[#allocation102_spill] sm:$0xff] }
 0x460   : > { %2884 = vmatpush1.msra.mxu0 %v7292_v20  ;;  %3061 = vmatprep.subr.mxu1 %v4512_v35  ;;  %v7300_v20 = vld [vmem:[#allocation106_spill] sm:$0xff] }
 0x461   : > { %2887 = vmatprep.subr.mxu0 %v7293_v28  ;;  %3063 = vmatpush1.msra.mxu1 %v4526_v40  ;;  %v7301_v28 = vld [vmem:[#allocation110_spill] sm:$0xff] }
 0x462   : > { %2890 = vmatpush1.msra.mxu0 %v7294_v52  ;;  %3065 = vmatprep.subr.mxu1 %v7007_v41  ;;  %v7302_v52 = vld [vmem:[#allocation113_spill] sm:$0xff] }
 0x463   : > { %2893 = vmatprep.subr.mxu0 %v7295_v13  ;;  %3067 = vmatpush1.msra.mxu1 %v7009_v10  ;;  %v7303_v13 = vld [vmem:[#allocation119_spill] sm:$0xff] }
 0x464   : > { %2896 = vmatpush1.msra.mxu0 %v7296_v60  ;;  %3069 = vmatprep.subr.mxu1 %v7011_v59  ;;  %v7304_v60 = vld [vmem:[#allocation122_spill] sm:$0xff] }
 0x465   : > { %2899 = vmatprep.subr.mxu0 %v7297_v7  ;;  %3071 = vmatpush1.msra.mxu1 %v7013_v36  ;;  %v7305_v7 = vld [vmem:[#allocation128_spill] sm:$0xff] }
 0x466   : > { %2902 = vmatpush1.msra.mxu0 %v7298_v9  ;;  %3073 = vmatprep.subr.mxu1 %v7015_v27  ;;  %v7306_v9 = vld [vmem:[#allocation131_spill] sm:$0xff] }
 0x467   : > { %2905 = vmatprep.subr.mxu0 %v7299_v38  ;;  %3075 = vmatpush1.msra.mxu1 %v7017_v18  ;;  %v7307_v38 = vld [vmem:[#allocation134_spill] sm:$0xff] }
 0x468   : > { %2908 = vmatpush1.msra.mxu0 %v7300_v20  ;;  %3077 = vmatprep.subr.mxu1 %v7019_v37  ;;  %v7308_v20 = vld [vmem:[#allocation138_spill] sm:$0xff] }
 0x469   : > { %2911 = vmatprep.subr.mxu0 %v7301_v28  ;;  %3079 = vmatpush1.msra.mxu1 %v7021_v23  ;;  %v7309_v28 = vld [vmem:[#allocation142_spill] sm:$0xff] }
 0x46a   : > { %2914 = vmatpush1.msra.mxu0 %v7302_v52  ;;  %3081 = vmatprep.subr.mxu1 %v7023_v32  ;;  %v7310_v52 = vld [vmem:[#allocation145_spill] sm:$0xff] }
 0x46b   : > { %2917 = vmatprep.subr.mxu0 %v7303_v13  ;;  %3083 = vmatpush1.msra.mxu1 %v7025_v51  ;;  %v7311_v13 = vld [vmem:[#allocation151_spill] sm:$0xff] }
 0x46c   : > { %2920 = vmatpush1.msra.mxu0 %v7304_v60  ;;  %3085 = vmatprep.subr.mxu1 %v7027_v22  ;;  %v7312_v60 = vld [vmem:[#allocation154_spill] sm:$0xff] }
 0x46d   : > { %2923 = vmatprep.subr.mxu0 %v7305_v7  ;;  %3087 = vmatpush1.msra.mxu1 %v7029_v24  ;;  %v7313_v7 = vld [vmem:[#allocation160_spill] sm:$0xff] }
 0x46e   : > { %2926 = vmatpush2.msra.mxu0 %v7306_v9  ;;  %3089 = vmatprep.subr.mxu1 %v7031_v47  ;;  %v7314_v9 = vld [vmem:[#allocation163_spill] sm:$0xff] }
 0x46f   : > { %2929 = vmatprep.subr.mxu0 %v7307_v38  ;;  %3091 = vmatpush1.msra.mxu1 %v7033_v39  ;;  %v7315_v38 = vld [vmem:[#allocation166_spill] sm:$0xff] }
 0x470   : > { %2932 = vmatpush2.msra.mxu0 %v7308_v20  ;;  %3093 = vmatprep.subr.mxu1 %v7116_v17  ;;  %v7316_v20 = vld [vmem:[#allocation170_spill] sm:$0xff] }
 0x471   : > { %2935 = vmatprep.subr.mxu0 %v7309_v28  ;;  %3095 = vmatpush2.msra.mxu1 %v7118_v12  ;;  %v7317_v28 = vld [vmem:[#allocation125_spill] sm:$0xff] }
 0x472   : > { %2938 = vmatpush2.msra.mxu0 %v7310_v52  ;;  %3097 = vmatprep.subr.mxu1 %v7120_v2  ;;  %v7318_v52 = vld [vmem:[#allocation174_spill] sm:$0xff] }
 0x473   : > { %2941 = vmatprep.subr.mxu0 %v7311_v13  ;;  %3099 = vmatpush2.msra.mxu1 %v7122_v58  ;;  %v7319_v13 = vld [vmem:[#allocation177_spill] sm:$0xff] }
 0x474   : > { %2944 = vmatpush2.msra.mxu0 %v7312_v60  ;;  %3101 = vmatprep.subr.mxu1 %v7124_v3  ;;  %v7320_v60 = vld [vmem:[#allocation183_spill] sm:$0xff] }
 0x475   : > { %2947 = vmatprep.subr.mxu0 %v7313_v7  ;;  %3103 = vmatpush2.msra.mxu1 %v7126_v31  ;;  %v7321_v7 = vld [vmem:[#allocation135_spill] sm:$0xff] }
 0x476   : > { %2950 = vmatpush2.msra.mxu0 %v7314_v9  ;;  %3105 = vmatprep.subr.mxu1 %v7228_v46  ;;  %v7322_v9 = vld [vmem:[#allocation186_spill] sm:$0xff] }
 0x477   : > { %2953 = vmatprep.subr.mxu0 %v7315_v38  ;;  %3107 = vmatpush2.msra.mxu1 %v7230_v53  ;;  %v7323_v38 = vld [vmem:[#allocation139_spill] sm:$0xff] }
 0x478   : > { %2956 = vmatpush2.msra.mxu0 %v7316_v20  ;;  %3109 = vmatprep.subr.mxu1 %v7317_v28  ;;  %v7325_v20 = vld [vmem:[#allocation144_spill] sm:$0xff] }
 0x479   : > { %2959 = vmatprep.subr.mxu0 %v7318_v52  ;;  %3111 = vmatpush2.msra.mxu1 %v7235_v14  ;;  %v7327_v52 = vld [vmem:[#allocation198_spill] sm:$0xff] }
 0x47a   : > { %2962 = vmatpush2.msra.mxu0 %v7319_v13  ;;  %3113 = vmatprep.subr.mxu1 %v7237_v1  ;;  %v7328_v13 = vld [vmem:[#allocation153_spill] sm:$0xff]  ;;  %v7329_v1 = vld [vmem:[#allocation202_spill] sm:$0xff] }
 0x47b   : > { %2965 = vmatprep.subr.mxu0 %v7320_v60  ;;  %3115 = vmatpush2.msra.mxu1 %v7321_v7  ;;  %v7330_v60 = vld [vmem:[#allocation206_spill] sm:$0xff] }
 0x47c   : > { %2968 = vmatpush2.msra.mxu0 %v7322_v9  ;;  %3117 = vmatprep.subr.mxu1 %v7323_v38  ;;  %v7331_v9 = vld [vmem:[#allocation161_spill] sm:$0xff]  ;;  %v7332_v38 = vld [vmem:[#allocation208_spill] sm:$0xff] }
 0x47d   : > { %2971 = vmatprep.subr.mxu0 %v7324_v33  ;;  %3119 = vmatpush2.msra.mxu1 %v7325_v20  ;;  %v7333_v33 = vld [vmem:[#allocation164_spill] sm:$0xff] }
 0x47e   : > { %2974 = vmatpush2.msra.mxu0 %v7326_v62  ;;  %3121 = vmatprep.subr.mxu1 %v7144_v0  ;;  %v7334_v20 = vld [vmem:[#allocation216_spill] sm:$0xff]  ;;  %v7335_v62 = vld [vmem:[#allocation221_spill] sm:$0xff] }
 0x47f   : > { %2977 = vmatprep.subr.mxu0 %v7327_v52  ;;  %3123 = vmatpush2.msra.mxu1 %v7328_v13  ;;  %v7336_v52 = vld [vmem:[#allocation229_spill] sm:$0xff] }
 0x480   : > { %2980 = vmatpush2.msra.mxu0 %v7329_v1  ;;  %3125 = vmatprep.subr.mxu1 %v7249_v34  ;;  %v7337_v1 = vld [vmem:[#allocation176_spill] sm:$0xff] }
 0x481   : > { %2983 = vmatprep.subr.mxu0 %v7330_v60  ;;  %3127 = vmatpush2.msra.mxu1 %v7331_v9  ;;  %v7338_v34 = vld [vmem:[#allocation232_spill] sm:$0xff]  ;;  %v7339_v60 = vld [vmem:[#allocation235_spill] sm:$0xff] }
 0x482   : > { %2986 = vmatpush2.msra.mxu0 %v7332_v38  ;;  %3129 = vmatprep.subr.mxu1 %v7333_v33  ;;  %v7340_v38 = vld [vmem:[#allocation40_spill] sm:$0xff]  ;;  %v7341_v33 = vld [vmem:[#allocation239_spill] sm:$0xff] }
 0x483   : > { %2989 = vmatprep.subr.mxu0 %v7334_v20  ;;  %3131 = vmatpush2.msra.mxu1 %v7254_v29  ;;  %v7342_v20 = vld [vmem:[#allocation245_spill] sm:$0xff] }
 0x484   : > { %2992 = vmatpush2.msra.mxu0 %v7335_v62  ;;  %3133 = vmatprep.subr.mxu1 %v7075_v5  ;;  %v7343_v62 = vld [vmem:[#allocation248_spill] sm:$0xff] }
 0x485   : > { %2995 = vmatprep.subr.mxu0 %v7336_v52  ;;  %3135 = vmatpush2.msra.mxu1 %v7337_v1  ;;  %v7344_v52 = vld [vmem:[#allocation255_spill] sm:$0xff]  ;;  %v7348_v1 = vld [vmem:[#allocation46_spill] sm:$0xff] }
 0x486   : > { %2998 = vmatpush2.msra.mxu0 %v7338_v34  ;;  %3137 = vmatprep.subr.mxu1 %v7259_v30  ;;  %v7345_v34 = vld [vmem:[#allocation196_spill] sm:$0xff]  ;;  %v7346_v30 = vld [vmem:[#allocation258_spill] sm:$0xff] }
 0x487   : > { %3001 = vmatprep.subr.mxu0 %v7339_v60  ;;  %3019 = vmatprep.mubr.f32.mxu0 %v7340_v38  ;;  %v7347_v60 = vld [vmem:[#allocation199_spill] sm:$0xff] }
 0x488   : > { %3004 = vmatpush2.msra.mxu0 %v7341_v33  ;;  %3139 = vmatpush2.msra.mxu1 %v5221_v45  ;;  %v7349_v33 = vld [vmem:[#allocation15_spill] sm:$0xff]  ;;  %v7350_v45 = vld [vmem:[#allocation17_spill] sm:$0xff] }
 0x489   : > { %3007 = vmatprep.subr.mxu0 %v7342_v20  ;;  %3141 = vmatprep.subr.mxu1 %v7261_v19  ;;  %v7351_v20 = vld [vmem:[#allocation18_spill] sm:$0xff] }
 0x48a   : > { %3010 = vmatpush2.msra.mxu0 %v7343_v62  ;;  %3143 = vmatpush2.msra.mxu1 %v7263_v15  ;;  %v7352_v62 = vld [vmem:[#allocation20_spill] sm:$0xff] }
 0x48b   : > { %3013 = vmatprep.subr.mxu0 %v7344_v52  ;;  %3145 = vmatprep.subr.mxu1 %v7345_v34  ;;  %v7353_v52 = vld [vmem:[#allocation22_spill] sm:$0xff] }
 0x48c   : > { %3016 = vmatpush2.msra.mxu0 %v7346_v30  ;;  %3147 = vmatpush2.msra.mxu1 %v7347_v60  ;;  %v7354_v30 = vld [vmem:[#allocation25_spill] sm:$0xff] }
 0x48d   : > { %3022 = vmatmul.mubr.f32.vlgmr.msra.gmra.mxu0 %v7348_v1  ;;  %3172 = vmatprep.subr.mxu0 %v7349_v33  ;;  %v7355_v33 = vand.u32 4294901760, %v7340_v38  ;;  %v7362_v38 = vld [vmem:[#allocation48_spill] sm:$0xff] }
 0x48e   : > { %3176 = vmatpush1.msra.mxu0 %v7350_v45  ;;  %3149 = vmatprep.subr.mxu1 %v5299_v21  ;;  %v7356_v45 = vld [vmem:[#allocation28_spill] sm:$0xff]  ;;  %v7357_v21 = vand.u32 4294901760, %v7348_v1 }
 0x48f   : > { %3180 = vmatprep.subr.mxu0 %v7351_v20  ;;  %3151 = vmatpush2.msra.mxu1 %v5323_v26  ;;  %v7358_v20 = vld [vmem:[#allocation34_spill] sm:$0xff]  ;;  %v7401_v1 = vld [vmem:[#allocation132_spill] sm:$0xff] }
 0x490   : > { %3184 = vmatpush1.msra.mxu0 %v7352_v62  ;;  %3153 = vmatprep.subr.mxu1 %v7269_v57  ;;  %v7359_v62 = vld [vmem:[#allocation38_spill] sm:$0xff] }
 0x491   : > { %3188 = vmatprep.subr.mxu0 %v7353_v52  ;;  %3155 = vmatpush2.msra.mxu1 %v7271_v4  ;;  %v7360_v52 = vld [vmem:[#allocation41_spill] sm:$0xff] }
 0x492   : > { %3192 = vmatpush1.msra.mxu0 %v7354_v30  ;;  %3159 = vmatprep.mubr.f32.mxu1 %v7355_v33  ;;  %v7361_v30 = vld [vmem:[#allocation44_spill] sm:$0xff]  ;;  %v7404_v33 = vld [vmem:[#allocation139_spill] sm:$0xff] }
 0x493   : > { %3196 = vmatprep.subr.mxu0 %v7356_v45  ;;  %3163 = vmatmul.mubr.f32.vlgmr.msra.gmra.mxu1 %v7357_v21  ;;  %v7363_v21 = vld [vmem:[#allocation51_spill] sm:$0xff]  ;;  %v7406_v45 = vld [vmem:[#allocation144_spill] sm:$0xff] }
 0x494   : > { %3200 = vmatpush1.msra.mxu0 %v7358_v20  ;;  %3435 = vmatprep.subr.mxu1 %v4377_v42  ;;  %v7364_v42 = vld [vmem:[#allocation54_spill] sm:$0xff]  ;;  %v7409_v20 = vld [vmem:[#allocation227_spill] sm:$0xff] }
 0x495   : > { %3204 = vmatprep.subr.mxu0 %v7359_v62  ;;  %3437 = vmatpush1.msra.mxu1 %v4379_v43  ;;  %v7365_v43 = vld [vmem:[#allocation60_spill] sm:$0xff]  ;;  %v7410_v62 = vld [vmem:[#allocation157_spill] sm:$0xff] }
 0x496   : > { %3208 = vmatpush1.msra.mxu0 %v7360_v52  ;;  %3439 = vmatprep.subr.mxu1 %v4381_v44  ;;  %v7366_v44 = vld [vmem:[#allocation63_spill] sm:$0xff]  ;;  %v7412_v52 = vld [vmem:[#allocation238_spill] sm:$0xff] }
 0x497   : > { %3212 = vmatprep.subr.mxu0 %v7361_v30  ;;  %3441 = vmatpush1.msra.mxu1 %v4383_v48  ;;  %v7367_v48 = vld [vmem:[#allocation69_spill] sm:$0xff]  ;;  %v7413_v30 = vld [vmem:[#allocation164_spill] sm:$0xff] }
 0x498   : > { %3216 = vmatpush1.msra.mxu0 %v7362_v38  ;;  %3443 = vmatprep.subr.mxu1 %v4385_v49  ;;  %v7368_v49 = vld [vmem:[#allocation73_spill] sm:$0xff]  ;;  %v7414_v38 = vld [vmem:[#allocation242_spill] sm:$0xff] }
 0x499   : > { %3220 = vmatprep.subr.mxu0 %v7363_v21  ;;  %3445 = vmatpush1.msra.mxu1 %v4387_v50  ;;  %v7369_v50 = vld [vmem:[#allocation77_spill] sm:$0xff]  ;;  %v7417_v21 = vld [vmem:[#allocation176_spill] sm:$0xff] }
 0x49a   : > { %3224 = vmatpush1.msra.mxu0 %v7364_v42  ;;  %3447 = vmatprep.subr.mxu1 %v4390_v54  ;;  %v7370_v54 = vld [vmem:[#allocation79_spill] sm:$0xff]  ;;  %v7418_v42 = vld [vmem:[#allocation254_spill] sm:$0xff] }
 0x49b   : > { %3228 = vmatprep.subr.mxu0 %v7365_v43  ;;  %3449 = vmatpush1.msra.mxu1 %v4392_v55  ;;  %v7371_v55 = vld [vmem:[#allocation83_spill] sm:$0xff]  ;;  %v7419_v43 = vld [vmem:[#allocation180_spill] sm:$0xff] }
 0x49c   : > { %3232 = vmatpush1.msra.mxu0 %v7366_v44  ;;  %3451 = vmatprep.subr.mxu1 %v4394_v56  ;;  %v7372_v56 = vld [vmem:[#allocation86_spill] sm:$0xff]  ;;  %v7421_v44 = vld [vmem:[#allocation36_spill] sm:$0xff] }
 0x49d   : > { %3236 = vmatprep.subr.mxu0 %v7367_v48  ;;  %3453 = vmatpush1.msra.mxu1 %v4407_v61  ;;  %v7373_v61 = vld [vmem:[#allocation92_spill] sm:$0xff]  ;;  %v7422_v48 = vld [vmem:[#allocation261_spill] sm:$0xff] }
 0x49e   : > { %3240 = vmatpush1.msra.mxu0 %v7368_v49  ;;  %3455 = vmatprep.subr.mxu1 %v4413_v63  ;;  %v7374_v63 = vld [vmem:[#allocation95_spill] sm:$0xff]  ;;  %v7423_v49 = vld [vmem:[#allocation185_spill] sm:$0xff] }
 0x49f   : > { %3244 = vmatprep.subr.mxu0 %v7369_v50  ;;  %3457 = vmatpush1.msra.mxu1 %v4429_v6  ;;  %v7375_v6 = vld [vmem:[#allocation101_spill] sm:$0xff]  ;;  %v1143_v50 = vpop.f32.mrf.mxu0 }
 0x4a0   : > { %3248 = vmatpush1.msra.mxu0 %v7370_v54  ;;  %3459 = vmatprep.subr.mxu1 %v4435_v8  ;;  %v7376_v8 = vld [vmem:[#allocation105_spill] sm:$0xff]  ;;  %v1536_v54 = vpop.f32.mrf.mxu1 }
 0x4a1   : > { %3252 = vmatprep.subr.mxu0 %v7371_v55  ;;  %3461 = vmatpush1.msra.mxu1 %v4448_v11  ;;  %v7377_v11 = vld [vmem:[#allocation109_spill] sm:$0xff] }
 0x4a2   : > { %3256 = vmatpush1.msra.mxu0 %v7372_v56  ;;  %3463 = vmatprep.subr.mxu1 %v4462_v16  ;;  %v7378_v16 = vld [vmem:[#allocation111_spill] sm:$0xff]  ;;  %v1538_v55 = vpop.f32.mrf.mxu1 }
 0x4a3   : > { %3260 = vmatprep.subr.mxu0 %v7373_v61  ;;  %3465 = vmatpush1.msra.mxu1 %v4486_v25  ;;  %v7379_v25 = vld [vmem:[#allocation115_spill] sm:$0xff] }
 0x4a4   : > { %3264 = vmatpush1.msra.mxu0 %v7374_v63  ;;  %3467 = vmatprep.subr.mxu1 %v4512_v35  ;;  %v7380_v35 = vld [vmem:[#allocation118_spill] sm:$0xff]  ;;  %v1880_v61 = vpop.f32.mrf.mxu1 }
 0x4a5   : > { %3268 = vmatprep.subr.mxu0 %v7375_v6  ;;  %3469 = vmatpush1.msra.mxu1 %v4526_v40  ;;  %v7381_v40 = vld [vmem:[#allocation124_spill] sm:$0xff] }
 0x4a6   : > { %3272 = vmatpush1.msra.mxu0 %v7376_v8  ;;  %3471 = vmatprep.subr.mxu1 %v7007_v41  ;;  %v7382_v41 = vld [vmem:[#allocation127_spill] sm:$0xff]  ;;  %v1882_v63 = vpop.f32.mrf.mxu1 }
 0x4a7   : > { %3276 = vmatprep.subr.mxu0 %v7377_v11  ;;  %3473 = vmatpush1.msra.mxu1 %v7009_v10  ;;  %v7383_v10 = vld [vmem:[#allocation133_spill] sm:$0xff] }
 0x4a8   : > { %3280 = vmatpush1.msra.mxu0 %v7378_v16  ;;  %3475 = vmatprep.subr.mxu1 %v7011_v59  ;;  %v7384_v59 = vld [vmem:[#allocation137_spill] sm:$0xff] }
 0x4a9   : > { %3284 = vmatprep.subr.mxu0 %v7379_v25  ;;  %3477 = vmatpush1.msra.mxu1 %v7013_v36  ;;  %v7385_v36 = vld [vmem:[#allocation141_spill] sm:$0xff] }
 0x4aa   : > { %3288 = vmatpush1.msra.mxu0 %v7380_v35  ;;  %3479 = vmatprep.subr.mxu1 %v7015_v27  ;;  %v7386_v27 = vld [vmem:[#allocation143_spill] sm:$0xff] }
 0x4ab   : > { %3292 = vmatprep.subr.mxu0 %v7381_v40  ;;  %3481 = vmatpush1.msra.mxu1 %v7017_v18  ;;  %v7387_v18 = vld [vmem:[#allocation147_spill] sm:$0xff] }
 0x4ac   : > { %3296 = vmatpush1.msra.mxu0 %v7382_v41  ;;  %3483 = vmatprep.subr.mxu1 %v7019_v37  ;;  %v7388_v37 = vld [vmem:[#allocation150_spill] sm:$0xff] }
 0x4ad   : > { %3300 = vmatprep.subr.mxu0 %v7383_v10  ;;  %3485 = vmatpush1.msra.mxu1 %v7021_v23  ;;  %v7389_v23 = vld [vmem:[#allocation156_spill] sm:$0xff] }
 0x4ae   : > { %3304 = vmatpush2.msra.mxu0 %v7384_v59  ;;  %3487 = vmatprep.subr.mxu1 %v7023_v32  ;;  %v7390_v32 = vld [vmem:[#allocation159_spill] sm:$0xff] }
 0x4af   : > { %3308 = vmatprep.subr.mxu0 %v7385_v36  ;;  %3489 = vmatpush1.msra.mxu1 %v7025_v51  ;;  %v7391_v51 = vld [vmem:[#allocation165_spill] sm:$0xff] }
 0x4b0   : > { %3312 = vmatpush2.msra.mxu0 %v7386_v27  ;;  %3491 = vmatprep.subr.mxu1 %v7027_v22  ;;  %v7392_v22 = vld [vmem:[#allocation169_spill] sm:$0xff] }
 0x4b1   : > { %3316 = vmatprep.subr.mxu0 %v7387_v18  ;;  %3493 = vmatpush1.msra.mxu1 %v7029_v24  ;;  %v7393_v24 = vld [vmem:[#allocation173_spill] sm:$0xff] }
 0x4b2   : > { %3320 = vmatpush2.msra.mxu0 %v7388_v37  ;;  %3495 = vmatprep.subr.mxu1 %v7031_v47  ;;  %v7394_v47 = vld [vmem:[#allocation175_spill] sm:$0xff] }
 0x4b3   : > { %3324 = vmatprep.subr.mxu0 %v7389_v23  ;;  %3497 = vmatpush1.msra.mxu1 %v7033_v39  ;;  %v7395_v39 = vld [vmem:[#allocation179_spill] sm:$0xff] }
 0x4b4   : > { %3328 = vmatpush2.msra.mxu0 %v7390_v32  ;;  %3499 = vmatprep.subr.mxu1 %v7116_v17  ;;  %v7396_v17 = vld [vmem:[#allocation182_spill] sm:$0xff] }
 0x4b5   : > { %3332 = vmatprep.subr.mxu0 %v7391_v51  ;;  %3501 = vmatpush2.msra.mxu1 %v7118_v12  ;;  %v7397_v12 = vld [vmem:[#allocation188_spill] sm:$0xff] }
 0x4b6   : > { %3336 = vmatpush2.msra.mxu0 %v7392_v22  ;;  %3503 = vmatprep.subr.mxu1 %v7120_v2  ;;  %v7398_v2 = vld [vmem:[#allocation191_spill] sm:$0xff] }
 0x4b7   : > { %3340 = vmatprep.subr.mxu0 %v7393_v24  ;;  %3505 = vmatpush2.msra.mxu1 %v7122_v58  ;;  %v7399_v58 = vld [vmem:[#allocation197_spill] sm:$0xff] }
 0x4b8   : > { %3344 = vmatpush2.msra.mxu0 %v7394_v47  ;;  %3507 = vmatprep.subr.mxu1 %v7124_v3  ;;  %v7400_v3 = vld [vmem:[#allocation201_spill] sm:$0xff] }
 0x4b9   : > { %3348 = vmatprep.subr.mxu0 %v7395_v39  ;;  %3509 = vmatpush2.msra.mxu1 %v7126_v31  ;;  %v7402_v31 = vld [vmem:[#allocation205_spill] sm:$0xff] }
 0x4ba   : > { %3352 = vmatpush2.msra.mxu0 %v7396_v17  ;;  %3511 = vmatprep.subr.mxu1 %v7228_v46  ;;  %v7403_v46 = vld [vmem:[#allocation207_spill] sm:$0xff] }
 0x4bb   : > { %3356 = vmatprep.subr.mxu0 %v7397_v12  ;;  %3513 = vmatpush2.msra.mxu1 %v7230_v53  ;;  %v7405_v53 = vld [vmem:[#allocation210_spill] sm:$0xff] }
 0x4bc   : > { %3360 = vmatpush2.msra.mxu0 %v7398_v2  ;;  %3515 = vmatprep.subr.mxu1 %v7317_v28  ;;  %v7407_v28 = vld [vmem:[#allocation215_spill] sm:$0xff] }
 0x4bd   : > { %3364 = vmatprep.subr.mxu0 %v7399_v58  ;;  %3517 = vmatpush2.msra.mxu1 %v7235_v14  ;;  %v7408_v14 = vld [vmem:[#allocation224_spill] sm:$0xff] }
 0x4be   : > { %3368 = vmatpush2.msra.mxu0 %v7400_v3  ;;  %3519 = vmatprep.subr.mxu1 %v7401_v1 }
 0x4bf   : > { %3372 = vmatprep.subr.mxu0 %v7402_v31  ;;  %3521 = vmatpush2.msra.mxu1 %v7321_v7  ;;  %v7411_v7 = vld [vmem:[#allocation234_spill] sm:$0xff] }
 0x4c0   : > { %3376 = vmatpush2.msra.mxu0 %v7403_v46  ;;  %3523 = vmatprep.subr.mxu1 %v7404_v33 }
 0x4c1   : > { %3380 = vmatprep.subr.mxu0 %v7405_v53  ;;  %3525 = vmatpush2.msra.mxu1 %v7406_v45 }
 0x4c2   : > { %3384 = vmatpush2.msra.mxu0 %v7407_v28  ;;  %3527 = vmatprep.subr.mxu1 %v7144_v0  ;;  %v7415_v0 = vld [vmem:[#allocation244_spill] sm:$0xff] }
 0x4c3   : > { %3388 = vmatprep.subr.mxu0 %v7408_v14  ;;  %3529 = vmatpush2.msra.mxu1 %v7328_v13  ;;  %v7416_v13 = vld [vmem:[#allocation251_spill] sm:$0xff] }
 0x4c4   : > { %3392 = vmatpush2.msra.mxu0 %v7409_v20  ;;  %3531 = vmatprep.subr.mxu1 %v7410_v62 }
 0x4c5   : > { %3396 = vmatprep.subr.mxu0 %v7411_v7  ;;  %3533 = vmatpush2.msra.mxu1 %v7331_v9  ;;  %v7420_v9 = vld [vmem:[#allocation259_spill] sm:$0xff] }
 0x4c6   : > { %3400 = vmatpush2.msra.mxu0 %v7412_v52  ;;  %3535 = vmatprep.subr.mxu1 %v7413_v30 }
 0x4c7   : > { %3404 = vmatprep.subr.mxu0 %v7414_v38  ;;  %3537 = vmatpush2.msra.mxu1 %v7254_v29  ;;  %v7424_v29 = vld [vmem:[#allocation43_spill] sm:$0xff] }
 0x4c8   : > { %3408 = vmatpush2.msra.mxu0 %v7415_v0  ;;  %3539 = vmatprep.subr.mxu1 %v7075_v5  ;;  %v7425_v5 = vld [vmem:[#allocation203_spill] sm:$0xff] }
 0x4c9   : > { %3412 = vmatprep.subr.mxu0 %v7416_v13  ;;  %3541 = vmatpush2.msra.mxu1 %v7417_v21  ;;  %v4172_v13 = vmov 1966171168  }
 0x4ca   : > { %3416 = vmatpush2.msra.mxu0 %v7418_v42  ;;  %3543 = vmatprep.subr.mxu1 %v7419_v43  ;;  %v2282_v6 = vpop.f32.mrf.mxu1  ;;  %v3588_v21 = vunpack.c.l.s4 %v4172_v13  ;;  %v3590_v42 = vlaneseq }
 0x4cb   : > { %3420 = vmatprep.subr.mxu0 %v7420_v9  ;;  %3426 = vmatprep.mubr.f32.mxu0 %v7421_v44 }
 0x4cc   : > { %3424 = vmatpush2.msra.mxu0 %v7422_v48  ;;  %3545 = vmatpush2.msra.mxu1 %v7423_v49  ;;  %v2284_v11 = vpop.f32.mrf.mxu1  ;;  %v3589_v43 = vunpack.c.0.s8 %v3588_v21  ;;  %v3591_v9 = vshrl.u32 %v3590_v42, 7 }
 0x4cd   : > { %3428 = vmatmul.mubr.f32.vlgmr.msra.gmra.mxu0 %v7424_v29  ;;  %3547 = vmatprep.subr.mxu1 %v7261_v19  ;;  %v1145_v19 = vpop.f32.mrf.mxu0 }
 0x4ce   : > { %3549 = vmatpush2.msra.mxu1 %v7263_v15  ;;  %3563 = vmatprep.mubr.f32.mxu1 %v7421_v44  ;;  %v3592_v48 = vsub.s32 %v3589_v43, %v3591_v9 }
 0x4cf   : > { %3551 = vmatprep.subr.mxu1 %v7345_v34  ;;  %v1739_v15 = vpop.f32.mrf.mxu0 }
 0x4d0   : > { %3553 = vmatpush2.msra.mxu1 %v7347_v60 }
 0x4d1   : > { %3555 = vmatprep.subr.mxu1 %v7425_v5  ;;  %v1741_v56 = vpop.f32.mrf.mxu0 }
 0x4d2   : > { %3557 = vmatpush2.msra.mxu1 %v5323_v26 }
 0x4d3   : > { %3559 = vmatprep.subr.mxu1 %v7269_v57  ;;  %v2145_v34 = vpop.f32.mrf.mxu0  ;;  %v1537_v57 = vadd.f32 %v1536_v54, %v1143_v50  ;;  %v3579_v50 = vld [vmem:[%s6314_s4] sm:$0x3]  ;;  %v3607_v54 = vsub.s32 0, %v3591_v9 }
 0x4d4   : > { %3561 = vmatpush2.msra.mxu1 %v7271_v4  ;;  %v1539_v4 = vadd.f32 %v1538_v55, %v1145_v19 }
 0x4d5   : > { %3565 = vmatmul.mubr.f32.vlgmr.msra.gmra.mxu1 %v7424_v29  ;;  %v2147_v60 = vpop.f32.mrf.mxu0  ;;  %v1740_v35 = vadd.f32 %v1739_v15, %v1537_v57  ;;  %v3611_v15 = vsub.s32 1, %v3591_v9  ;;  %v4012_v57 = vld [vmem:[#allocation8 + $0x8] sm:$0xff] }
 0x4d6   : > { %v1742_v41 = vadd.f32 %v1741_v56, %v1539_v4  ;;  %v4013_v4 = vld [vmem:[#allocation8 + $0x10] sm:$0xff] }
 0x4d7   : > { %v1881_v10 = vadd.f32 %v1880_v61, %v1740_v35 }
 0x4d8   : > { %v1883_v27 = vadd.f32 %v1882_v63, %v1742_v41  ;;  %v4014_v41 = vld [vmem:[#allocation8 + $0x18] sm:$0xff] }
 0x4d9   : > { %v2146_v18 = vadd.f32 %v2145_v34, %v1881_v10 }
 0x4da   : > { %v2148_v32 = vadd.f32 %v2147_v60, %v1883_v27  ;;  %v4016_v27 = vld [vmem:[#allocation8 + $0x28] sm:$0xff] }
 0x4db   : > { %v2283_v51 = vadd.f32 %v2282_v6, %v2146_v18 }
 0x4dc   : > { %v2285_v39 = vadd.f32 %v2284_v11, %v2148_v32  ;;  %v4018_v32 = vld [vmem:[#allocation8 + $0x38] sm:$0xff] }
 0x4dd   : > { %v3571_v58 = vmul.f32 0.00048828125, %v2283_v51 }
 0x4de   : > { %v3572_v46 = vmul.f32 0.00048828125, %v2285_v39 }
 0x4df   : > { %v3575_v28 = vmul.f32 %v3571_v58, %v3571_v58 }
 0x4e0   : > { %v3576_v62 = vmul.f32 %v3572_v46, %v3572_v46 }
 0x50d   : > { %v2427_v8 = vpop.f32.mrf.mxu0 }
 0x50f   : > { %v2429_v26 = vpop.f32.mrf.mxu0  ;;  %v2820_v16 = vpop.f32.mrf.mxu1 }
 0x510   : > { %v2821_v37 = vadd.f32 %v2820_v16, %v2427_v8  ;;  %v3603_v8 = vld [vmem:[%s6315_s5] sm:$0x3] }
 0x511   : > { %v2822_v40 = vpop.f32.mrf.mxu1 }
 0x512   : > { %v2823_v22 = vadd.f32 %v2822_v40, %v2429_v26  ;;  %v4011_v26 = vld [vmem:[#allocation8] sm:$0xff] }
 0x54d   : > { %v3023_v25 = vpop.f32.mrf.mxu0 }
 0x54e   : > { %v3024_v24 = vadd.f32 %v3023_v25, %v2821_v37  ;;  %v4017_v37 = vld [vmem:[#allocation8 + $0x30] sm:$0xff] }
 0x54f   : > { %v3025_v59 = vpop.f32.mrf.mxu0 }
 0x550   : > { %v3026_v17 = vadd.f32 %v3025_v59, %v2823_v22  ;;  %v4015_v59 = vld [vmem:[#allocation8 + $0x20] sm:$0xff] }
 0x551   : > { %v4019_v22 = vld [vmem:[#allocation8 + $0x40] sm:$0xff] }
 0x553   : > { %v3164_v36 = vpop.f32.mrf.mxu1 }
 0x554   : > { %v3165_v12 = vadd.f32 %v3164_v36, %v3024_v24 }
 0x555   : > { %v3166_v47 = vpop.f32.mrf.mxu1 }
 0x556   : > { %v3167_v3 = vadd.f32 %v3166_v47, %v3026_v17  ;;  %v4020_v47 = vld [vmem:[#allocation8 + $0x48] sm:$0xff]  ;;  %v4021_v17 = vld [vmem:[#allocation8 + $0x50] sm:$0xff] }
 0x58d   : > { %v3429_v23 = vpop.f32.mrf.mxu0 }
 0x58e   : > { %v3430_v1 = vadd.f32 %v3429_v23, %v3165_v12 }
 0x58f   : > { %v3431_v2 = vpop.f32.mrf.mxu0 }
 0x590   : > { %v3432_v33 = vadd.f32 %v3431_v2, %v3167_v3  ;;  %v4022_v2 = vld [vmem:[#allocation8 + $0x58] sm:$0xff] }
 0x595   : > { %v3566_v31 = vpop.f32.mrf.mxu1 }
 0x596   : > { %v3567_v53 = vadd.f32 %v3566_v31, %v3430_v1  ;;  %v4023_v31 = vld [vmem:[#allocation8 + $0x60] sm:$0xff] }
 0x597   : > { %v3568_v45 = vpop.f32.mrf.mxu1 }
 0x598   : > { %v3573_v14 = vmul.f32 0.00048828125, %v3567_v53  ;;  %v3569_v20 = vadd.f32 %v3568_v45, %v3432_v33  ;;  %v4024_v33 = vld [vmem:[#allocation8 + $0x68] sm:$0xff]  ;;  %v4025_v45 = vld [vmem:[#allocation8 + $0x70] sm:$0xff] }
 0x59a   : > { %v3577_v7 = vsub.f32 %v3573_v14, %v3575_v28  ;;  %v3574_v52 = vmul.f32 0.00048828125, %v3569_v20  ;;  %v4026_v14 = vld [vmem:[#allocation8 + $0x78] sm:$0xff] }
 0x59c   : > { %v3580_v30 = vadd.f32 1e-05, %v3577_v7  ;;  %v3578_v38 = vsub.f32 %v3574_v52, %v3576_v62 }
 0x59e   : > { %v3581_v0 = vadd.f32 1e-05, %v3578_v38  ;;  %4007 = vrsqrt.f32 %v3580_v30 }
 0x5a0   : > { %4009 = vrsqrt.f32 %v3581_v0 }
 0x5ab   : > { %v4008_v44 = vpop.eup %4007 }
 0x5ad   : > { %v4010_v49 = vpop.eup %4009 }
 0x5ae   : > { %v3586_v29 = vcombine.low %v4008_v44, %v4010_v49 }
 0x5b0   : > { %v3593_v5 = vrot.slane %v3586_v29, %v3592_v48 }
 0x5b2   : > { %v3600_v19 = vrot.slane %v3593_v5, %v3592_v48 }
 0x5b4   : > { %v3602_v55 = vmul.f32 %v3600_v19, %v3579_v50 }
 0x5b6   : > { %v3608_v56 = vrot.slane %v3602_v55, %v3607_v54  ;;  %v3612_v61 = vrot.slane %v3602_v55, %v3611_v15 }
 0x5b8   : > { %v3615_v34 = vmul.f32 %v3608_v56, %v3571_v58  ;;  %v3616_v63 = vmul.f32 %v3612_v61, %v3572_v46  ;;  %v3636_v16 = vmul.f32 %v4011_v26, %v3608_v56  ;;  %v3637_v25 = vmul.f32 %v4012_v57, %v3612_v61 }
 0x5b9   : > { %v3638_v35 = vmul.f32 %v4013_v4, %v3608_v56  ;;  %v3639_v10 = vmul.f32 %v4014_v41, %v3612_v61  ;;  %v3640_v36 = vmul.f32 %v4015_v59, %v3608_v56  ;;  %v3641_v18 = vmul.f32 %v4016_v27, %v3612_v61 }
 0x5ba   : > { %v3619_v60 = vcombine.low %v3615_v34, %v3616_v63  ;;  %v3642_v23 = vmul.f32 %v4017_v37, %v3608_v56  ;;  %v3643_v51 = vmul.f32 %v4018_v32, %v3612_v61  ;;  %v3644_v24 = vmul.f32 %v4019_v22, %v3608_v56 }
 0x5bb   : > { %v3645_v39 = vmul.f32 %v4020_v47, %v3612_v61  ;;  %v3646_v12 = vmul.f32 %v4021_v17, %v3608_v56  ;;  %v3647_v58 = vmul.f32 %v4022_v2, %v3612_v61  ;;  %v3648_v46 = vmul.f32 %v4023_v31, %v3608_v56 }
 0x5bc   : > { %v3626_v6 = vrot.slane %v3619_v60, %v3592_v48  ;;  %v3649_v53 = vmul.f32 %v4024_v33, %v3612_v61  ;;  %v3650_v28 = vmul.f32 %v4025_v45, %v3608_v56  ;;  %v3651_v20 = vmul.f32 %v4026_v14, %v3612_v61 }
 0x5be   : > { %v3633_v11 = vrot.slane %v3626_v6, %v3592_v48 }
 0x5c0   : > { %v3635_v40 = vsub.f32 %v3603_v8, %v3633_v11 }
 0x5c2   : > { %v3656_v3 = vrot.slane %v3635_v40, %v3607_v54  ;;  %v3660_v1 = vrot.slane %v3635_v40, %v3611_v15 }
 0x5c4   : > { %v3663_v62 = vadd.f32 %v3656_v3, %v3636_v16  ;;  %v3664_v7 = vadd.f32 %v3660_v1, %v3637_v25  ;;  %v3665_v52 = vadd.f32 %v3656_v3, %v3638_v35  ;;  %v3666_v30 = vadd.f32 %v3660_v1, %v3639_v10 }
 0x5c5   : > { %v3667_v38 = vadd.f32 %v3656_v3, %v3640_v36  ;;  %v3668_v0 = vadd.f32 %v3660_v1, %v3641_v18  ;;  %v3669_v13 = vadd.f32 %v3656_v3, %v3642_v23  ;;  %v3670_v21 = vadd.f32 %v3660_v1, %v3643_v51 }
 0x5c6   : > { %v3671_v42 = vadd.f32 %v3656_v3, %v3644_v24  ;;  %v3672_v43 = vadd.f32 %v3660_v1, %v3645_v39  ;;  %v3673_v9 = vadd.f32 %v3656_v3, %v3646_v12  ;;  %v3674_v44 = vadd.f32 %v3660_v1, %v3647_v58 }
 0x5c7   : > { %v3675_v48 = vadd.f32 %v3656_v3, %v3648_v46  ;;  %v3676_v49 = vadd.f32 %v3660_v1, %v3649_v53  ;;  %v3677_v29 = vadd.f32 %v3656_v3, %v3650_v28  ;;  %v3678_v5 = vadd.f32 %v3660_v1, %v3651_v20 }
 0x5c8   : > { %v3679_v50 = vmax.f32 %v3663_v62, 0.0  ;;  %v3680_v19 = vmax.f32 %v3664_v7, 0.0  ;;  %v3681_v54 = vmax.f32 %v3665_v52, 0.0  ;;  %v3682_v15 = vmax.f32 %v3666_v30, 0.0 }
 0x5c9   : > { %v3683_v55 = vmax.f32 %v3667_v38, 0.0  ;;  %v3684_v56 = vmax.f32 %v3668_v0, 0.0  ;;  %v3685_v61 = vmax.f32 %v3669_v13, 0.0  ;;  %v3686_v34 = vmax.f32 %v3670_v21, 0.0 }
 0x5ca   : > { %v3687_v63 = vmax.f32 %v3671_v42, 0.0  ;;  %v3688_v60 = vmax.f32 %v3672_v43, 0.0  ;;  %v3689_v6 = vmax.f32 %v3673_v9, 0.0  ;;  %v3690_v8 = vmax.f32 %v3674_v44, 0.0  ;;  %3695 = vst [vmem:[#allocation8] sm:$0xff] %v3679_v50  ;;  %3696 = vst [vmem:[#allocation8 + $0x8] sm:$0xff] %v3680_v19 }
 0x5cb   : > { %3697 = vst [vmem:[#allocation8 + $0x10] sm:$0xff] %v3681_v54  ;;  %3698 = vst [vmem:[#allocation8 + $0x18] sm:$0xff] %v3682_v15  ;;  %v3691_v11 = vmax.f32 %v3675_v48, 0.0  ;;  %v3692_v26 = vmax.f32 %v3676_v49, 0.0  ;;  %v3693_v16 = vmax.f32 %v3677_v29, 0.0  ;;  %v3694_v57 = vmax.f32 %v3678_v5, 0.0 }
 0x5cc   : > { %3699 = vst [vmem:[#allocation8 + $0x20] sm:$0xff] %v3683_v55  ;;  %3700 = vst [vmem:[#allocation8 + $0x28] sm:$0xff] %v3684_v56 }
 0x5cd   : > { %3701 = vst [vmem:[#allocation8 + $0x30] sm:$0xff] %v3685_v61  ;;  %3702 = vst [vmem:[#allocation8 + $0x38] sm:$0xff] %v3686_v34 }
 0x5ce   : > { %3703 = vst [vmem:[#allocation8 + $0x40] sm:$0xff] %v3687_v63  ;;  %3704 = vst [vmem:[#allocation8 + $0x48] sm:$0xff] %v3688_v60 }
 0x5cf   : > { %3705 = vst [vmem:[#allocation8 + $0x50] sm:$0xff] %v3689_v6  ;;  %3706 = vst [vmem:[#allocation8 + $0x58] sm:$0xff] %v3690_v8 }
 0x5d0   : > { %3707 = vst [vmem:[#allocation8 + $0x60] sm:$0xff] %v3691_v11  ;;  %3708 = vst [vmem:[#allocation8 + $0x68] sm:$0xff] %v3692_v26 }
 0x5d1   : > { %3709 = vst [vmem:[#allocation8 + $0x70] sm:$0xff] %v3693_v16  ;;  %3710 = vst [vmem:[#allocation8 + $0x78] sm:$0xff] %v3694_v57 }
 0x5d2 PF: > { %s7426_s30 = sadd.s32 4294967295, %s4163_s29   ;;  %s4173_s9 = smov [#allocation8]  }
 0x5d3   : > { %p6277_p11 = scmp.eq.s32.totalorder %s7426_s30, 2  ;;  %s3720_s10 = sshll.u32 %s4173_s9, 4  ;;  %s3721_s10 = int_to_ptr.vmem [resolvable:$true] %s3720_s10 }
 0x5d4   : > { %s4081_s12 = scalar_lea.vmem %s3721_s10, 2048  ;;  %p4088_p0 = scmp.lt.s32.totalorder %s3721_s10, %s3721_s10 }
 0x5d5   : > { %p4082_p7 = scmp.ne.s32.totalorder %s3721_s10, %s4081_s12  ;;  %p4089_p2 = scmp.lt.s32.totalorder %s4081_s12, %s4081_s12 }
 0x5d7   : > { %p4083_p12 = pnand %p4082_p7, %p6277_p11  ;;  %p4090_p3 = por %p4089_p2, %p4088_p0 }
 0x5d9   : > { %p4084_p13 = pneg %p4083_p12 }
 0x5db   : > { %p4091_p6 = pnand %p4090_p3, %p4084_p13 }
 0x5dd   : > { %4094 = shalt.err (!%p4091_p6)
}
 0x5de   : > { %s4174_s17 = smov 256   ;;  %s4175_s18 = smov 16  }
 0x5df   : > { %3917 = dma.vmem_to_hbm [thread:$0]  (%p6277_p11), %s3721_s10, 2048, %s6317_s7, [#allocation5], %s4174_s17, %s4174_s17, %s4175_s18  }
 0x5e0   : > { %4138 = dma.done.wait (%p6277_p11), [#allocation5], 2048  }
 0x5e1   : > { %4140 = vsyncadd (%p6277_p11), [#allocation5], 4294965248 }
 0x5e2 PF: > { %s22_s29 = sadd.s32 1, %s4163_s29   ;;  %s7428_s24 = smov %s4147_s25 }
 0x5e3   : > { %p19_p8 = scmp.ge.s32.totalorder %s22_s29, 5   ;;  %s7429_s25 = smov %s4151_s26 }
 0x5e4   : > { %s7430_s26 = smov %s4292_s11  ;;  %s7431_s27 = smov %s4159_s28 }
 0x5e5   : > { %s7432_s28 = smov %s7434_s14  ;;  %21 = sbr.rel (!%p19_p8) target bundleno = 6 (0x6), region = 135 }
 0x5ea   :  { %3736 = vsyncpa [#allocation4], 1 }
 0x5eb   :  { %3738 = vsyncpa [#allocation4 + $0x1], 1 }
 0x5ec   :  { %3739 = vsyncpa [#allocation7], 1 }
 0x5ed   :  { %3740 = vsyncpa [#allocation5], 1 }
 0x5ee   :  { %3742 = vsyncpa [#allocation5 + $0x1], 1 }

</bundles_post_ra>
